<compile_context>
chip_gen: v7x
topology: tpu7x:2x2x1
jax: 0.10.0
libtpu: 0.0.40
codegen_flags: <defaults>
</compile_context>

<pallas_src>
from functools import partial

import jax
import jax.numpy as jnp
from jax.experimental import pallas as pl
from jax.experimental.pallas import tpu as pltpu

_LANES = 128   # channels padded to a multiple of the lane width (lane-dense blocks)
_OFF = 16      # bf16 sublane tile; scratch interior starts here so interior stores are aligned


def _basic_block_kernel(xt_ref, xb_ref, xbt_ref, w1_ref, sc1_ref, sh1_ref,
                        w2_ref, sc2_ref, sh2_ref, out_ref, pad_ref, *, TH, W, C):
    """One (batch, row-tile) grid step.

    Refs:
      xt_ref  : (1, 2,  W, C) bf16  x rows tile_start-2 .. tile_start-1 (clamped at top edge)
      xb_ref  : (1, TH, W, C) bf16  x body tile (rows tile_start .. tile_start+TH-1)
      xbt_ref : (1, 2,  W, C) bf16  x rows tile_start+TH .. tile_start+TH+1 (clamped at bottom)
      w*_ref  : (9*C, C)      bf16  conv weights, tap-major rows (ky, kx, cin)
      sc*/sh* : (1, C)        f32   BN scale / shift (shift includes the conv bias)
      out_ref : (1, TH, W, C) bf16  output tile
      pad_ref : (TH+4, W+2*_OFF, C) bf16 halo scratch; scratch row r holds global row
                tile_start + r - 2; interior columns are [_OFF, _OFF+W).
    conv1 is evaluated on TH+2 output rows (tile +-1) and written back into scratch rows
    1..TH+2 (out-of-image rows forced to zero); conv2 then produces the TH tile rows.
    """
    ti = pl.program_id(1)
    nt = pl.num_programs(1)

    # Zero only the two halo *columns* read by the dx=+-1 taps (cheap, done every step so nothing
    # relies on scratch persistence; every halo row below is rewritten each step).
    zcol = jnp.zeros((TH + 4, 1, C), pad_ref.dtype)
    pad_ref[pl.ds(0, TH + 4), pl.ds(_OFF - 1, 1), :] = zcol
    pad_ref[pl.ds(0, TH + 4), pl.ds(_OFF + W, 1), :] = zcol

    # Fill the scratch interior; halo rows outside the image are zero.
    top = jnp.where(ti > 0, xt_ref[0], jnp.zeros_like(xt_ref[0]))
    bot = jnp.where(ti < nt - 1, xbt_ref[0], jnp.zeros_like(xbt_ref[0]))
    pad_ref[pl.ds(0, 2), pl.ds(_OFF, W), :] = top
    pad_ref[pl.ds(2, TH), pl.ds(_OFF, W), :] = xb_ref[0]
    pad_ref[pl.ds(TH + 2, 2), pl.ds(_OFF, W), :] = bot

    def conv3x3(row0, n_rows, w_ref, sc, sh):
        # 3 accumulating MXU matmuls of K = 3*C (one per kernel row).
        m = n_rows * W
        acc = jnp.zeros((m, C), jnp.float32)
        for dy in range(3):
            taps = jnp.concatenate(
                [pad_ref[pl.ds(row0 + dy, n_rows), pl.ds(_OFF - 1 + dx, W), :].reshape(m, C)
                 for dx in range(3)],
                axis=-1)
            acc = acc + jnp.dot(taps, w_ref[pl.ds(dy * 3 * C, 3 * C), :],
                                preferred_element_type=jnp.float32)
        # BN applied in f32 to the f32 accumulator (scale not folded into bf16 weights).
        return acc * sc + sh

    # ---- conv1 + bn1 + ReLU on TH+2 rows; intermediate never leaves VMEM ----
    out1 = jnp.maximum(conv3x3(0, TH + 2, w1_ref, sc1_ref[0], sh1_ref[0]), 0.0)
    pad_ref[pl.ds(1, TH + 2), pl.ds(_OFF, W), :] = (
        out1.reshape(TH + 2, W, C).astype(pad_ref.dtype))

    # conv2's vertical zero padding: out1 rows falling outside the image must be zero.
    @pl.when(ti == 0)
    def _():
        pad_ref[pl.ds(1, 1), pl.ds(_OFF, W), :] = jnp.zeros((1, W, C), pad_ref.dtype)

    @pl.when(ti == nt - 1)
    def _():
        pad_ref[pl.ds(TH + 2, 1), pl.ds(_OFF, W), :] = jnp.zeros((1, W, C), pad_ref.dtype)

    # ---- conv2 + bn2 + residual add + ReLU on the TH tile rows ----
    pre2 = conv3x3(1, TH, w2_ref, sc2_ref[0], sh2_ref[0])
    res = xb_ref[0].astype(jnp.float32).reshape(TH * W, C)
    out2 = jnp.maximum(pre2 + res, 0.0)
    out_ref[...] = out2.reshape(1, TH, W, C).astype(out_ref.dtype)


def _prep_conv_bn(w, b, gamma, beta, mean, var, eps, c_pad):
    """Pad a (3,3,Cin,Cout) HWIO conv weight to lane width and flatten to tap-major (9*Cp, Cp)
    bf16 rows; return the inference-mode BN as f32 per-channel (scale, shift) such that
    BN(conv(x, w) + b) == conv(x, w_bf16) * scale + shift."""
    cin, cout = w.shape[2], w.shape[3]
    w_p = jnp.pad(w, ((0, 0), (0, 0), (0, c_pad - cin), (0, c_pad - cout)))
    w_p = w_p.reshape(9 * c_pad, c_pad).astype(jnp.bfloat16)
    scale = gamma / jnp.sqrt(var + eps)
    shift = (b - mean) * scale + beta
    scale = jnp.pad(scale, (0, c_pad - cout)).reshape(1, c_pad).astype(jnp.float32)
    shift = jnp.pad(shift, (0, c_pad - cout)).reshape(1, c_pad).astype(jnp.float32)
    return w_p, scale, shift


def _pick_row_tile(H):
    # 8-16 output rows per step keeps the f32 accumulators small (no vreg-spill blowup), bounds
    # per-step VMEM, and gives the grid enough steps to feed v7x's two TensorCores.
    for th in (16, 8, 4, 2):
        if H % th == 0 and H > th:
            return th
    return H


def basic_block_forward(x_nchw, params, eps=1e-3, row_tile=None):
    """BasicBlock forward (stride=1, downsample=None).  x_nchw: (N, C, H, W) float32.
    eps matches the spconv backbone's norm_fn (BatchNorm2d(eps=1e-3))."""
    N, C, H, W = x_nchw.shape
    cout = params["w1"].shape[-1]
    assert C == cout, "stride=1 & downsample=None => residual needs matching channels"
    assert H % 2 == 0, "2-row halo blocks assume even H"  # TODO(synk): odd H needs 1-row halo specs
    TH = row_tile if row_tile is not None else _pick_row_tile(H)
    assert H % TH == 0 and TH % 2 == 0

    c_pad = pl.cdiv(C, _LANES) * _LANES
    # TODO(synk): on v6e/v7x real C=64 wastes MXU width; if MXU-bound, pack at true channel width.

    # NHWC + lane-dense channel padding + bf16 at the kernel boundary (halves HBM bytes).
    x = jnp.transpose(x_nchw, (0, 2, 3, 1))
    x = jnp.pad(x, ((0, 0), (0, 0), (0, 0), (0, c_pad - C))).astype(jnp.bfloat16)

    w1f, sc1, sh1 = _prep_conv_bn(params["w1"], params["b1"], params["g1"], params["be1"],
                                  params["m1"], params["v1"], eps, c_pad)
    w2f, sc2, sh2 = _prep_conv_bn(params["w2"], params["b2"], params["g2"], params["be2"],
                                  params["m2"], params["v2"], eps, c_pad)

    nt = H // TH
    hb = TH // 2   # block-index unit of the 2-row halo specs
    kernel = partial(_basic_block_kernel, TH=TH, W=W, C=c_pad)

    def _const_spec(shape):
        # Constant block index + single buffer: no re-DMA and no double-buffer VMEM for weights.
        return pl.BlockSpec(shape, lambda b, i: (0,) * len(shape),
                            pipeline_mode=pl.Buffered(buffer_count=1))

    out = pl.pallas_call(
        kernel,
        out_shape=jax.ShapeDtypeStruct((N, H, W, c_pad), jnp.bfloat16),
        grid=(N, nt),
        in_specs=[
            # x top halo: 2 rows above the tile (clamped at the top edge, zeroed in-kernel)
            pl.BlockSpec((1, 2, W, c_pad),
                         lambda b, i: (b, jnp.maximum(i * hb - 1, 0), 0, 0)),
            # x body tile
            pl.BlockSpec((1, TH, W, c_pad), lambda b, i: (b, i, 0, 0)),
            # x bottom halo: 2 rows below the tile (clamped at the bottom edge, zeroed in-kernel)
            pl.BlockSpec((1, 2, W, c_pad),
                         lambda b, i: (b, jnp.minimum((i + 1) * hb, H // 2 - 1), 0, 0)),
            _const_spec((9 * c_pad, c_pad)),   # conv1 weight (bf16, tap-major)
            _const_spec((1, c_pad)),           # bn1 scale
            _const_spec((1, c_pad)),           # bn1 shift (incl. conv1 bias)
            _const_spec((9 * c_pad, c_pad)),   # conv2 weight
            _const_spec((1, c_pad)),           # bn2 scale
            _const_spec((1, c_pad)),           # bn2 shift
        ],
        out_specs=pl.BlockSpec((1, TH, W, c_pad), lambda b, i: (b, i, 0, 0)),
        scratch_shapes=[pltpu.VMEM((TH + 4, W + 2 * _OFF, c_pad), jnp.bfloat16)],
        compiler_params=pltpu.CompilerParams(
            # Both axes are independent: megacore may shard either (v7x: 2 TCs busy even at N=1).
            dimension_semantics=("parallel", "parallel"),
            # Conservative cap that fits v7x (64 MiB physical / 32 MiB scoped default).
            # TODO(synk): per-chip sweep of TH / buffering / vmem limit (v5e/v6e have 128 MiB).
            vmem_limit_bytes=32 * 1024 * 1024,
        ),
    )(x, x, x, w1f, sc1, sh1, w2f, sc2, sh2)

    # Final-interface conversion only; keep bf16/NHWC end-to-end when chaining blocks.
    out = out[..., :C].astype(jnp.float32)
    return jnp.transpose(out, (0, 3, 1, 2))


def _reference_forward(x_nchw, params, eps=1e-3):
    """Pure-JAX f32 reference of the PyTorch module (for validation)."""
    def conv_bn(x, w, b, g, be, m, v):
        y = jax.lax.conv_general_dilated(
            x, w, window_strides=(1, 1), padding="SAME",
            dimension_numbers=("NCHW", "HWIO", "NCHW"))
        y = y + b[None, :, None, None]
        inv = g / jnp.sqrt(v + eps)
        return (y - m[None, :, None, None]) * inv[None, :, None, None] + be[None, :, None, None]

    out = jax.nn.relu(conv_bn(x_nchw, params["w1"], params["b1"], params["g1"],
                              params["be1"], params["m1"], params["v1"]))
    out = conv_bn(out, params["w2"], params["b2"], params["g2"],
                  params["be2"], params["m2"], params["v2"])
    return jax.nn.relu(out + x_nchw)


def init_params(key, inplanes, planes):
    """Deterministic synthetic parameters matching the module's shapes.
    Conv weights stored HWIO (3, 3, Cin, Cout); PyTorch uses OIHW (same data, different layout)."""
    ks = jax.random.split(key, 12)
    p = {}
    p["w1"] = 0.1 * jax.random.normal(ks[0], (3, 3, inplanes, planes), jnp.float32)
    p["b1"] = 0.1 * jax.random.normal(ks[1], (planes,), jnp.float32)
    p["g1"] = 1.0 + 0.05 * jax.random.normal(ks[2], (planes,), jnp.float32)
    p["be1"] = 0.05 * jax.random.normal(ks[3], (planes,), jnp.float32)
    p["m1"] = 0.05 * jax.random.normal(ks[4], (planes,), jnp.float32)
    p["v1"] = jnp.abs(1.0 + 0.05 * jax.random.normal(ks[5], (planes,), jnp.float32))
    p["w2"] = 0.1 * jax.random.normal(ks[6], (3, 3, planes, planes), jnp.float32)
    p["b2"] = 0.1 * jax.random.normal(ks[7], (planes,), jnp.float32)
    p["g2"] = 1.0 + 0.05 * jax.random.normal(ks[8], (planes,), jnp.float32)
    p["be2"] = 0.05 * jax.random.normal(ks[9], (planes,), jnp.float32)
    p["m2"] = 0.05 * jax.random.normal(ks[10], (planes,), jnp.float32)
    p["v2"] = jnp.abs(1.0 + 0.05 * jax.random.normal(ks[11], (planes,), jnp.float32))
    return p
    # TODO(synk): training-mode BatchNorm (batch statistics + running-stat updates) is not
    # implemented; inference-mode BN (running stats) is applied as a per-channel f32 scale+shift.


if __name__ == "__main__":
    key = jax.random.PRNGKey(0)
    k_x, k_p = jax.random.split(key)

    N, C, H, W = 2, 4, 16, 16          # inplanes == planes, stride=1, downsample=None
    x = jax.random.normal(k_x, (N, C, H, W), jnp.float32)
    params = init_params(k_p, inplanes=C, planes=C)

    fwd = jax.jit(basic_block_forward)
    out = fwd(x, params)
    jax.block_until_ready(out)
    assert out.shape == (N, C, H, W) and out.dtype == jnp.float32

    ref = _reference_forward(x, params)
    assert jnp.allclose(out, ref, atol=5e-2, rtol=5e-2), \
        f"max abs err {jnp.max(jnp.abs(out - ref)):.4f}"
    print("KERNEL_OK")
</pallas_src>

<mosaic_0001>
module attributes {stable_mosaic.version = 11 : i64} {
  func.func @_basic_block_kernel(%arg0: i32, %arg1: i32, %arg2: memref<1x2x16x128xbf16, #tpu.memory_space<vmem>>, %arg3: memref<1x8x16x128xbf16, #tpu.memory_space<vmem>>, %arg4: memref<1x2x16x128xbf16, #tpu.memory_space<vmem>>, %arg5: memref<1152x128xbf16, #tpu.memory_space<vmem>>, %arg6: memref<1x128xf32, #tpu.memory_space<vmem>>, %arg7: memref<1x128xf32, #tpu.memory_space<vmem>>, %arg8: memref<1152x128xbf16, #tpu.memory_space<vmem>>, %arg9: memref<1x128xf32, #tpu.memory_space<vmem>>, %arg10: memref<1x128xf32, #tpu.memory_space<vmem>>, %arg11: memref<1x8x16x128xbf16, #tpu.memory_space<vmem>>, %arg12: memref<12x48x128xbf16, #tpu.memory_space<vmem>>) attributes {dimension_semantics = [#tpu.dimension_semantics<parallel>, #tpu.dimension_semantics<parallel>], iteration_bounds = array<i64: 2, 2>, scalar_prefetch = 0 : i64, scratch_operands = 1 : i64, tpu.core_type = #tpu.core_type<tc>, window_params = [{transform_indices = @transform_0, window_bounds = array<i64: 1, 2, 16, 128>}, {transform_indices = @transform_1, window_bounds = array<i64: 1, 8, 16, 128>}, {transform_indices = @transform_2, window_bounds = array<i64: 1, 2, 16, 128>}, {pipeline_mode = #tpu.pipeline_mode<synchronous>, transform_indices = @transform_3, window_bounds = array<i64: 1152, 128>}, {pipeline_mode = #tpu.pipeline_mode<synchronous>, transform_indices = @transform_4, window_bounds = array<i64: 1, 128>}, {pipeline_mode = #tpu.pipeline_mode<synchronous>, transform_indices = @transform_5, window_bounds = array<i64: 1, 128>}, {pipeline_mode = #tpu.pipeline_mode<synchronous>, transform_indices = @transform_6, window_bounds = array<i64: 1152, 128>}, {pipeline_mode = #tpu.pipeline_mode<synchronous>, transform_indices = @transform_7, window_bounds = array<i64: 1, 128>}, {pipeline_mode = #tpu.pipeline_mode<synchronous>, transform_indices = @transform_8, window_bounds = array<i64: 1, 128>}, {transform_indices = @transform_9, window_bounds = array<i64: 1, 8, 16, 128>}]} {
    %cst = arith.constant 0.000000e+00 : bf16
    %0 = vector.broadcast %cst : bf16 to vector<12x1x128xbf16>
    %c0 = arith.constant 0 : index
    %c15 = arith.constant 15 : index
    %c0_0 = arith.constant 0 : index
    %1 = vector.load %arg12[%c0, %c15, %c0_0] : memref<12x48x128xbf16, #tpu.memory_space<vmem>>, vector<12x1x128xbf16>
    tpu.vector_store %arg12[%c0, %c15, %c0_0], %0 {strides = array<i32>} : memref<12x48x128xbf16, #tpu.memory_space<vmem>>, vector<12x1x128xbf16>,
    %c0_1 = arith.constant 0 : index
    %c32 = arith.constant 32 : index
    %c0_2 = arith.constant 0 : index
    %2 = vector.load %arg12[%c0_1, %c32, %c0_2] : memref<12x48x128xbf16, #tpu.memory_space<vmem>>, vector<12x1x128xbf16>
    tpu.vector_store %arg12[%c0_1, %c32, %c0_2], %0 {strides = array<i32>} : memref<12x48x128xbf16, #tpu.memory_space<vmem>>, vector<12x1x128xbf16>,
    %c0_i32 = arith.constant 0 : i32
    %3 = arith.cmpi sgt, %arg1, %c0_i32 : i32
    %c0_3 = arith.constant 0 : index
    %c0_4 = arith.constant 0 : index
    %c0_5 = arith.constant 0 : index
    %c0_6 = arith.constant 0 : index
    %4 = vector.load %arg2[%c0_3, %c0_4, %c0_5, %c0_6] : memref<1x2x16x128xbf16, #tpu.memory_space<vmem>>, vector<1x2x16x128xbf16>
    %5 = vector.shape_cast %4 : vector<1x2x16x128xbf16> to vector<2x16x128xbf16>
    %cst_7 = arith.constant 0.000000e+00 : bf16
    %6 = vector.broadcast %cst_7 : bf16 to vector<2x16x128xbf16>
    %7 = arith.select %3, %5, %6 : vector<2x16x128xbf16>
    %c1_i32 = arith.constant 1 : i32
    %8 = arith.cmpi slt, %arg1, %c1_i32 : i32
    %c0_8 = arith.constant 0 : index
    %c0_9 = arith.constant 0 : index
    %c0_10 = arith.constant 0 : index
    %c0_11 = arith.constant 0 : index
    %9 = vector.load %arg4[%c0_8, %c0_9, %c0_10, %c0_11] : memref<1x2x16x128xbf16, #tpu.memory_space<vmem>>, vector<1x2x16x128xbf16>
    %10 = vector.shape_cast %9 : vector<1x2x16x128xbf16> to vector<2x16x128xbf16>
    %cst_12 = arith.constant 0.000000e+00 : bf16
    %11 = vector.broadcast %cst_12 : bf16 to vector<2x16x128xbf16>
    %12 = arith.select %8, %10, %11 : vector<2x16x128xbf16>
    %c0_13 = arith.constant 0 : index
    %c16 = arith.constant 16 : index
    %c0_14 = arith.constant 0 : index
    %13 = vector.load %arg12[%c0_13, %c16, %c0_14] : memref<12x48x128xbf16, #tpu.memory_space<vmem>>, vector<2x16x128xbf16>
    tpu.vector_store %arg12[%c0_13, %c16, %c0_14], %7 {strides = array<i32>} : memref<12x48x128xbf16, #tpu.memory_space<vmem>>, vector<2x16x128xbf16>,
    %c0_15 = arith.constant 0 : index
    %c0_16 = arith.constant 0 : index
    %c0_17 = arith.constant 0 : index
    %c0_18 = arith.constant 0 : index
    %14 = vector.load %arg3[%c0_15, %c0_16, %c0_17, %c0_18] : memref<1x8x16x128xbf16, #tpu.memory_space<vmem>>, vector<1x8x16x128xbf16>
    %15 = vector.shape_cast %14 : vector<1x8x16x128xbf16> to vector<8x16x128xbf16>
    %c2 = arith.constant 2 : index
    %c16_19 = arith.constant 16 : index
    %c0_20 = arith.constant 0 : index
    %16 = vector.load %arg12[%c2, %c16_19, %c0_20] : memref<12x48x128xbf16, #tpu.memory_space<vmem>>, vector<8x16x128xbf16>
    tpu.vector_store %arg12[%c2, %c16_19, %c0_20], %15 {strides = array<i32>} : memref<12x48x128xbf16, #tpu.memory_space<vmem>>, vector<8x16x128xbf16>,
    %c10 = arith.constant 10 : index
    %c16_21 = arith.constant 16 : index
    %c0_22 = arith.constant 0 : index
    %17 = vector.load %arg12[%c10, %c16_21, %c0_22] : memref<12x48x128xbf16, #tpu.memory_space<vmem>>, vector<2x16x128xbf16>
    tpu.vector_store %arg12[%c10, %c16_21, %c0_22], %12 {strides = array<i32>} : memref<12x48x128xbf16, #tpu.memory_space<vmem>>, vector<2x16x128xbf16>,
    %c0_23 = arith.constant 0 : index
    %c0_24 = arith.constant 0 : index
    %18 = vector.load %arg6[%c0_23, %c0_24] : memref<1x128xf32, #tpu.memory_space<vmem>>, vector<1x128xf32>
    %19 = vector.shape_cast %18 : vector<1x128xf32> to vector<128xf32>
    %c0_25 = arith.constant 0 : index
    %c0_26 = arith.constant 0 : index
    %20 = vector.load %arg7[%c0_25, %c0_26] : memref<1x128xf32, #tpu.memory_space<vmem>>, vector<1x128xf32>
    %21 = vector.shape_cast %20 : vector<1x128xf32> to vector<128xf32>
    %cst_27 = arith.constant 0.000000e+00 : f32
    %22 = vector.broadcast %cst_27 : f32 to vector<160x128xf32>
    %c0_28 = arith.constant 0 : index
    %c15_29 = arith.constant 15 : index
    %c0_30 = arith.constant 0 : index
    %23 = vector.load %arg12[%c0_28, %c15_29, %c0_30] : memref<12x48x128xbf16, #tpu.memory_space<vmem>>, vector<10x16x128xbf16>
    %24 = vector.shape_cast %23 : vector<10x16x128xbf16> to vector<160x128xbf16>
    %c0_31 = arith.constant 0 : index
    %c16_32 = arith.constant 16 : index
    %c0_33 = arith.constant 0 : index
    %25 = vector.load %arg12[%c0_31, %c16_32, %c0_33] : memref<12x48x128xbf16, #tpu.memory_space<vmem>>, vector<10x16x128xbf16>
    %26 = vector.shape_cast %25 : vector<10x16x128xbf16> to vector<160x128xbf16>
    %c0_34 = arith.constant 0 : index
    %c17 = arith.constant 17 : index
    %c0_35 = arith.constant 0 : index
    %27 = vector.load %arg12[%c0_34, %c17, %c0_35] : memref<12x48x128xbf16, #tpu.memory_space<vmem>>, vector<10x16x128xbf16>
    %28 = vector.shape_cast %27 : vector<10x16x128xbf16> to vector<160x128xbf16>
    %29 = tpu.concatenate %24, %26, %28 in 1 : vector<160x128xbf16>, vector<160x128xbf16>, vector<160x128xbf16> -> vector<160x384xbf16>
    %c0_36 = arith.constant 0 : index
    %c0_37 = arith.constant 0 : index
    %30 = vector.load %arg5[%c0_36, %c0_37] : memref<1152x128xbf16, #tpu.memory_space<vmem>>, vector<384x128xbf16>
    %cst_38 = arith.constant dense<0.000000e+00> : vector<160x128xf32>
    %31 = tpu.matmul %29, %30, %cst_38 {dimension_numbers = #tpu.dot_dimension_numbers<[1], [0], [0], [1], [0, 0, 1, 1], [], []>} : vector<160x384xbf16>, vector<384x128xbf16>, vector<160x128xf32> -> vector<160x128xf32>
    %32 = arith.addf %22, %31 : vector<160x128xf32>
    %c1 = arith.constant 1 : index
    %c15_39 = arith.constant 15 : index
    %c0_40 = arith.constant 0 : index
    %33 = vector.load %arg12[%c1, %c15_39, %c0_40] : memref<12x48x128xbf16, #tpu.memory_space<vmem>>, vector<10x16x128xbf16>
    %34 = vector.shape_cast %33 : vector<10x16x128xbf16> to vector<160x128xbf16>
    %c1_41 = arith.constant 1 : index
    %c16_42 = arith.constant 16 : index
    %c0_43 = arith.constant 0 : index
    %35 = vector.load %arg12[%c1_41, %c16_42, %c0_43] : memref<12x48x128xbf16, #tpu.memory_space<vmem>>, vector<10x16x128xbf16>
    %36 = vector.shape_cast %35 : vector<10x16x128xbf16> to vector<160x128xbf16>
    %c1_44 = arith.constant 1 : index
    %c17_45 = arith.constant 17 : index
    %c0_46 = arith.constant 0 : index
    %37 = vector.load %arg12[%c1_44, %c17_45, %c0_46] : memref<12x48x128xbf16, #tpu.memory_space<vmem>>, vector<10x16x128xbf16>
    %38 = vector.shape_cast %37 : vector<10x16x128xbf16> to vector<160x128xbf16>
    %39 = tpu.concatenate %34, %36, %38 in 1 : vector<160x128xbf16>, vector<160x128xbf16>, vector<160x128xbf16> -> vector<160x384xbf16>
    %c384 = arith.constant 384 : index
    %c0_47 = arith.constant 0 : index
    %40 = vector.load %arg5[%c384, %c0_47] : memref<1152x128xbf16, #tpu.memory_space<vmem>>, vector<384x128xbf16>
    %cst_48 = arith.constant dense<0.000000e+00> : vector<160x128xf32>
    %41 = tpu.matmul %39, %40, %cst_48 {dimension_numbers = #tpu.dot_dimension_numbers<[1], [0], [0], [1], [0, 0, 1, 1], [], []>} : vector<160x384xbf16>, vector<384x128xbf16>, vector<160x128xf32> -> vector<160x128xf32>
    %42 = arith.addf %32, %41 : vector<160x128xf32>
    %c2_49 = arith.constant 2 : index
    %c15_50 = arith.constant 15 : index
    %c0_51 = arith.constant 0 : index
    %43 = vector.load %arg12[%c2_49, %c15_50, %c0_51] : memref<12x48x128xbf16, #tpu.memory_space<vmem>>, vector<10x16x128xbf16>
    %44 = vector.shape_cast %43 : vector<10x16x128xbf16> to vector<160x128xbf16>
    %c2_52 = arith.constant 2 : index
    %c16_53 = arith.constant 16 : index
    %c0_54 = arith.constant 0 : index
    %45 = vector.load %arg12[%c2_52, %c16_53, %c0_54] : memref<12x48x128xbf16, #tpu.memory_space<vmem>>, vector<10x16x128xbf16>
    %46 = vector.shape_cast %45 : vector<10x16x128xbf16> to vector<160x128xbf16>
    %c2_55 = arith.constant 2 : index
    %c17_56 = arith.constant 17 : index
    %c0_57 = arith.constant 0 : index
    %47 = vector.load %arg12[%c2_55, %c17_56, %c0_57] : memref<12x48x128xbf16, #tpu.memory_space<vmem>>, vector<10x16x128xbf16>
    %48 = vector.shape_cast %47 : vector<10x16x128xbf16> to vector<160x128xbf16>
    %49 = tpu.concatenate %44, %46, %48 in 1 : vector<160x128xbf16>, vector<160x128xbf16>, vector<160x128xbf16> -> vector<160x384xbf16>
    %c768 = arith.constant 768 : index
    %c0_58 = arith.constant 0 : index
    %50 = vector.load %arg5[%c768, %c0_58] : memref<1152x128xbf16, #tpu.memory_space<vmem>>, vector<384x128xbf16>
    %cst_59 = arith.constant dense<0.000000e+00> : vector<160x128xf32>
    %51 = tpu.matmul %49, %50, %cst_59 {dimension_numbers = #tpu.dot_dimension_numbers<[1], [0], [0], [1], [0, 0, 1, 1], [], []>} : vector<160x384xbf16>, vector<384x128xbf16>, vector<160x128xf32> -> vector<160x128xf32>
    %52 = arith.addf %42, %51 : vector<160x128xf32>
    %53 = vector.shape_cast %19 : vector<128xf32> to vector<1x128xf32>
    %54 = vector.broadcast %53 : vector<1x128xf32> to vector<160x128xf32>
    %55 = arith.mulf %52, %54 : vector<160x128xf32>
    %56 = vector.shape_cast %21 : vector<128xf32> to vector<1x128xf32>
    %57 = vector.broadcast %56 : vector<1x128xf32> to vector<160x128xf32>
    %58 = arith.addf %55, %57 : vector<160x128xf32>
    %cst_60 = arith.constant 0.000000e+00 : f32
    %59 = vector.broadcast %cst_60 : f32 to vector<160x128xf32>
    %60 = arith.maximumf %58, %59 : vector<160x128xf32>
    %61 = vector.shape_cast %60 : vector<160x128xf32> to vector<10x16x128xf32>
    %62 = arith.truncf %61 : vector<10x16x128xf32> to vector<10x16x128xbf16>
    %c1_61 = arith.constant 1 : index
    %c16_62 = arith.constant 16 : index
    %c0_63 = arith.constant 0 : index
    %63 = vector.load %arg12[%c1_61, %c16_62, %c0_63] : memref<12x48x128xbf16, #tpu.memory_space<vmem>>, vector<10x16x128xbf16>
    tpu.vector_store %arg12[%c1_61, %c16_62, %c0_63], %62 {strides = array<i32>} : memref<12x48x128xbf16, #tpu.memory_space<vmem>>, vector<10x16x128xbf16>,
    %c0_i32_64 = arith.constant 0 : i32
    %64 = arith.cmpi eq, %arg1, %c0_i32_64 : i32
    %65 = arith.extui %64 : i1 to i32
    %c0_i32_65 = arith.constant 0 : i32
    %66 = arith.cmpi ne, %65, %c0_i32_65 : i32
    scf.if %66 {
      %cst_117 = arith.constant 0.000000e+00 : bf16
      %121 = vector.broadcast %cst_117 : bf16 to vector<1x16x128xbf16>
      %c1_118 = arith.constant 1 : index
      %c16_119 = arith.constant 16 : index
      %c0_120 = arith.constant 0 : index
      %122 = vector.load %arg12[%c1_118, %c16_119, %c0_120] : memref<12x48x128xbf16, #tpu.memory_space<vmem>>, vector<1x16x128xbf16>
      tpu.vector_store %arg12[%c1_118, %c16_119, %c0_120], %121 {strides = array<i32>} : memref<12x48x128xbf16, #tpu.memory_space<vmem>>, vector<1x16x128xbf16>,
    } else {
    }
    %c1_i32_66 = arith.constant 1 : i32
    %67 = arith.cmpi eq, %arg1, %c1_i32_66 : i32
    %68 = arith.extui %67 : i1 to i32
    %c0_i32_67 = arith.constant 0 : i32
    %69 = arith.cmpi ne, %68, %c0_i32_67 : i32
    scf.if %69 {
      %cst_117 = arith.constant 0.000000e+00 : bf16
      %121 = vector.broadcast %cst_117 : bf16 to vector<1x16x128xbf16>
      %c10_118 = arith.constant 10 : index
      %c16_119 = arith.constant 16 : index
      %c0_120 = arith.constant 0 : index
      %122 = vector.load %arg12[%c10_118, %c16_119, %c0_120] : memref<12x48x128xbf16, #tpu.memory_space<vmem>>, vector<1x16x128xbf16>
      tpu.vector_store %arg12[%c10_118, %c16_119, %c0_120], %121 {strides = array<i32>} : memref<12x48x128xbf16, #tpu.memory_space<vmem>>, vector<1x16x128xbf16>,
    } else {
    }
    %c0_68 = arith.constant 0 : index
    %c0_69 = arith.constant 0 : index
    %70 = vector.load %arg9[%c0_68, %c0_69] : memref<1x128xf32, #tpu.memory_space<vmem>>, vector<1x128xf32>
    %71 = vector.shape_cast %70 : vector<1x128xf32> to vector<128xf32>
    %c0_70 = arith.constant 0 : index
    %c0_71 = arith.constant 0 : index
    %72 = vector.load %arg10[%c0_70, %c0_71] : memref<1x128xf32, #tpu.memory_space<vmem>>, vector<1x128xf32>
    %73 = vector.shape_cast %72 : vector<1x128xf32> to vector<128xf32>
    %cst_72 = arith.constant 0.000000e+00 : f32
    %74 = vector.broadcast %cst_72 : f32 to vector<128x128xf32>
    %c1_73 = arith.constant 1 : index
    %c15_74 = arith.constant 15 : index
    %c0_75 = arith.constant 0 : index
    %75 = vector.load %arg12[%c1_73, %c15_74, %c0_75] : memref<12x48x128xbf16, #tpu.memory_space<vmem>>, vector<8x16x128xbf16>
    %76 = vector.shape_cast %75 : vector<8x16x128xbf16> to vector<128x128xbf16>
    %c1_76 = arith.constant 1 : index
    %c16_77 = arith.constant 16 : index
    %c0_78 = arith.constant 0 : index
    %77 = vector.load %arg12[%c1_76, %c16_77, %c0_78] : memref<12x48x128xbf16, #tpu.memory_space<vmem>>, vector<8x16x128xbf16>
    %78 = vector.shape_cast %77 : vector<8x16x128xbf16> to vector<128x128xbf16>
    %c1_79 = arith.constant 1 : index
    %c17_80 = arith.constant 17 : index
    %c0_81 = arith.constant 0 : index
    %79 = vector.load %arg12[%c1_79, %c17_80, %c0_81] : memref<12x48x128xbf16, #tpu.memory_space<vmem>>, vector<8x16x128xbf16>
    %80 = vector.shape_cast %79 : vector<8x16x128xbf16> to vector<128x128xbf16>
    %81 = tpu.concatenate %76, %78, %80 in 1 : vector<128x128xbf16>, vector<128x128xbf16>, vector<128x128xbf16> -> vector<128x384xbf16>
    %c0_82 = arith.constant 0 : index
    %c0_83 = arith.constant 0 : index
    %82 = vector.load %arg8[%c0_82, %c0_83] : memref<1152x128xbf16, #tpu.memory_space<vmem>>, vector<384x128xbf16>
    %cst_84 = arith.constant dense<0.000000e+00> : vector<128x128xf32>
    %83 = tpu.matmul %81, %82, %cst_84 {dimension_numbers = #tpu.dot_dimension_numbers<[1], [0], [0], [1], [0, 0, 1, 1], [], []>} : vector<128x384xbf16>, vector<384x128xbf16>, vector<128x128xf32> -> vector<128x128xf32>
    %84 = arith.addf %74, %83 : vector<128x128xf32>
    %c2_85 = arith.constant 2 : index
    %c15_86 = arith.constant 15 : index
    %c0_87 = arith.constant 0 : index
    %85 = vector.load %arg12[%c2_85, %c15_86, %c0_87] : memref<12x48x128xbf16, #tpu.memory_space<vmem>>, vector<8x16x128xbf16>
    %86 = vector.shape_cast %85 : vector<8x16x128xbf16> to vector<128x128xbf16>
    %c2_88 = arith.constant 2 : index
    %c16_89 = arith.constant 16 : index
    %c0_90 = arith.constant 0 : index
    %87 = vector.load %arg12[%c2_88, %c16_89, %c0_90] : memref<12x48x128xbf16, #tpu.memory_space<vmem>>, vector<8x16x128xbf16>
    %88 = vector.shape_cast %87 : vector<8x16x128xbf16> to vector<128x128xbf16>
    %c2_91 = arith.constant 2 : index
    %c17_92 = arith.constant 17 : index
    %c0_93 = arith.constant 0 : index
    %89 = vector.load %arg12[%c2_91, %c17_92, %c0_93] : memref<12x48x128xbf16, #tpu.memory_space<vmem>>, vector<8x16x128xbf16>
    %90 = vector.shape_cast %89 : vector<8x16x128xbf16> to vector<128x128xbf16>
    %91 = tpu.concatenate %86, %88, %90 in 1 : vector<128x128xbf16>, vector<128x128xbf16>, vector<128x128xbf16> -> vector<128x384xbf16>
    %c384_94 = arith.constant 384 : index
    %c0_95 = arith.constant 0 : index
    %92 = vector.load %arg8[%c384_94, %c0_95] : memref<1152x128xbf16, #tpu.memory_space<vmem>>, vector<384x128xbf16>
    %cst_96 = arith.constant dense<0.000000e+00> : vector<128x128xf32>
    %93 = tpu.matmul %91, %92, %cst_96 {dimension_numbers = #tpu.dot_dimension_numbers<[1], [0], [0], [1], [0, 0, 1, 1], [], []>} : vector<128x384xbf16>, vector<384x128xbf16>, vector<128x128xf32> -> vector<128x128xf32>
    %94 = arith.addf %84, %93 : vector<128x128xf32>
    %c3 = arith.constant 3 : index
    %c15_97 = arith.constant 15 : index
    %c0_98 = arith.constant 0 : index
    %95 = vector.load %arg12[%c3, %c15_97, %c0_98] : memref<12x48x128xbf16, #tpu.memory_space<vmem>>, vector<8x16x128xbf16>
    %96 = vector.shape_cast %95 : vector<8x16x128xbf16> to vector<128x128xbf16>
    %c3_99 = arith.constant 3 : index
    %c16_100 = arith.constant 16 : index
    %c0_101 = arith.constant 0 : index
    %97 = vector.load %arg12[%c3_99, %c16_100, %c0_101] : memref<12x48x128xbf16, #tpu.memory_space<vmem>>, vector<8x16x128xbf16>
    %98 = vector.shape_cast %97 : vector<8x16x128xbf16> to vector<128x128xbf16>
    %c3_102 = arith.constant 3 : index
    %c17_103 = arith.constant 17 : index
    %c0_104 = arith.constant 0 : index
    %99 = vector.load %arg12[%c3_102, %c17_103, %c0_104] : memref<12x48x128xbf16, #tpu.memory_space<vmem>>, vector<8x16x128xbf16>
    %100 = vector.shape_cast %99 : vector<8x16x128xbf16> to vector<128x128xbf16>
    %101 = tpu.concatenate %96, %98, %100 in 1 : vector<128x128xbf16>, vector<128x128xbf16>, vector<128x128xbf16> -> vector<128x384xbf16>
    %c768_105 = arith.constant 768 : index
    %c0_106 = arith.constant 0 : index
    %102 = vector.load %arg8[%c768_105, %c0_106] : memref<1152x128xbf16, #tpu.memory_space<vmem>>, vector<384x128xbf16>
    %cst_107 = arith.constant dense<0.000000e+00> : vector<128x128xf32>
    %103 = tpu.matmul %101, %102, %cst_107 {dimension_numbers = #tpu.dot_dimension_numbers<[1], [0], [0], [1], [0, 0, 1, 1], [], []>} : vector<128x384xbf16>, vector<384x128xbf16>, vector<128x128xf32> -> vector<128x128xf32>
    %104 = arith.addf %94, %103 : vector<128x128xf32>
    %105 = vector.shape_cast %71 : vector<128xf32> to vector<1x128xf32>
    %106 = vector.broadcast %105 : vector<1x128xf32> to vector<128x128xf32>
    %107 = arith.mulf %104, %106 : vector<128x128xf32>
    %108 = vector.shape_cast %73 : vector<128xf32> to vector<1x128xf32>
    %109 = vector.broadcast %108 : vector<1x128xf32> to vector<128x128xf32>
    %110 = arith.addf %107, %109 : vector<128x128xf32>
    %c0_108 = arith.constant 0 : index
    %c0_109 = arith.constant 0 : index
    %c0_110 = arith.constant 0 : index
    %c0_111 = arith.constant 0 : index
    %111 = vector.load %arg3[%c0_108, %c0_109, %c0_110, %c0_111] : memref<1x8x16x128xbf16, #tpu.memory_space<vmem>>, vector<1x8x16x128xbf16>
    %112 = vector.shape_cast %111 : vector<1x8x16x128xbf16> to vector<8x16x128xbf16>
    %113 = arith.extf %112 : vector<8x16x128xbf16> to vector<8x16x128xf32>
    %114 = vector.shape_cast %113 : vector<8x16x128xf32> to vector<128x128xf32>
    %115 = arith.addf %110, %114 : vector<128x128xf32>
    %cst_112 = arith.constant 0.000000e+00 : f32
    %116 = vector.broadcast %cst_112 : f32 to vector<128x128xf32>
    %117 = arith.maximumf %115, %116 : vector<128x128xf32>
    %118 = vector.shape_cast %117 : vector<128x128xf32> to vector<1x8x16x128xf32>
    %119 = arith.truncf %118 : vector<1x8x16x128xf32> to vector<1x8x16x128xbf16>
    %c0_113 = arith.constant 0 : index
    %c0_114 = arith.constant 0 : index
    %c0_115 = arith.constant 0 : index
    %c0_116 = arith.constant 0 : index
    %120 = vector.load %arg11[%c0_113, %c0_114, %c0_115, %c0_116] : memref<1x8x16x128xbf16, #tpu.memory_space<vmem>>, vector<1x8x16x128xbf16>
    tpu.vector_store %arg11[%c0_113, %c0_114, %c0_115, %c0_116], %119 {strides = array<i32>} : memref<1x8x16x128xbf16, #tpu.memory_space<vmem>>, vector<1x8x16x128xbf16>,
    return
  }
  func.func @transform_0(%arg0: i32, %arg1: i32) -> (i32, i32, i32, i32) {
    %c4_i32 = arith.constant 4 : i32
    %0 = arith.muli %arg1, %c4_i32 : i32
    %c1_i32 = arith.constant 1 : i32
    %1 = arith.subi %0, %c1_i32 : i32
    %c0_i32 = arith.constant 0 : i32
    %2 = arith.maxsi %1, %c0_i32 : i32
    %c0_i32_0 = arith.constant 0 : i32
    %c0_i32_1 = arith.constant 0 : i32
    %c0_i32_2 = arith.constant 0 : i32
    return %arg0, %2, %c0_i32_0, %c0_i32_1 : i32, i32, i32, i32
  }
  func.func @transform_1(%arg0: i32, %arg1: i32) -> (i32, i32, i32, i32) {
    %c0_i32 = arith.constant 0 : i32
    %c0_i32_0 = arith.constant 0 : i32
    %c0_i32_1 = arith.constant 0 : i32
    return %arg0, %arg1, %c0_i32, %c0_i32_0 : i32, i32, i32, i32
  }
  func.func @transform_2(%arg0: i32, %arg1: i32) -> (i32, i32, i32, i32) {
    %c1_i32 = arith.constant 1 : i32
    %0 = arith.addi %arg1, %c1_i32 : i32
    %c4_i32 = arith.constant 4 : i32
    %1 = arith.muli %0, %c4_i32 : i32
    %c7_i32 = arith.constant 7 : i32
    %2 = arith.minsi %1, %c7_i32 : i32
    %c0_i32 = arith.constant 0 : i32
    %c0_i32_0 = arith.constant 0 : i32
    %c0_i32_1 = arith.constant 0 : i32
    return %arg0, %2, %c0_i32, %c0_i32_0 : i32, i32, i32, i32
  }
  func.func @transform_3(%arg0: i32, %arg1: i32) -> (i32, i32) {
    %c0_i32 = arith.constant 0 : i32
    %c0_i32_0 = arith.constant 0 : i32
    %c0_i32_1 = arith.constant 0 : i32
    return %c0_i32, %c0_i32_0 : i32, i32
  }
  func.func @transform_4(%arg0: i32, %arg1: i32) -> (i32, i32) {
    %c0_i32 = arith.constant 0 : i32
    %c0_i32_0 = arith.constant 0 : i32
    %c0_i32_1 = arith.constant 0 : i32
    return %c0_i32, %c0_i32_0 : i32, i32
  }
  func.func @transform_5(%arg0: i32, %arg1: i32) -> (i32, i32) {
    %c0_i32 = arith.constant 0 : i32
    %c0_i32_0 = arith.constant 0 : i32
    %c0_i32_1 = arith.constant 0 : i32
    return %c0_i32, %c0_i32_0 : i32, i32
  }
  func.func @transform_6(%arg0: i32, %arg1: i32) -> (i32, i32) {
    %c0_i32 = arith.constant 0 : i32
    %c0_i32_0 = arith.constant 0 : i32
    %c0_i32_1 = arith.constant 0 : i32
    return %c0_i32, %c0_i32_0 : i32, i32
  }
  func.func @transform_7(%arg0: i32, %arg1: i32) -> (i32, i32) {
    %c0_i32 = arith.constant 0 : i32
    %c0_i32_0 = arith.constant 0 : i32
    %c0_i32_1 = arith.constant 0 : i32
    return %c0_i32, %c0_i32_0 : i32, i32
  }
  func.func @transform_8(%arg0: i32, %arg1: i32) -> (i32, i32) {
    %c0_i32 = arith.constant 0 : i32
    %c0_i32_0 = arith.constant 0 : i32
    %c0_i32_1 = arith.constant 0 : i32
    return %c0_i32, %c0_i32_0 : i32, i32
  }
  func.func @transform_9(%arg0: i32, %arg1: i32) -> (i32, i32, i32, i32) {
    %c0_i32 = arith.constant 0 : i32
    %c0_i32_0 = arith.constant 0 : i32
    %c0_i32_1 = arith.constant 0 : i32
    return %arg0, %arg1, %c0_i32, %c0_i32_0 : i32, i32, i32, i32
  }
}

</mosaic_0001>

<bundles_post_ra>
// kernel: basic_block_forward.1
= control target key start
LH: loop header
LB: loop body
LE: loop exit
PB: predicated region body
PF: predicated region fallthrough
CT: control target
= control target key end

     0   :  { %s6408_s30 = smov 0   ;;  %s6410_s10 = smov 0   ;;  %s7976_s0 = inlined_call_operand.vmem [shape: bf16[2,16,16,128], index: 0, kind: input, shape index: {}, may-alias: {0,1,2}]   ;;  %s7977_s1 = inlined_call_operand.vmem [shape: bf16[2,16,16,128], index: 1, kind: input, shape index: {}, may-alias: {0,1,2}]   ;;  %s7978_s2 = inlined_call_operand.vmem [shape: bf16[2,16,16,128], index: 2, kind: input, shape index: {}, may-alias: {0,1,2}]   ;;  %s7979_s3 = inlined_call_operand.vmem [shape: bf16[1152,128], index: 3, kind: input, shape index: {}]   ;;  %s7980_s4 = inlined_call_operand.vmem [shape: f32[1,128], index: 4, kind: input, shape index: {}]   ;;  %s7981_s5 = inlined_call_operand.vmem [shape: f32[1,128], index: 5, kind: input, shape index: {}]   ;;  %s7982_s6 = inlined_call_operand.vmem [shape: bf16[1152,128], index: 6, kind: input, shape index: {}]   ;;  %s7983_s7 = inlined_call_operand.vmem [shape: f32[1,128], index: 7, kind: input, shape index: {}]   ;;  %s7984_s8 = inlined_call_operand.vmem [shape: f32[1,128], index: 8, kind: input, shape index: {}]   ;;  %s7985_s9 = inlined_call_operand.vmem [shape: bf16[2,16,16,128], index: 9, kind: output, shape index: {}]  }
   0x1   :  { %s6412_s11 = smov 0   ;;  %s6414_s12 = smov 0  }
   0x2   :  { %s6416_s13 = smov 0  }
   0x3 LB: > { %s28_s14 = sadd.s32 1, %s6346_s11  ;;  %s31_s15 = sadd.s32 1, %s6350_s12  ;;  %s6354_s13 = sphi %s6416_s13, %s19_s13   ;;  %s6350_s12 = sphi %s6414_s12, %s7999_s12   ;;  %s6346_s11 = sphi %s6412_s11, %s7998_s11   ;;  %s6342_s10 = sphi %s6410_s10, %s7997_s10   ;;  %s6338_s30 = sphi %s6408_s30, %s7996_s30  }
   0x4   : > { %p29_p0 = scmp.ge.s32.totalorder %s28_s14, 2  ;;  %p4908_p1 = scmp.ge.s32.totalorder %s6354_s13, 1 }
   0x5   : > { %p377_p2 = scmp.lt.s32.totalorder %s6354_s13, 5 }
   0x6   : > { %s8001_s14 = smov (%p29_p0, %s28_s14), 0  ;;  %s8003_s15 = smov (!%p29_p0, %s31_s15), %s6350_s12 }
   0x7   : > { %p378_p3 = pnand %p4908_p1, %p377_p2  ;;  %p33_p4 = scmp.ge.s32.totalorder %s8003_s15, 2 }
   0x8   : > { %v6164_v0 = vld [vmem:[%s7979_s3 + $0x100] sm:$0xff] (!%p378_p3)   ;;  %s4909_s18 = sshll.u32 (!%p378_p3), %s6338_s30, 2  ;;  %v6168_v4 = vld [vmem:[%s7979_s3 + $0x108] sm:$0xff] (!%p378_p3)   ;;  %p456_p6 = scmp.lt.s32.totalorder (!%p378_p3), %s6342_s10, 1  ;;  %v6172_v8 = vld [vmem:[%s7979_s3 + $0x110] sm:$0xff] (!%p378_p3)   ;;  %vm512_vm0 = vcmask (!%p378_p3), 1047559  }
   0x9   : > { %s8005_s15 = smov (%p33_p4, %s8003_s15), 0  ;;  %381 = sbr.rel (%p378_p3) target bundleno = 887 (0x377), region = 56 }
   0xa   : > { %v6165_v1 = vld [vmem:[%s7979_s3 + $0xc0] sm:$0xff] (!%p378_p3)   ;;  %s4910_s21 = sadd.s32 (!%p378_p3), 4294967295, %s4909_s18  ;;  %5216 = vmatprep.subr.bf16.mxu0 (!%p378_p3), %v6164_v0  ;;  %v6169_v5 = vld [vmem:[%s7979_s3 + $0xc8] sm:$0xff] (!%p378_p3)   ;;  %v6173_v9 = vld [vmem:[%s7979_s3 + $0xd0] sm:$0xff] (!%p378_p3)   ;;  %s4915_s28 = sshll.u32 (!%p378_p3), %s6338_s30, 3  ;;  %vm551_vm5 = vcmask (!%p378_p3), 1040384  }
   0xb   : > { %v6166_v2 = vld [vmem:[%s7979_s3 + $0x40] sm:$0xff] (!%p378_p3)   ;;  %p453_p5 = scmp.gt.s32.totalorder (!%p378_p3), %s4910_s21, 0  ;;  %5217 = vmatpush3.bf16.msra.mxu0 (!%p378_p3), %v6165_v1  ;;  %v6170_v6 = vld [vmem:[%s7979_s3 + $0x48] sm:$0xff] (!%p378_p3)   ;;  %v6174_v10 = vld [vmem:[%s7979_s3 + $0x50] sm:$0xff] (!%p378_p3)   ;;  %p473_p8 = scmp.lt.s32.totalorder (!%p378_p3), %s4915_s28, 15 }
   0xc   : > { %v6167_v3 = vld [vmem:[%s7979_s3] sm:$0xff] (!%p378_p3)   ;;  %5310 = vmatprep.subr.bf16.mxu1 (!%p378_p3), %v6166_v2  ;;  %5218 = vmatprep.subr.bf16.mxu0 (!%p378_p3), %v6168_v4  ;;  %v6171_v7 = vld [vmem:[%s7979_s3 + $0x8] sm:$0xff] (!%p378_p3)   ;;  %v6175_v11 = vld [vmem:[%s7979_s3 + $0x10] sm:$0xff] (!%p378_p3)   ;;  %s5113_s27 = sadd.s32 (!%p378_p3), 4, %s4909_s18  ;;  %p590_p11 = scmp.gt.s32.totalorder (!%p378_p3), %s6338_s30, 0 }
   0xd   : > { %5311 = vmatpush3.bf16.msra.mxu1 (!%p378_p3), %v6167_v3  ;;  %v6176_v12 = vld [vmem:[%s7979_s3 + $0x118] sm:$0xff] (!%p378_p3)   ;;  %v6180_v16 = vld [vmem:[%s7979_s3 + $0x120] sm:$0xff] (!%p378_p3)   ;;  %v6184_v20 = vld [vmem:[%s7979_s3 + $0x128] sm:$0xff] (!%p378_p3)   ;;  %p483_p9 = scmp.lt.s32.totalorder (!%p378_p3), %s5113_s27, 7  ;;  %vm513_vm1 = vsmask.f32 (!%p378_p3), 7966 }
   0xe   : > { %5312 = vmatprep.subr.bf16.mxu1 (!%p378_p3), %v6170_v6  ;;  %v6177_v13 = vld [vmem:[%s7979_s3 + $0xd8] sm:$0xff] (!%p378_p3)   ;;  %v6181_v17 = vld [vmem:[%s7979_s3 + $0xe0] sm:$0xff] (!%p378_p3)   ;;  %v6185_v21 = vld [vmem:[%s7979_s3 + $0xe8] sm:$0xff] (!%p378_p3)   ;;  %vm552_vm4 = vsmask.f32 (!%p378_p3), 256  ;;  %p602_p12 = scmp.lt.s32.totalorder (!%p378_p3), %s6338_s30, 1 }
   0xf   : > { %5219 = vmatpush3.bf16.msra.mxu0 (!%p378_p3), %v6169_v5  ;;  %v6178_v14 = vld [vmem:[%s7979_s3 + $0x58] sm:$0xff] (!%p378_p3)   ;;  %v6182_v18 = vld [vmem:[%s7979_s3 + $0x60] sm:$0xff] (!%p378_p3)   ;;  %v6186_v22 = vld [vmem:[%s7979_s3 + $0x68] sm:$0xff] (!%p378_p3)   ;;  %vm878_vm8 = vsmask.f32 (!%p378_p3), 7424  ;;  %p5014_p13 = scmp.ne.s32.totalorder (!%p378_p3), %s6338_s30, 0 }
  0x10   : > { %s8007_s21 = smov (!%p453_p5, %s4910_s21), 0  ;;  %s8009_s10 = smov (!%p456_p6, %s6342_s10), 1  ;;  %5220 = vmatprep.subr.bf16.mxu0 %v6172_v8  ;;  %v6179_v15 = vld [vmem:[%s7979_s3 + $0x18] sm:$0xff]   ;;  %v6183_v19 = vld [vmem:[%s7979_s3 + $0x20] sm:$0xff]   ;;  %v6187_v23 = vld [vmem:[%s7979_s3 + $0x28] sm:$0xff]  }
  0x11   : > { %s4911_s19 = sshll.u32 %s8007_s21, 1  ;;  %5313 = vmatpush3.bf16.msra.mxu1 %v6171_v7  ;;  %s6495_s26 = sshll.u32 %s8009_s10, 5  ;;  %v6188_v24 = vld [vmem:[%s7979_s3 + $0x130] sm:$0xff]   ;;  %v6192_v28 = vld [vmem:[%s7979_s3 + $0x138] sm:$0xff]   ;;  %vm6586_vm3 = vmand %vm512_vm0, %vm513_vm1 }
  0x12   : > { %p458_p7 = scmp.lt.s32.totalorder %s4911_s19, 15  ;;  %5314 = vmatprep.subr.bf16.mxu1 %v6174_v10  ;;  %s8013_s28 = smov (!%p473_p8, %s4915_s28), 15  ;;  %v6189_v25 = vld [vmem:[%s7979_s3 + $0xf0] sm:$0xff]   ;;  %v6193_v29 = vld [vmem:[%s7979_s3 + $0xf8] sm:$0xff]   ;;  %v6196_v41 = vld [vmem:[%s7979_s3 + $0x140] sm:$0xff]  }
  0x13   : > { %5221 = vmatpush3.bf16.msra.mxu0 %v6173_v9  ;;  %s4916_s10 = sshll.u32 %s8013_s28, 1  ;;  %s8015_s27 = smov (!%p483_p9, %s5113_s27), 7  ;;  %v6190_v26 = vld [vmem:[%s7979_s3 + $0x70] sm:$0xff]   ;;  %v6194_v30 = vld [vmem:[%s7979_s3 + $0x78] sm:$0xff]   ;;  %v515_v46 = vld [vmem:[#allocation2] sm:$0x80] }
  0x14   : > { %s8011_s19 = smov (!%p458_p7, %s4911_s19), 15  ;;  %5222 = vmatprep.subr.bf16.mxu0 %v6176_v12  ;;  %s6511_s25 = sadd.s32 %s4916_s10, %s6495_s26  ;;  %v6191_v27 = vld [vmem:[%s7979_s3 + $0x30] sm:$0xff]   ;;  %v6195_v33 = vld [vmem:[%s7979_s3 + $0x38] sm:$0xff]   ;;  %v516_v49 = vsel %vm6586_vm3, 0, %v515_v46  ;;  %v524_v1 = vld [vmem:[#allocation2 + $0x48] sm:$0x80] }
  0x15   : > { %5315 = vmatpush3.bf16.msra.mxu1 %v6175_v11  ;;  %s4912_s17 = sshll.u32 %s8011_s19, 1  ;;  %s7986_s29 = sshll.u32 %s6511_s25, 2  ;;  %v518_v35 = vld [vmem:[#allocation2 + $0x18] sm:$0x80]  ;;  %517 = vst [vmem:[#allocation2] sm:$0x80] %v516_v49  ;;  %vm6742_vm6 = vmand %vm551_vm5, %vm552_vm4 }
  0x16   : > { %5316 = vmatprep.subr.bf16.mxu1 %v6178_v14  ;;  %s6527_s10 = scalar_lea.vmem %s7985_s9, %s7986_s29  ;;  %s462_s24 = sadd.s32 %s6495_s26, %s4912_s17  ;;  %v519_v40 = vsel %vm6586_vm3, 0, %v518_v35  ;;  %v521_v53 = vld [vmem:[#allocation2 + $0x30] sm:$0x80]  ;;  %v525_v10 = vsel %vm6586_vm3, 0, %v524_v1  ;;  %v6206_v36 = vld [vmem:[%s7979_s3 + $0x80] sm:$0xff]  }
  0x17   : > { %5223 = vmatpush3.bf16.msra.mxu0 %v6177_v13  ;;  %s4914_s23 = sshll.u32 %s462_s24, 2  ;;  %s4920_s19 = sshll.u32 %s8015_s27, 1  ;;  %520 = vst [vmem:[#allocation2 + $0x18] sm:$0x80] %v519_v40  ;;  %v522_v55 = vsel %vm6586_vm3, 0, %v521_v53  ;;  %v6205_v53 = vld [vmem:[%s7979_s3 + $0x160] sm:$0xff]  }
  0x18   : > { %5224 = vmatprep.subr.bf16.mxu0 %v6180_v16  ;;  %p488_p10 = scmp.lt.s32.totalorder %s4920_s19, 15  ;;  %s6554_s24 = scalar_lea.vmem %s7976_s0, %s4914_s23  ;;  %523 = vst [vmem:[#allocation2 + $0x30] sm:$0x80] %v522_v55  ;;  %526 = vst [vmem:[#allocation2 + $0x48] sm:$0x80] %v525_v10  ;;  %v6239_v37 = vld [vmem:[%s7979_s3 + $0x1b0] sm:$0xff]  }
  0x19   : > { %5317 = vmatpush3.bf16.msra.mxu1 %v6179_v15  ;;  %v593_v31 = vld [vmem:[%s6554_s24 + $0x8] sm:$0xf]  ;;  %v594_v32 = vld [vmem:[%s6554_s24 + $0xc] sm:$0xf]  ;;  %s595_s28 = scalar_select %p590_p11, 1, 0 }
  0x1a   : > { %5318 = vmatprep.subr.bf16.mxu1 %v6182_v18  ;;  %s8017_s19 = smov (!%p488_p10, %s4920_s19), 15  ;;  %s7987_s17 = sshll.u32 %s6511_s25, 2  ;;  %v591_v42 = vld [vmem:[%s6554_s24] sm:$0xf]  ;;  %v592_v44 = vld [vmem:[%s6554_s24 + $0x4] sm:$0xf] }
  0x1b   : > { %5225 = vmatpush3.bf16.msra.mxu0 %v6181_v17  ;;  %s4921_s16 = sshll.u32 %s8017_s19, 1  ;;  %s6579_s23 = scalar_lea.vmem %s7977_s1, %s7987_s17  ;;  %v596_v34 = vstv %s595_s28  ;;  %v527_v16 = vld [vmem:[#allocation2 + $0x60] sm:$0x80]  ;;  %v6198_v18 = vld [vmem:[%s7979_s3 + $0x148] sm:$0xff]  }
  0x1c   : > { %5226 = vmatprep.subr.bf16.mxu0 %v6184_v20  ;;  %s6572_s27 = sadd.s32 %s4921_s16, %s6495_s26  ;;  %vm6581_vm2 = vcmp.eq.s32.totalorder %v596_v34, 1  ;;  %v6606_v47 = vld [vmem:[%s6579_s23] sm:$0xff]   ;;  %v6621_v62 = vld [vmem:[%s6579_s23 + $0x8] sm:$0xff]   ;;  %v6633_v15 = vld [vmem:[%s6579_s23 + $0x10] sm:$0xff]   ;;  %v528_v20 = vsel %vm6586_vm3, 0, %v527_v16 }
  0x1d   : > { %5319 = vmatpush3.bf16.msra.mxu1 %v6183_v19  ;;  %v600_v38 = vsel %vm6581_vm2, %v593_v31, 0  ;;  %v601_v39 = vsel %vm6581_vm2, %v594_v32, 0  ;;  %v598_v45 = vsel %vm6581_vm2, %v591_v42, 0  ;;  %v599_v48 = vsel %vm6581_vm2, %v592_v44, 0  ;;  %693 = vst [vmem:[#allocation2 + $0x38] sm:$0xff] %v6606_v47  ;;  %694 = vst [vmem:[#allocation2 + $0x50] sm:$0xff] %v6621_v62 }
  0x1e   : > { %5320 = vmatprep.subr.bf16.mxu1 %v6186_v22  ;;  %v6600_v43 = vcombine.low %v600_v38, %v601_v39  ;;  %v4928_v52 = vcombine.low %v598_v45, %v599_v48  ;;  %v1048_v54 = vshll.u32 %v6606_v47, 16  ;;  %v1045_v59 = vshrl.u32 %v6606_v47, 16  ;;  %v1008_v2 = vld [vmem:[#allocation2 + $0x18] sm:$0x80]  ;;  %v718_v9 = vld [vmem:[#allocation2] sm:$0x80] }
  0x1f   : > { %5227 = vmatpush3.bf16.msra.mxu0 %v6185_v21  ;;  %v720_v5 = vld [vmem:[#allocation2 + $0x18] sm:$0x80]  ;;  %v1029_v6 = vshrl.u32 %v1008_v2, 16  ;;  %v739_v13 = vshrl.u32 %v718_v9, 16  ;;  %v1010_v17 = vld [vmem:[#allocation2 + $0x30] sm:$0x80] }
  0x20   : > { %5228 = vmatprep.subr.bf16.mxu0 %v6188_v24  ;;  %v1033_v50 = vshrl.u32 %v6600_v43, 16  ;;  %v1036_v51 = vshll.u32 %v6600_v43, 16  ;;  %1472 = vmatprep.mubr.bf16.mxu0 %v6600_v43  ;;  %v743_v57 = vshrl.u32 %v4928_v52, 16  ;;  %v746_v58 = vshll.u32 %v4928_v52, 16  ;;  %695 = vst [vmem:[#allocation2 + $0x68] sm:$0xff] %v6633_v15  ;;  %v6200_v31 = vld [vmem:[%s7979_s3 + $0x150] sm:$0xff]  }
  0x21   : > { %5321 = vmatpush3.bf16.msra.mxu1 %v6187_v23  ;;  %1842 = vmatprep.mubr.bf16.mxu1 %v4928_v52  ;;  %v1175_v60 = vrot.slane %v1048_v54, 1  ;;  %v1031_v11 = vrot.slane %v1029_v6, 7  ;;  %v1047_v14 = vrot.slane %v1045_v59, 7  ;;  %v751_v19 = vshrl.u32 %v720_v5, 16  ;;  %529 = vst [vmem:[#allocation2 + $0x60] sm:$0x80] %v528_v20 }
  0x22   : > { %5322 = vmatprep.subr.bf16.mxu1 %v6190_v26  ;;  %v1035_v56 = vrot.slane %v1033_v50, 7  ;;  %v886_v61 = vrot.slane %v1036_v51, 1  ;;  %v745_v63 = vrot.slane %v743_v57, 7  ;;  %v879_v0 = vrot.slane %v746_v58, 1  ;;  %v1012_v34 = vld [vmem:[#allocation2 + $0x48] sm:$0x80] }
  0x23   : > { %5229 = vmatpush3.bf16.msra.mxu0 %v6189_v25  ;;  %v6623_v3 = vor.u32 %v1175_v60, %v1045_v59  ;;  %v741_v22 = vrot.slane %v739_v13, 7  ;;  %v1041_v23 = vshrl.u32 %v1010_v17, 16  ;;  %v1057_v24 = vshrl.u32 %v6621_v62, 16  ;;  %v6644_v25 = vld [vmem:[%s6579_s23 + $0x18] sm:$0xff]   ;;  %v722_v35 = vld [vmem:[#allocation2 + $0x30] sm:$0x80] }
  0x24   : > { %5230 = vmatprep.subr.bf16.mxu0 %v6192_v28  ;;  %v6625_v4 = vor.u32 %v1033_v50, %v886_v61  ;;  %v1038_v7 = vor.u32 %v1036_v51, %v1035_v56  ;;  %v6628_v8 = vor.u32 %v879_v0, %v743_v57  ;;  %v748_v12 = vor.u32 %v746_v58, %v745_v63  ;;  %v533_v42 = vld [vmem:[#allocation2 + $0x90] sm:$0x80]  ;;  %v6202_v44 = vld [vmem:[%s7979_s3 + $0x158] sm:$0xff]   ;;  %v6209_v58 = vld [vmem:[%s7979_s3 + $0x88] sm:$0xff]   ;;  %s4923_s29 = sshll.u32 %s6572_s27, 2 }
  0x25   : > { %5323 = vmatpush3.bf16.msra.mxu1 %v6191_v27  ;;  %v1043_v27 = vrot.slane %v1041_v23, 7  ;;  %v1050_v28 = vor.u32 %v1048_v54, %v1047_v14  ;;  %696 = vst [vmem:[#allocation2 + $0x80] sm:$0xff] %v6644_v25  ;;  %v753_v32 = vrot.slane %v751_v19, 7  ;;  %v1060_v39 = vshll.u32 %v6621_v62, 16  ;;  %v536_v54 = vld [vmem:[#allocation2 + $0xa8] sm:$0x80]  ;;  %s6809_s21 = scalar_lea.vmem %s7978_s2, %s4923_s29 }
  0x26   : > { %5324 = vmatprep.subr.bf16.mxu1 %v6194_v30  ;;  %v1039_v21 = vsel %vm552_vm4, %v1031_v11, %v1038_v7  ;;  %v749_v26 = vsel %vm552_vm4, %v741_v22, %v748_v12  ;;  %v6649_v30 = vld [vmem:[%s6579_s23 + $0x20] sm:$0xff]   ;;  %v1053_v40 = vshrl.u32 %v1012_v34, 16  ;;  %v534_v45 = vsel %vm6586_vm3, 0, %v533_v42  ;;  %v724_v61 = vld [vmem:[#allocation2 + $0x48] sm:$0x80]  ;;  %v6211_v11 = vld [vmem:[%s7979_s3 + $0x90] sm:$0xff]  }
  0x27   : > { %5231 = vmatpush3.bf16.msra.mxu0 %v6193_v29  ;;  %v530_v29 = vld [vmem:[#allocation2 + $0x78] sm:$0x80]  ;;  %697 = vst [vmem:[#allocation2 + $0x98] sm:$0xff] %v6649_v30  ;;  %v1051_v38 = vsel %vm552_vm4, %v1043_v27, %v1050_v28  ;;  %v761_v46 = vsel %vm552_vm4, %v753_v32, %v1038_v7  ;;  %v763_v48 = vshrl.u32 %v722_v35, 16  ;;  %v1069_v49 = vshrl.u32 %v6633_v15, 16  ;;  %v6212_v12 = vld [vmem:[%s7979_s3 + $0x170] sm:$0xff]  }
  0x28   : > { %5738 = vmatprep.subr.bf16.mxu0 %v6196_v41  ;;  %v1014_v50 = vld [vmem:[#allocation2 + $0x60] sm:$0x80]  ;;  %535 = vst [vmem:[#allocation2 + $0x90] sm:$0x80] %v534_v45  ;;  %v1055_v51 = vrot.slane %v1053_v40, 7  ;;  %v1072_v56 = vshll.u32 %v6633_v15, 16 }
  0x29   : > { %5325 = vmatpush3.bf16.msra.mxu1 %v6195_v33  ;;  %v531_v33 = vsel %vm6586_vm3, 0, %v530_v29  ;;  %v765_v55 = vrot.slane %v763_v48, 7  ;;  %v537_v57 = vsel %vm6586_vm3, 0, %v536_v54  ;;  %v1065_v59 = vshrl.u32 %v1014_v50, 16  ;;  %v539_v5 = vld [vmem:[#allocation2 + $0xc0] sm:$0x80] }
  0x2a   : > { %1473 = vmatmul.mubr.bf16.vlgmr.msra.gmra.mrb[0].mxu0 %v1039_v21  ;;  %532 = vst [vmem:[#allocation2 + $0x78] sm:$0x80] %v531_v33  ;;  %5774 = vmatprep.subr.bf16.mxu1 %v6206_v36  ;;  %v1071_v60 = vrot.slane %v1069_v49, 7  ;;  %538 = vst [vmem:[#allocation2 + $0xa8] sm:$0x80] %v537_v57  ;;  %v775_v1 = vshrl.u32 %v724_v61, 16 }
  0x2b   : > { %5739 = vmatpush3.bf16.msra.mxu0 %v6196_v41  ;;  %1480 = vmatprep.mubr.bf16.mxu0 %v6606_v47  ;;  %v1059_v41 = vrot.slane %v1057_v24, 7  ;;  %v773_v0 = vsel %vm552_vm4, %v765_v55, %v1050_v28  ;;  %v1081_v2 = vshrl.u32 %v6644_v25, 16  ;;  %v1067_v6 = vrot.slane %v1065_v59, 7  ;;  %v726_v14 = vld [vmem:[#allocation2 + $0x60] sm:$0x80]  ;;  %v6213_v19 = vld [vmem:[%s7979_s3 + $0x98] sm:$0xff]  }
  0x2c   : > { %1843 = vmatmul.mubr.bf16.vlgmr.msra.gmra.mrb[0].mxu1 %v749_v26  ;;  %5740 = vmatprep.subr.bf16.mxu0 %v6198_v18  ;;  %v1074_v7 = vor.u32 %v1072_v56, %v1071_v60  ;;  %v540_v10 = vsel %vm6586_vm3, 0, %v539_v5  ;;  %v777_v13 = vrot.slane %v775_v1, 7  ;;  %v1084_v16 = vshll.u32 %v6644_v25, 16  ;;  %v542_v21 = vld [vmem:[#allocation2 + $0xd8] sm:$0x80]  ;;  %v6215_v28 = vld [vmem:[%s7979_s3 + $0xa0] sm:$0xff]  }
  0x2d   : > { %1850 = vmatprep.mubr.bf16.mxu1 %v6600_v43  ;;  %v6667_v43 = vld [vmem:[%s6579_s23 + $0x28] sm:$0xff]   ;;  %5775 = vmatpush3.bf16.msra.mxu1 %v6206_v36  ;;  %v1062_v52 = vor.u32 %v1060_v39, %v1059_v41  ;;  %541 = vst [vmem:[#allocation2 + $0xc0] sm:$0x80] %v540_v10  ;;  %v787_v22 = vshrl.u32 %v726_v14, 16  ;;  %v1093_v23 = vshrl.u32 %v6649_v30, 16  ;;  %v543_v27 = vsel %vm6586_vm3, 0, %v542_v21 }
  0x2e   : > { %698 = vst [vmem:[#allocation2 + $0xb0] sm:$0xff] %v6667_v43  ;;  %5776 = vmatprep.subr.bf16.mxu1 %v6209_v58  ;;  %v1075_v20 = vsel %vm552_vm4, %v1067_v6, %v1074_v7  ;;  %544 = vst [vmem:[#allocation2 + $0xd8] sm:$0x80] %v543_v27  ;;  %v6216_v29 = vld [vmem:[%s7979_s3 + $0x178] sm:$0xff]   ;;  %v6217_v34 = vld [vmem:[%s7979_s3 + $0xa8] sm:$0xff]   ;;  %v1096_v35 = vshll.u32 %v6649_v30, 16 }
  0x2f   : > { %5741 = vmatpush3.bf16.msra.mxu0 %v6198_v18  ;;  %v1063_v63 = vsel %vm552_vm4, %v1055_v51, %v1062_v52  ;;  %v1083_v18 = vrot.slane %v1081_v2, 7  ;;  %v785_v26 = vsel %vm552_vm4, %v777_v13, %v1062_v52  ;;  %v1018_v33 = vld [vmem:[#allocation2 + $0x90] sm:$0x80]  ;;  %v789_v36 = vrot.slane %v787_v22, 7  ;;  %v557_v51 = vld [vmem:[#allocation2 + $0x28] sm:$0x1] }
  0x30   : > { %5742 = vmatprep.subr.bf16.mxu0 %v6200_v31  ;;  %v545_v40 = vld [vmem:[#allocation2 + $0xf0] sm:$0x80]  ;;  %v1089_v41 = vshrl.u32 %v1018_v33, 16  ;;  %v1182_v50 = vrot.slane %v1060_v39, 1  ;;  %v6220_v52 = vld [vmem:[%s7979_s3 + $0x1c0] sm:$0xff]   ;;  %v1105_v55 = vshrl.u32 %v6667_v43, 16 }
  0x31   : > { %5777 = vmatpush3.bf16.msra.mxu1 %v6209_v58  ;;  %v1016_v9 = vld [vmem:[#allocation2 + $0x78] sm:$0x80]  ;;  %v6730_v32 = vor.u32 %v1084_v16, %v1083_v18  ;;  %v6218_v48 = vld [vmem:[%s7979_s3 + $0xb0] sm:$0xff]   ;;  %v1020_v59 = vld [vmem:[#allocation2 + $0xa8] sm:$0x80]  ;;  %v558_v60 = vsel %vm6742_vm6, 0, %v557_v51 }
  0x32   : > { %1481 = vmatmul.mubr.bf16.gmra.mrb[4].mxu0 %v1051_v38  ;;  %5778 = vmatprep.subr.bf16.mxu1 %v6211_v11  ;;  %v1077_v17 = vshrl.u32 %v1016_v9, 16  ;;  %v1095_v38 = vrot.slane %v1093_v23, 7  ;;  %v728_v42 = vld [vmem:[#allocation2 + $0x78] sm:$0x80]  ;;  %v730_v57 = vld [vmem:[#allocation2 + $0x90] sm:$0x80]  ;;  %v6761_v58 = vor.u32 %v1182_v50, %v1057_v24 }
  0x33   : > { %1488 = vmatprep.mubr.bf16.mxu0 %v6621_v62  ;;  %5743 = vmatpush3.bf16.msra.mxu0 %v6200_v31  ;;  %v799_v54 = vshrl.u32 %v728_v42, 16  ;;  %v1091_v39 = vrot.slane %v1089_v41, 7  ;;  %v560_v61 = vld [vmem:[#allocation2 + $0x40] sm:$0x1]  ;;  %559 = vst [vmem:[#allocation2 + $0x28] sm:$0x1] %v558_v60 }
  0x34   : > { %1851 = vmatmul.mubr.bf16.gmra.mrb[4].mxu1 %v761_v46  ;;  %5744 = vmatprep.subr.bf16.mxu0 %v6202_v44  ;;  %v1079_v31 = vrot.slane %v1077_v17, 7  ;;  %v561_v24 = vsel %vm6742_vm6, 0, %v560_v61  ;;  %v1108_v6 = vshll.u32 %v6667_v43, 16  ;;  %v1107_v9 = vrot.slane %v1105_v55, 7  ;;  %s6786_s18 = scalar_select %p602_p12, 1, 0 }
  0x35   : > { %1858 = vmatprep.mubr.bf16.mxu1 %v6606_v47  ;;  %v6208_v47 = vld [vmem:[%s7979_s3 + $0x168] sm:$0xff]   ;;  %5779 = vmatpush3.bf16.msra.mxu1 %v6211_v11  ;;  %562 = vst [vmem:[#allocation2 + $0x40] sm:$0x1] %v561_v24  ;;  %v801_v1 = vrot.slane %v799_v54, 7  ;;  %v811_v10 = vshrl.u32 %v730_v57, 16  ;;  %v6817_v33 = vld [vmem:[%s6579_s23 + $0x38] sm:$0xff]  }
  0x36   : > { %5780 = vmatprep.subr.bf16.mxu1 %v6213_v19  ;;  %v1087_v46 = vsel %vm552_vm4, %v1079_v31, %v6730_v32  ;;  %v566_v13 = vld [vmem:[#allocation2 + $0x70] sm:$0x1]  ;;  %v1110_v22 = vor.u32 %v1108_v6, %v1107_v9  ;;  %v572_v57 = vld [vmem:[#allocation2 + $0xa0] sm:$0x1]  ;;  %v734_v61 = vld [vmem:[#allocation2 + $0xc0] sm:$0x80] }
  0x37   : > { %5745 = vmatpush3.bf16.msra.mxu0 %v6202_v44  ;;  %v546_v44 = vsel %vm6586_vm3, 0, %v545_v40  ;;  %v809_v14 = vsel %vm552_vm4, %v801_v1, %v6730_v32  ;;  %v732_v32 = vld [vmem:[#allocation2 + $0xa8] sm:$0x80]  ;;  %v573_v60 = vsel %vm6742_vm6, 0, %v572_v57 }
  0x38   : > { %5746 = vmatprep.subr.bf16.mxu0 %v6205_v53  ;;  %547 = vst [vmem:[#allocation2 + $0xf0] sm:$0x80] %v546_v44  ;;  %v823_v42 = vshrl.u32 %v732_v32, 16  ;;  %v569_v44 = vld [vmem:[#allocation2 + $0x88] sm:$0x1] }
  0x39   : > { %5781 = vmatpush3.bf16.msra.mxu1 %v6213_v19  ;;  %v567_v19 = vsel %vm6742_vm6, 0, %v566_v13  ;;  %v570_v54 = vsel %vm6742_vm6, 0, %v569_v44  ;;  %574 = vst [vmem:[#allocation2 + $0xa0] sm:$0x1] %v573_v60 }
  0x3a   : > { %1489 = vmatmul.mubr.bf16.gmra.mrb[8].mxu0 %v1063_v63  ;;  %5782 = vmatprep.subr.bf16.mxu1 %v6215_v28  ;;  %v1098_v63 = vor.u32 %v1096_v35, %v1095_v38  ;;  %568 = vst [vmem:[#allocation2 + $0x70] sm:$0x1] %v567_v19  ;;  %571 = vst [vmem:[#allocation2 + $0x88] sm:$0x1] %v570_v54  ;;  %v869_v57 = vld [vmem:[#allocation2 + $0x28] sm:$0x1] }
  0x3b   : > { %1496 = vmatprep.mubr.bf16.mxu0 %v6633_v15  ;;  %5747 = vmatpush3.bf16.msra.mxu0 %v6205_v53  ;;  %v797_v53 = vsel %vm552_vm4, %v789_v36, %v1074_v7  ;;  %v1101_v7 = vshrl.u32 %v1020_v59, 16  ;;  %v604_v36 = vld [vmem:[%s6809_s21 + $0x4] sm:$0xf]  ;;  %v1024_v59 = vld [vmem:[#allocation2 + $0xd8] sm:$0x80] }
  0x3c   : > { %1859 = vmatmul.mubr.bf16.gmra.mrb[8].mxu1 %v773_v0  ;;  %5748 = vmatprep.subr.bf16.mxu0 %v6208_v47  ;;  %v554_v0 = vld [vmem:[#allocation2 + $0x10] sm:$0x1]  ;;  %v1099_v11 = vsel %vm552_vm4, %v1091_v39, %v1098_v63  ;;  %v825_v39 = vrot.slane %v823_v42, 7  ;;  %v581_v42 = vld [vmem:[#allocation2 + $0xe8] sm:$0x1] }
  0x3d   : > { %1866 = vmatprep.mubr.bf16.mxu1 %v6621_v62  ;;  %5783 = vmatpush3.bf16.msra.mxu1 %v6215_v28  ;;  %v6219_v62 = vld [vmem:[%s7979_s3 + $0xb8] sm:$0xff]   ;;  %v555_v5 = vsel %vm6742_vm6, 0, %v554_v0  ;;  %v1103_v21 = vrot.slane %v1101_v7, 7  ;;  %v1022_v28 = vld [vmem:[#allocation2 + $0xc0] sm:$0x80]  ;;  %v1125_v0 = vshrl.u32 %v1024_v59, 16 }
  0x3e   : > { %5784 = vmatprep.subr.bf16.mxu1 %v6217_v34  ;;  %556 = vst [vmem:[#allocation2 + $0x10] sm:$0x1] %v555_v5  ;;  %v1113_v40 = vshrl.u32 %v1022_v28, 16  ;;  %v835_v5 = vshrl.u32 %v734_v61, 16  ;;  %v833_v7 = vsel %vm552_vm4, %v825_v39, %v1110_v22  ;;  %v584_v39 = vld [vmem:[#allocation2 + $0x100] sm:$0x1] }
  0x3f   : > { %5749 = vmatpush3.bf16.msra.mxu0 %v6208_v47  ;;  %v6774_v47 = vld [vmem:[%s6579_s23 + $0x30] sm:$0xff]   ;;  %v1111_v38 = vsel %vm552_vm4, %v1103_v21, %v1110_v22  ;;  %v736_v22 = vld [vmem:[#allocation2 + $0xd8] sm:$0x80]  ;;  %v870_v61 = vld [vmem:[#allocation2 + $0x40] sm:$0x1] }
  0x40   : > { %5750 = vmatprep.subr.bf16.mxu0 %v6212_v12  ;;  %v1117_v17 = vshrl.u32 %v6774_v47, 16  ;;  %v1120_v27 = vshll.u32 %v6774_v47, 16  ;;  %v1026_v19 = vld [vmem:[#allocation2 + $0xf0] sm:$0x80]  ;;  %v837_v21 = vrot.slane %v835_v5, 7 }
  0x41   : > { %5785 = vmatpush3.bf16.msra.mxu1 %v6217_v34  ;;  %v603_v34 = vld [vmem:[%s6809_s21] sm:$0xf] }
  0x42   : > { %1497 = vmatmul.mubr.bf16.gmra.mrb[12].mxu0 %v1075_v20  ;;  %5786 = vmatprep.subr.bf16.mxu1 %v6218_v48  ;;  %v6798_v20 = vld [vmem:[%s7979_s3 + $0x200] sm:$0xff]   ;;  %v1119_v31 = vrot.slane %v1117_v17, 7 }
  0x43   : > { %1504 = vmatprep.mubr.bf16.mxu0 %v6644_v25  ;;  %5751 = vmatpush3.bf16.msra.mxu0 %v6212_v12  ;;  %v563_v12 = vld [vmem:[#allocation2 + $0x58] sm:$0x1] }
  0x44   : > { %1867 = vmatmul.mubr.bf16.gmra.mrb[12].mxu1 %v785_v26  ;;  %5752 = vmatprep.subr.bf16.mxu0 %v6216_v29  ;;  %v564_v18 = vsel %vm6742_vm6, 0, %v563_v12  ;;  %v813_v26 = vrot.slane %v811_v10, 7  ;;  %v575_v10 = vld [vmem:[#allocation2 + $0xb8] sm:$0x1] }
  0x45   : > { %1874 = vmatprep.mubr.bf16.mxu1 %v6633_v15  ;;  %5787 = vmatpush3.bf16.msra.mxu1 %v6218_v48  ;;  %565 = vst [vmem:[#allocation2 + $0x58] sm:$0x1] %v564_v18  ;;  %v1129_v48 = vshrl.u32 %v6817_v33, 16  ;;  %v576_v12 = vsel %vm6742_vm6, 0, %v575_v10 }
  0x46   : > { %5788 = vmatprep.subr.bf16.mxu1 %v6219_v62  ;;  %577 = vst [vmem:[#allocation2 + $0xb8] sm:$0x1] %v576_v12  ;;  %v889_v12 = vshll.u32 %v869_v57, 16  ;;  %v6227_v57 = vld [vmem:[%s7979_s3 + $0x208] sm:$0xff]  }
  0x47   : > { %5753 = vmatpush3.bf16.msra.mxu0 %v6216_v29  ;;  %v608_v29 = vstv %s6786_s18  ;;  %v1131_v1 = vrot.slane %v1129_v48, 7 }
  0x48   : > { %5404 = vmatprep.subr.bf16.mxu0 %v6220_v52  ;;  %vm6822_vm7 = vcmp.eq.s32.totalorder %v608_v29, 1  ;;  %v1115_v52 = vrot.slane %v1113_v40, 7  ;;  %v1137_v29 = vshrl.u32 %v1026_v19, 16  ;;  %v847_v40 = vshrl.u32 %v736_v22, 16  ;;  %v1161_v22 = vld [vmem:[#allocation2 + $0x70] sm:$0x1] }
  0x49   : > { %5789 = vmatpush3.bf16.msra.mxu1 %v6219_v62  ;;  %v610_v50 = vsel %vm6822_vm7, %v603_v34, 0  ;;  %v611_v51 = vsel %vm6822_vm7, %v604_v36, 0  ;;  %v1132_v62 = vshll.u32 %v6817_v33, 16  ;;  %v868_v34 = vld [vmem:[#allocation2 + $0x10] sm:$0x1] }
  0x4a   : > { %1505 = vmatmul.mubr.bf16.gmra.mrb[16].mxu0 %v1087_v46  ;;  %5810 = vmatprep.subr.bf16.mxu1 %v6798_v20  ;;  %v821_v46 = vsel %vm552_vm4, %v813_v26, %v1098_v63  ;;  %v6842_v63 = vcombine.low %v610_v50, %v611_v51  ;;  %v1158_v26 = vld [vmem:[#allocation2 + $0x28] sm:$0x1]  ;;  %v882_v44 = vshll.u32 %v868_v34, 16  ;;  %v1159_v51 = vld [vmem:[#allocation2 + $0x40] sm:$0x1]  ;;  %v849_v59 = vrot.slane %v847_v40, 7 }
  0x4b   : > { %1512 = vmatprep.mubr.bf16.mxu0 %v6649_v30  ;;  %v6858_v18 = vor.u32 %v1132_v62, %v1131_v1  ;;  %v1171_v36 = vshll.u32 %v1158_v26, 16  ;;  %v1178_v5 = vshll.u32 %v1159_v51, 16  ;;  %v891_v26 = vrot.slane %v889_v12, 1  ;;  %v872_v40 = vld [vmem:[#allocation2 + $0x70] sm:$0x1]  ;;  %v6228_v12 = vld [vmem:[%s7979_s3 + $0x1d8] sm:$0xff]  }
  0x4c   : > { %1875 = vmatmul.mubr.bf16.gmra.mrb[16].mxu1 %v797_v53  ;;  %v6835_v53 = vor.u32 %v1120_v27, %v1119_v31  ;;  %v1141_v9 = vshrl.u32 %v6842_v63, 16  ;;  %v1144_v28 = vshll.u32 %v6842_v63, 16  ;;  %v1160_v60 = vld [vmem:[#allocation2 + $0x58] sm:$0x1] }
  0x4d   : > { %1882 = vmatprep.mubr.bf16.mxu1 %v6644_v25  ;;  %v1173_v54 = vrot.slane %v1171_v36, 1  ;;  %v1185_v10 = vshll.u32 %v1160_v60, 16  ;;  %v1180_v19 = vrot.slane %v1178_v5, 1  ;;  %v6221_v36 = vld [vmem:[%s7979_s3 + $0x180] sm:$0xff]   ;;  %v1164_v15 = vld [vmem:[#allocation2 + $0xb8] sm:$0x1] }
  0x4e   : > { %v1123_v24 = vsel %vm552_vm4, %v1115_v52, %v6835_v53  ;;  %v1143_v31 = vrot.slane %v1141_v9, 7  ;;  %v582_v52 = vsel %vm6742_vm6, 0, %v581_v42  ;;  %v6222_v42 = vld [vmem:[%s7979_s3 + $0x1c8] sm:$0xff]   ;;  %v6230_v5 = vld [vmem:[%s7979_s3 + $0x210] sm:$0xff]  }
  0x4f   : > { %583 = vst [vmem:[#allocation2 + $0xe8] sm:$0x1] %v582_v52  ;;  %v1181_v34 = vsel %vm878_vm8, %v6623_v3, %v1180_v19  ;;  %v892_v52 = vsel %vm878_vm8, %v6625_v4, %v891_v26  ;;  %v6226_v25 = vld [vmem:[%s7979_s3 + $0x190] sm:$0xff]   ;;  %v1213_v19 = vshll.u32 %v1164_v15, 16  ;;  %v6235_v15 = vld [vmem:[%s7979_s3 + $0x1a8] sm:$0xff]  }
  0x50   : > { %v6871_v50 = vor.u32 %v1144_v28, %v1143_v31 }
  0x52   : > { %1513 = vmatmul.mubr.bf16.gmra.mrb[20].mxu0 %v1099_v11  ;;  %v578_v11 = vld [vmem:[#allocation2 + $0xd0] sm:$0x1] }
  0x53   : > { %1520 = vmatprep.mubr.bf16.mxu0 %v6667_v43  ;;  %v579_v13 = vsel %vm6742_vm6, 0, %v578_v11  ;;  %v857_v11 = vsel %vm552_vm4, %v849_v59, %v6858_v18  ;;  %v6223_v59 = vld [vmem:[%s7979_s3 + $0x188] sm:$0xff]  }
  0x54   : > { %1883 = vmatmul.mubr.bf16.gmra.mrb[20].mxu1 %v809_v14  ;;  %v1127_v14 = vrot.slane %v1125_v0, 7  ;;  %580 = vst [vmem:[#allocation2 + $0xd0] sm:$0x1] %v579_v13  ;;  %v884_v0 = vrot.slane %v882_v44, 1 }
  0x55   : > { %1890 = vmatprep.mubr.bf16.mxu1 %v6649_v30 }
  0x56   : > { %v1135_v32 = vsel %vm552_vm4, %v1127_v14, %v6858_v18  ;;  %v885_v13 = vsel %vm878_vm8, %v6628_v8, %v884_v0  ;;  %v896_v14 = vshll.u32 %v870_v61, 16  ;;  %v1189_v8 = vrot.slane %v1072_v56, 1 }
  0x58   : > { %v898_v31 = vrot.slane %v896_v14, 1  ;;  %v1210_v14 = vrot.slane %v1108_v6, 1 }
  0x5a   : > { %1521 = vmatmul.mubr.bf16.gmra.mrb[24].mxu0 %v1111_v38  ;;  %v845_v38 = vsel %vm552_vm4, %v837_v21, %v6835_v53  ;;  %v1187_v21 = vrot.slane %v1185_v10, 1  ;;  %v899_v56 = vsel %vm878_vm8, %v6623_v3, %v898_v31  ;;  %v6224_v3 = vld [vmem:[%s7979_s3 + $0x1d0] sm:$0xff]   ;;  %v6231_v31 = vld [vmem:[%s7979_s3 + $0x1e0] sm:$0xff]  }
  0x5b   : > { %1528 = vmatprep.mubr.bf16.mxu0 %v6774_v47  ;;  %v1165_v30 = vld [vmem:[#allocation2 + $0xd0] sm:$0x1] }
  0x5c   : > { %1891 = vmatmul.mubr.bf16.gmra.mrb[24].mxu1 %v821_v46  ;;  %v1139_v46 = vrot.slane %v1137_v29, 7  ;;  %v1162_v29 = vld [vmem:[#allocation2 + $0x88] sm:$0x1]  ;;  %v1188_v44 = vsel %vm878_vm8, %v6761_v58, %v1187_v21 }
  0x5d   : > { %1898 = vmatprep.mubr.bf16.mxu1 %v6667_v43  ;;  %v1199_v51 = vshll.u32 %v1162_v29, 16  ;;  %v6236_v43 = vld [vmem:[%s7979_s3 + $0x220] sm:$0xff]  }
  0x5e   : > { %v1147_v1 = vsel %vm552_vm4, %v1139_v46, %v6871_v50  ;;  %v1196_v46 = vrot.slane %v1084_v16, 1  ;;  %v1190_v16 = vor.u32 %v1189_v8, %v1069_v49  ;;  %v587_v8 = vld [vmem:[#allocation2 + $0x118] sm:$0x1] }
  0x5f   : > { %v1201_v61 = vrot.slane %v1199_v51, 1  ;;  %v6232_v51 = vld [vmem:[%s7979_s3 + $0x1a0] sm:$0xff]  }
  0x60   : > { %v6917_v60 = vor.u32 %v1196_v46, %v1081_v2  ;;  %v1203_v2 = vrot.slane %v1096_v35, 1  ;;  %v875_v46 = vld [vmem:[#allocation2 + $0xb8] sm:$0x1] }
  0x62   : > { %1529 = vmatmul.mubr.bf16.gmra.mrb[28].mxu0 %v1123_v24  ;;  %v585_v24 = vsel %vm6742_vm6, 0, %v584_v39  ;;  %v910_v39 = vshll.u32 %v872_v40, 16  ;;  %v1204_v6 = vor.u32 %v1203_v2, %v1093_v23  ;;  %v1166_v23 = vld [vmem:[#allocation2 + $0xe8] sm:$0x1]  ;;  %v606_v40 = vld [vmem:[%s6809_s21 + $0xc] sm:$0xf] }
  0x63   : > { %1536 = vmatprep.mubr.bf16.mxu0 %v6817_v33  ;;  %586 = vst [vmem:[#allocation2 + $0x100] sm:$0x1] %v585_v24  ;;  %v1163_v24 = vld [vmem:[#allocation2 + $0xa0] sm:$0x1] }
  0x64   : > { %1899 = vmatmul.mubr.bf16.gmra.mrb[28].mxu1 %v833_v7  ;;  %v1174_v7 = vsel %vm878_vm8, %v6625_v4, %v1173_v54  ;;  %v912_v49 = vrot.slane %v910_v39, 1  ;;  %v1206_v10 = vshll.u32 %v1163_v24, 16  ;;  %v6234_v39 = vld [vmem:[%s7979_s3 + $0x1e8] sm:$0xff]  }
  0x65   : > { %1906 = vmatprep.mubr.bf16.mxu1 %v6774_v47 }
  0x66   : > { %v913_v35 = vsel %vm878_vm8, %v1190_v16, %v912_v49  ;;  %v1208_v29 = vrot.slane %v1206_v10, 1  ;;  %v6993_v49 = vld [vmem:[#allocation2 + $0x38] sm:$0xff] }
  0x6a   : > { %1537 = vmatmul.mubr.bf16.gmra.mrb[32].mxu0 %v1135_v32  ;;  %v871_v32 = vld [vmem:[#allocation2 + $0x58] sm:$0x1] }
  0x6b   : > { %1544 = vmatprep.mubr.bf16.mxu0 %v6842_v63  ;;  %v903_v54 = vshll.u32 %v871_v32, 16 }
  0x6c   : > { %1907 = vmatmul.mubr.bf16.gmra.mrb[32].mxu1 %v845_v38  ;;  %v1192_v38 = vshll.u32 %v1161_v22, 16  ;;  %v6233_v22 = vld [vmem:[%s7979_s3 + $0x218] sm:$0xff]  }
  0x6d   : > { %1914 = vmatprep.mubr.bf16.mxu1 %v6817_v33  ;;  %v905_v0 = vrot.slane %v903_v54, 1  ;;  %v1224_v54 = vrot.slane %v1132_v62, 1  ;;  %v613_v62 = vsel %vm6822_vm7, %v606_v40, 0 }
  0x6e   : > { %v1194_v4 = vrot.slane %v1192_v38, 1  ;;  %v605_v38 = vld [vmem:[%s6809_s21 + $0x8] sm:$0xf] }
  0x6f   : > { %v906_v21 = vsel %vm878_vm8, %v6761_v58, %v905_v0  ;;  %v6229_v58 = vld [vmem:[%s7979_s3 + $0x198] sm:$0xff]   ;;  %v6238_v0 = vld [vmem:[%s7979_s3 + $0x228] sm:$0xff]  }
  0x72   : > { %1545 = vmatmul.mubr.bf16.gmra.mrb[36].mxu0 %v1147_v1  ;;  %v873_v1 = vld [vmem:[#allocation2 + $0x88] sm:$0x1] }
  0x73   : > { %5754 = vmatprep.mubr.bf16.mxu0 %v1174_v7  ;;  %v1195_v7 = vsel %vm878_vm8, %v1190_v16, %v1194_v4  ;;  %v612_v16 = vsel %vm6822_vm7, %v605_v38, 0  ;;  %v931_v4 = vshll.u32 %v875_v46, 16  ;;  %v2036_v38 = vld [vmem:[#allocation2 + $0x30] sm:$0x80]  ;;  %v2187_v46 = vld [vmem:[#allocation2 + $0x58] sm:$0x1] }
  0x74   : > { %1915 = vmatmul.mubr.bf16.gmra.mrb[36].mxu1 %v857_v11  ;;  %v1202_v11 = vsel %vm878_vm8, %v6917_v60, %v1201_v61  ;;  %v548_v61 = vld [vmem:[#allocation2 + $0x108] sm:$0x80] }
  0x75   : > { %5790 = vmatprep.mubr.bf16.mxu1 %v885_v13  ;;  %v917_v13 = vshll.u32 %v873_v1, 16  ;;  %v549_v2 = vsel %vm6586_vm3, 0, %v548_v61  ;;  %v933_v10 = vrot.slane %v931_v4, 1  ;;  %v7050_v4 = vld [vmem:[#allocation2 + $0x80] sm:$0xff] }
  0x76   : > { %550 = vst [vmem:[#allocation2 + $0x108] sm:$0x80] %v549_v2  ;;  %v2189_v2 = vld [vmem:[#allocation2 + $0x88] sm:$0x1] }
  0x77   : > { %v919_v32 = vrot.slane %v917_v13, 1  ;;  %v2064_v13 = vshll.u32 %v6993_v49, 16 }
  0x79   : > { %v920_v45 = vsel %vm878_vm8, %v6917_v60, %v919_v32  ;;  %v7027_v32 = vld [vmem:[#allocation2 + $0x50] sm:$0xff] }
  0x7a   : > { %5755 = vmatmul.mubr.bf16.vlgmr.msra.gmra.mrb[40].mxu0 %v1181_v34  ;;  %v6952_v34 = vor.u32 %v1210_v14, %v1105_v55  ;;  %v1209_v55 = vsel %vm878_vm8, %v1204_v6, %v1208_v29  ;;  %v1231_v14 = vrot.slane %v1144_v28, 1  ;;  %v6243_v28 = vld [vmem:[%s7979_s3 + $0x238] sm:$0xff]  }
  0x7b   : > { %5405 = vmatpush3.bf16.msra.mxu0 %v6221_v36  ;;  %5758 = vmatprep.mubr.bf16.mxu0 %v1188_v44  ;;  %v1215_v36 = vrot.slane %v1213_v19, 1 }
  0x7c   : > { %5791 = vmatmul.mubr.bf16.vlgmr.msra.gmra.mrb[40].mxu1 %v892_v52  ;;  %5406 = vmatprep.subr.bf16.mxu0 %v6222_v42  ;;  %v1217_v42 = vrot.slane %v1120_v27, 1  ;;  %v1220_v52 = vshll.u32 %v1165_v30, 16  ;;  %v588_v27 = vsel %vm6742_vm6, 0, %v587_v8  ;;  %v6242_v30 = vld [vmem:[%s7979_s3 + $0x1b8] sm:$0xff]   ;;  %v2061_v8 = vshrl.u32 %v6993_v49, 16 }
  0x7d   : > { %5794 = vmatprep.mubr.bf16.mxu1 %v899_v56  ;;  %5811 = vmatpush3.bf16.msra.mxu1 %v6798_v20  ;;  %v874_v20 = vld [vmem:[#allocation2 + $0xa0] sm:$0x1]  ;;  %v876_v56 = vld [vmem:[#allocation2 + $0xd0] sm:$0x1]  ;;  %589 = vst [vmem:[#allocation2 + $0x118] sm:$0x1] %v588_v27 }
  0x7e   : > { %5812 = vmatprep.subr.bf16.mxu1 %v6227_v57  ;;  %v924_v26 = vshll.u32 %v874_v20, 16  ;;  %v938_v1 = vshll.u32 %v876_v56, 16  ;;  %v6988_v41 = vor.u32 %v1217_v42, %v1117_v17  ;;  %v1222_v60 = vrot.slane %v1220_v52, 1  ;;  %v1167_v17 = vld [vmem:[#allocation2 + $0x100] sm:$0x1] }
  0x7f   : > { %5407 = vmatpush3.bf16.msra.mxu0 %v6223_v59  ;;  %v1227_v59 = vshll.u32 %v1166_v23, 16  ;;  %v1234_v19 = vshll.u32 %v1167_v17, 16  ;;  %v7037_v23 = vld [vmem:[#allocation2 + $0x68] sm:$0xff]  ;;  %v2076_v42 = vshll.u32 %v7027_v32, 16  ;;  %v2057_v52 = vshrl.u32 %v2036_v38, 16 }
  0x80   : > { %5408 = vmatprep.subr.bf16.mxu0 %v6224_v3  ;;  %v926_v44 = vrot.slane %v924_v26, 1  ;;  %v6980_v3 = vcombine.low %v612_v16, %v613_v62  ;;  %v940_v20 = vrot.slane %v938_v1, 1  ;;  %v934_v26 = vsel %vm878_vm8, %v6952_v34, %v933_v10  ;;  %v2038_v1 = vld [vmem:[#allocation2 + $0x48] sm:$0x80]  ;;  %v2191_v38 = vld [vmem:[#allocation2 + $0xb8] sm:$0x1] }
  0x81   : > { %5813 = vmatpush3.bf16.msra.mxu1 %v6227_v57  ;;  %v1216_v57 = vsel %vm878_vm8, %v6952_v34, %v1215_v36  ;;  %v7031_v34 = vor.u32 %v1231_v14, %v1141_v9  ;;  %v1236_v36 = vrot.slane %v1234_v19, 1  ;;  %v2073_v27 = vshrl.u32 %v7027_v32, 16 }
  0x82   : > { %5759 = vmatmul.mubr.bf16.gmra.mrb[44].mxu0 %v1195_v7  ;;  %5814 = vmatprep.subr.bf16.mxu1 %v6230_v5  ;;  %v927_v24 = vsel %vm878_vm8, %v1204_v6, %v926_v44  ;;  %v7000_v7 = vor.u32 %v1224_v54, %v1129_v48  ;;  %v1223_v48 = vsel %vm878_vm8, %v6988_v41, %v1222_v60  ;;  %v2188_v54 = vld [vmem:[#allocation2 + $0x70] sm:$0x1]  ;;  %v2085_v16 = vshrl.u32 %v7037_v23, 16 }
  0x83   : > { %5409 = vmatpush3.bf16.msra.mxu0 %v6226_v25  ;;  %5762 = vmatprep.mubr.bf16.mxu0 %v1202_v11  ;;  %v1229_v25 = vrot.slane %v1227_v59, 1  ;;  %v877_v11 = vld [vmem:[#allocation2 + $0xe8] sm:$0x1]  ;;  %v941_v29 = vsel %vm878_vm8, %v6988_v41, %v940_v20  ;;  %v2220_v14 = vshll.u32 %v2189_v2, 16  ;;  %v2044_v2 = vld [vmem:[#allocation2 + $0x90] sm:$0x80] }
  0x84   : > { %5795 = vmatmul.mubr.bf16.gmra.mrb[44].mxu1 %v906_v21  ;;  %5410 = vmatprep.subr.bf16.mxu0 %v6228_v12  ;;  %v6240_v12 = vld [vmem:[%s7979_s3 + $0x230] sm:$0xff]   ;;  %v2186_v21 = vld [vmem:[#allocation2 + $0x40] sm:$0x1]  ;;  %v945_v6 = vshll.u32 %v877_v11, 16  ;;  %v2069_v11 = vshrl.u32 %v2038_v1, 16 }
  0x85   : > { %5798 = vmatprep.mubr.bf16.mxu1 %v913_v35  ;;  %5815 = vmatpush3.bf16.msra.mxu1 %v6230_v5  ;;  %v6237_v5 = vld [vmem:[%s7979_s3 + $0x1f0] sm:$0xff]   ;;  %v1230_v35 = vsel %vm878_vm8, %v7000_v7, %v1229_v25  ;;  %v2194_v1 = vld [vmem:[#allocation2 + $0x100] sm:$0x1] }
  0x86   : > { %5816 = vmatprep.subr.bf16.mxu1 %v6233_v22  ;;  %v947_v40 = vrot.slane %v945_v6, 1  ;;  %v2071_v6 = vrot.slane %v2069_v11, 7  ;;  %v2172_v11 = vshll.u32 %v6980_v3, 16 }
  0x87   : > { %5411 = vmatpush3.bf16.msra.mxu0 %v6229_v58  ;;  %v2196_v58 = vrot.slane %v2064_v13, 1 }
  0x88   : > { %5412 = vmatprep.subr.bf16.mxu0 %v6231_v31  ;;  %v2199_v31 = vshll.u32 %v2186_v21, 16  ;;  %v948_v56 = vsel %vm878_vm8, %v7000_v7, %v947_v40 }
  0x89   : > { %5817 = vmatpush3.bf16.msra.mxu1 %v6233_v22  ;;  %v6241_v22 = vld [vmem:[%s7979_s3 + $0x1f8] sm:$0xff]   ;;  %v2197_v9 = vor.u32 %v2196_v58, %v2061_v8 }
  0x8a   : > { %5763 = vmatmul.mubr.bf16.gmra.mrb[48].mxu0 %v1209_v55  ;;  %5818 = vmatprep.subr.bf16.mxu1 %v6236_v43  ;;  %v2201_v44 = vrot.slane %v2199_v31, 1  ;;  %v1237_v55 = vsel %vm878_vm8, %v7031_v34, %v1236_v36  ;;  %v2222_v31 = vrot.slane %v2220_v14, 1  ;;  %v2169_v14 = vshrl.u32 %v6980_v3, 16 }
  0x8b   : > { %5413 = vmatpush3.bf16.msra.mxu0 %v6232_v51  ;;  %5766 = vmatprep.mubr.bf16.mxu0 %v1216_v57  ;;  %v2063_v51 = vrot.slane %v2061_v8, 7  ;;  %v2203_v57 = vrot.slane %v2076_v42, 1 }
  0x8c   : > { %5799 = vmatmul.mubr.bf16.gmra.mrb[48].mxu1 %v920_v45  ;;  %5414 = vmatprep.subr.bf16.mxu0 %v6234_v39  ;;  %v2206_v39 = vshll.u32 %v2187_v46, 16  ;;  %v2202_v59 = vsel %vm878_vm8, %v2197_v9, %v2201_v44  ;;  %v2213_v45 = vshll.u32 %v2188_v54, 16  ;;  %v2087_v44 = vrot.slane %v2085_v16, 7  ;;  %v2192_v46 = vld [vmem:[#allocation2 + $0xd0] sm:$0x1] }
  0x8d   : > { %5802 = vmatprep.mubr.bf16.mxu1 %v927_v24  ;;  %5819 = vmatpush3.bf16.msra.mxu1 %v6236_v43  ;;  %v2088_v43 = vshll.u32 %v7037_v23, 16  ;;  %v2066_v61 = vor.u32 %v2064_v13, %v2063_v51  ;;  %v2059_v24 = vrot.slane %v2057_v52, 7  ;;  %v2204_v60 = vor.u32 %v2203_v57, %v2073_v27  ;;  %v2042_v57 = vld [vmem:[#allocation2 + $0x78] sm:$0x80] }
  0x8e   : > { %5820 = vmatprep.subr.bf16.mxu1 %v6238_v0  ;;  %v2215_v17 = vrot.slane %v2213_v45, 1  ;;  %v2234_v51 = vshll.u32 %v2191_v38, 16  ;;  %v2241_v54 = vshll.u32 %v2192_v46, 16 }
  0x8f   : > { %5415 = vmatpush3.bf16.msra.mxu0 %v6235_v15  ;;  %v2210_v62 = vrot.slane %v2088_v43, 1  ;;  %v2208_v15 = vrot.slane %v2206_v39, 1  ;;  %v2067_v20 = vsel %vm552_vm4, %v2059_v24, %v2066_v61  ;;  %v2093_v61 = vshrl.u32 %v2042_v57, 16 }
  0x90   : > { %5416 = vmatprep.subr.bf16.mxu0 %v6237_v5  ;;  %v2100_v5 = vshll.u32 %v7050_v4, 16 }
  0x91   : > { %5821 = vmatpush3.bf16.msra.mxu1 %v6238_v0  ;;  %v7053_v0 = vld [vmem:[#allocation2 + $0x98] sm:$0xff]  ;;  %v2211_v25 = vor.u32 %v2210_v62, %v2085_v16  ;;  %v2209_v13 = vsel %vm878_vm8, %v2204_v60, %v2208_v15  ;;  %v2243_v16 = vrot.slane %v2241_v54, 1  ;;  %v2193_v62 = vld [vmem:[#allocation2 + $0xe8] sm:$0x1] }
  0x92   : > { %5767 = vmatmul.mubr.bf16.gmra.mrb[52].mxu0 %v1223_v48  ;;  %5822 = vmatprep.subr.bf16.mxu1 %v6240_v12  ;;  %v2112_v10 = vshll.u32 %v7053_v0, 16  ;;  %v2097_v48 = vshrl.u32 %v7050_v4, 16  ;;  %v2109_v21 = vshrl.u32 %v7053_v0, 16  ;;  %v2248_v15 = vshll.u32 %v2193_v62, 16 }
  0x93   : > { %5770 = vmatprep.mubr.bf16.mxu0 %v1230_v35  ;;  %5417 = vmatpush3.bf16.msra.mxu0 %v6239_v37  ;;  %v2217_v37 = vrot.slane %v2100_v5, 1  ;;  %v2216_v19 = vsel %vm878_vm8, %v2211_v25, %v2215_v17  ;;  %v2095_v25 = vrot.slane %v2093_v61, 7 }
  0x94   : > { %5803 = vmatmul.mubr.bf16.gmra.mrb[52].mxu1 %v934_v26  ;;  %5418 = vmatprep.subr.bf16.mxu0 %v6241_v22  ;;  %v2224_v35 = vrot.slane %v2112_v10, 1  ;;  %v7066_v26 = vld [vmem:[#allocation2 + $0xb0] sm:$0xff]  ;;  %v2099_v24 = vrot.slane %v2097_v48, 7 }
  0x95   : > { %5806 = vmatprep.mubr.bf16.mxu1 %v941_v29  ;;  %5823 = vmatpush3.bf16.msra.mxu1 %v6240_v12  ;;  %v2075_v12 = vrot.slane %v2073_v27, 7  ;;  %v2218_v58 = vor.u32 %v2217_v37, %v2097_v48  ;;  %v2124_v36 = vshll.u32 %v7066_v26, 16  ;;  %v2090_v27 = vor.u32 %v2088_v43, %v2087_v44 }
  0x96   : > { %5824 = vmatprep.subr.bf16.mxu1 %v6243_v28  ;;  %v2255_v43 = vshll.u32 %v2194_v1, 16  ;;  %v2102_v17 = vor.u32 %v2100_v5, %v2099_v24  ;;  %v2105_v48 = vshrl.u32 %v2044_v2, 16  ;;  %v2111_v37 = vrot.slane %v2109_v21, 7 }
  0x97   : > { %5419 = vmatpush3.bf16.msra.mxu0 %v6242_v30  ;;  %v2078_v29 = vor.u32 %v2076_v42, %v2075_v12  ;;  %v2225_v30 = vor.u32 %v2224_v35, %v2109_v21  ;;  %v2231_v42 = vrot.slane %v2124_v36, 1 }
  0x98   : > { %v2257_v12 = vrot.slane %v2255_v43, 1  ;;  %v2107_v35 = vrot.slane %v2105_v48, 7 }
  0x99   : > { %5825 = vmatpush3.bf16.msra.mxu1 %v6243_v28  ;;  %v2040_v28 = vld [vmem:[#allocation2 + $0x60] sm:$0x80]  ;;  %v2079_v40 = vsel %vm552_vm4, %v2071_v6, %v2078_v29  ;;  %v2046_v6 = vld [vmem:[#allocation2 + $0xa8] sm:$0x80] }
  0x9a   : > { %5771 = vmatmul.mubr.bf16.gmra.mrb[56].mxu0 %v1237_v55  ;;  %v2081_v9 = vshrl.u32 %v2040_v28, 16  ;;  %v2223_v55 = vsel %vm878_vm8, %v2218_v58, %v2222_v31  ;;  %v2258_v5 = vsel %vm878_vm8, %v7031_v34, %v2257_v12  ;;  %v2117_v28 = vshrl.u32 %v2046_v6, 16 }
  0x9b   : > { %2500 = vmatprep.mubr.bf16.mxu0 %v6993_v49  ;;  %v2190_v49 = vld [vmem:[#allocation2 + $0xa0] sm:$0x1] }
  0x9c   : > { %5807 = vmatmul.mubr.bf16.gmra.mrb[56].mxu1 %v948_v56  ;;  %v2227_v22 = vshll.u32 %v2190_v49, 16  ;;  %v2083_v56 = vrot.slane %v2081_v9, 7  ;;  %v2195_v49 = vld [vmem:[#allocation2 + $0x118] sm:$0x1]  ;;  %v2119_v34 = vrot.slane %v2117_v28, 7 }
  0x9d   : > { %5826 = vmatprep.mubr.bf16.mxu1 %v2202_v59  ;;  %v2236_v59 = vrot.slane %v2234_v51, 1 }
  0x9e   : > { %v2229_v8 = vrot.slane %v2227_v22, 1  ;;  %v2091_v45 = vsel %vm552_vm4, %v2083_v56, %v2090_v27  ;;  %v2114_v22 = vor.u32 %v2112_v10, %v2111_v37 }
  0xa0   : > { %v2230_v52 = vsel %vm878_vm8, %v2225_v30, %v2229_v8 }
  0xa2   : > { %2501 = vmatmul.mubr.bf16.vlgmr.msra.gmra.mrb[60].mxu0 %v2067_v20  ;;  %v2250_v20 = vrot.slane %v2248_v15, 1 }
  0xa3   : > { %2508 = vmatprep.mubr.bf16.mxu0 %v7027_v32  ;;  %v2121_v32 = vshrl.u32 %v7066_v26, 16 }
  0xa4   : > { %5827 = vmatmul.mubr.bf16.vlgmr.msra.gmra.mrb[40].mxu1 %v2209_v13  ;;  %v2103_v13 = vsel %vm552_vm4, %v2095_v25, %v2102_v17 }
  0xa5   : > { %5830 = vmatprep.mubr.bf16.mxu1 %v2216_v19  ;;  %v2232_v39 = vor.u32 %v2231_v42, %v2121_v32  ;;  %v2259_v19 = vrot.slane %v2172_v11, 1  ;;  %v2123_v58 = vrot.slane %v2121_v32, 7 }
  0xa7   : > { %v2237_v60 = vsel %vm878_vm8, %v2232_v39, %v2236_v59  ;;  %v2260_v21 = vor.u32 %v2259_v19, %v2169_v14  ;;  %v2126_v30 = vor.u32 %v2124_v36, %v2123_v58 }
  0xa9   : > { %v2127_v10 = vsel %vm552_vm4, %v2119_v34, %v2126_v30 }
  0xaa   : > { %2509 = vmatmul.mubr.bf16.gmra.mrb[64].mxu0 %v2079_v40  ;;  %v2050_v40 = vld [vmem:[#allocation2 + $0xd8] sm:$0x80] }
  0xab   : > { %2516 = vmatprep.mubr.bf16.mxu0 %v7037_v23  ;;  %v2244_v23 = vsel %vm878_vm8, %v6988_v41, %v2243_v16  ;;  %v2251_v41 = vsel %vm878_vm8, %v7000_v7, %v2250_v20  ;;  %v2115_v7 = vsel %vm552_vm4, %v2107_v35, %v2114_v22  ;;  %v2141_v44 = vshrl.u32 %v2050_v40, 16 }
  0xac   : > { %5831 = vmatmul.mubr.bf16.gmra.mrb[44].mxu1 %v2223_v55 }
  0xad   : > { %5834 = vmatprep.mubr.bf16.mxu1 %v2230_v52  ;;  %v2143_v46 = vrot.slane %v2141_v44, 7 }
  0xaf   : > { %v2151_v36 = vsel %vm552_vm4, %v2143_v46, %v6858_v18 }
  0xb2   : > { %2517 = vmatmul.mubr.bf16.gmra.mrb[68].mxu0 %v2091_v45 }
  0xb3   : > { %2524 = vmatprep.mubr.bf16.mxu0 %v7050_v4  ;;  %v2262_v4 = vshll.u32 %v2195_v49, 16 }
  0xb4   : > { %5835 = vmatmul.mubr.bf16.gmra.mrb[48].mxu1 %v2237_v60 }
  0xb5   : > { %5838 = vmatprep.mubr.bf16.mxu1 %v2244_v23  ;;  %v2264_v29 = vrot.slane %v2262_v4, 1 }
  0xb7   : > { %v2265_v31 = vsel %vm878_vm8, %v2260_v21, %v2264_v29 }
  0xba   : > { %2525 = vmatmul.mubr.bf16.gmra.mrb[72].mxu0 %v2103_v13 }
  0xbb   : > { %2532 = vmatprep.mubr.bf16.mxu0 %v7053_v0  ;;  %v2048_v0 = vld [vmem:[#allocation2 + $0xc0] sm:$0x80] }
  0xbc   : > { %5839 = vmatmul.mubr.bf16.gmra.mrb[52].mxu1 %v2251_v41  ;;  %v2129_v8 = vshrl.u32 %v2048_v0, 16 }
  0xbd   : > { %5842 = vmatprep.mubr.bf16.mxu1 %v2258_v5 }
  0xbe   : > { %v2131_v38 = vrot.slane %v2129_v8, 7 }
  0xc0   : > { %v2139_v9 = vsel %vm552_vm4, %v2131_v38, %v6835_v53  ;;  %v2171_v53 = vrot.slane %v2169_v14, 7 }
  0xc2   : > { %2533 = vmatmul.mubr.bf16.gmra.mrb[76].mxu0 %v2115_v7  ;;  %v2174_v52 = vor.u32 %v2172_v11, %v2171_v53 }
  0xc3   : > { %2540 = vmatprep.mubr.bf16.mxu0 %v7066_v26  ;;  %v2052_v26 = vld [vmem:[#allocation2 + $0xf0] sm:$0x80] }
  0xc4   : > { %5843 = vmatmul.mubr.bf16.gmra.mrb[56].mxu1 %v2265_v31  ;;  %v2153_v55 = vshrl.u32 %v2052_v26, 16 }
  0xc6   : > { %v2155_v32 = vrot.slane %v2153_v55, 7 }
  0xc8   : > { %v2163_v42 = vsel %vm552_vm4, %v2155_v32, %v6871_v50 }
  0xca   : > { %2541 = vmatmul.mubr.bf16.gmra.mrb[80].mxu0 %v2127_v10 }
  0xcb   : > { %2548 = vmatprep.mubr.bf16.mxu0 %v6774_v47  ;;  %v2054_v47 = vld [vmem:[#allocation2 + $0x108] sm:$0x80] }
  0xcc   : > { %v2165_v51 = vshrl.u32 %v2054_v47, 16 }
  0xd2   : > { %2549 = vmatmul.mubr.bf16.gmra.mrb[84].mxu0 %v2139_v9 }
  0xd3   : > { %2556 = vmatprep.mubr.bf16.mxu0 %v6817_v33  ;;  %v2167_v33 = vrot.slane %v2165_v51, 7 }
  0xd5   : > { %v2175_v54 = vsel %vm552_vm4, %v2167_v33, %v2174_v52 }
  0xda   : > { %2557 = vmatmul.mubr.bf16.gmra.mrb[88].mxu0 %v2151_v36 }
  0xdb   : > { %2564 = vmatprep.mubr.bf16.mxu0 %v6842_v63 }
  0xe2   : > { %2565 = vmatmul.mubr.bf16.gmra.mrb[92].mxu0 %v2163_v42 }
  0xe3   : > { %2572 = vmatprep.mubr.bf16.mxu0 %v6980_v3 }
  0xea   : > { %2573 = vmatmul.mubr.bf16.gmra.mrb[96].mxu0 %v2175_v54 }
  0xfd   : > { %v5232_v18 = vpop.f32.mrb[0].mxu0 }
  0xfe   : > { %v5233_v56 = vpop.f32.mrb[1].mxu0 }
  0xff   : > { %v7113_v27 = vadd.f32 %v5233_v56, %v5232_v18  ;;  %v5235_v63 = vpop.f32.mrb[2].mxu0  ;;  %v5326_v57 = vpop.f32.mrb[0].mxu1 }
 0x100   : > { %v5236_v39 = vpop.f32.mrb[3].mxu0  ;;  %v5327_v59 = vpop.f32.mrb[1].mxu1 }
 0x101   : > { %v7115_v16 = vadd.f32 %v5236_v39, %v5235_v63  ;;  %v7117_v50 = vadd.f32 %v5327_v59, %v5326_v57  ;;  %v5329_v62 = vpop.f32.mrb[2].mxu1 }
 0x102   : > { %v5330_v45 = vpop.f32.mrb[3].mxu1 }
 0x103   : > { %v7119_v3 = vadd.f32 %v5330_v45, %v5329_v62 }
 0x105   : > { %v5238_v61 = vpop.f32.mrb[4].mxu0 }
 0x106   : > { %v5239_v24 = vpop.f32.mrb[5].mxu0 }
 0x107   : > { %v7121_v1 = vadd.f32 %v5239_v24, %v5238_v61  ;;  %v5241_v60 = vpop.f32.mrb[6].mxu0  ;;  %v5332_v15 = vpop.f32.mrb[4].mxu1 }
 0x108   : > { %v5242_v23 = vpop.f32.mrb[7].mxu0  ;;  %v5333_v43 = vpop.f32.mrb[5].mxu1 }
 0x109   : > { %v7123_v25 = vadd.f32 %v5242_v23, %v5241_v60  ;;  %v7125_v17 = vadd.f32 %v5333_v43, %v5332_v15  ;;  %v5335_v2 = vpop.f32.mrb[6].mxu1 }
 0x10a   : > { %v5336_v20 = vpop.f32.mrb[7].mxu1 }
 0x10b   : > { %v7127_v11 = vadd.f32 %v5336_v20, %v5335_v2 }
 0x10d   : > { %v5244_v12 = vpop.f32.mrb[8].mxu0 }
 0x10e   : > { %v5245_v49 = vpop.f32.mrb[9].mxu0 }
 0x10f   : > { %v7129_v13 = vadd.f32 %v5245_v49, %v5244_v12  ;;  %v5247_v48 = vpop.f32.mrb[10].mxu0  ;;  %v5338_v37 = vpop.f32.mrb[8].mxu1 }
 0x110   : > { %v5248_v41 = vpop.f32.mrb[11].mxu0  ;;  %v5339_v14 = vpop.f32.mrb[9].mxu1 }
 0x111   : > { %v7131_v19 = vadd.f32 %v5248_v41, %v5247_v48  ;;  %v7133_v4 = vadd.f32 %v5339_v14, %v5338_v37  ;;  %v5341_v5 = vpop.f32.mrb[10].mxu1 }
 0x112   : > { %v5342_v35 = vpop.f32.mrb[11].mxu1 }
 0x113   : > { %v7135_v22 = vadd.f32 %v5342_v35, %v5341_v5 }
 0x115   : > { %v5250_v6 = vpop.f32.mrb[12].mxu0 }
 0x116   : > { %v5251_v21 = vpop.f32.mrb[13].mxu0 }
 0x117   : > { %v7137_v29 = vadd.f32 %v5251_v21, %v5250_v6  ;;  %v5253_v7 = vpop.f32.mrb[14].mxu0  ;;  %v5344_v28 = vpop.f32.mrb[12].mxu1 }
 0x118   : > { %v5254_v58 = vpop.f32.mrb[15].mxu0  ;;  %v5345_v31 = vpop.f32.mrb[13].mxu1 }
 0x119   : > { %v7139_v34 = vadd.f32 %v5254_v58, %v5253_v7  ;;  %v7141_v30 = vadd.f32 %v5345_v31, %v5344_v28  ;;  %v5347_v0 = vpop.f32.mrb[14].mxu1 }
 0x11a   : > { %v5348_v10 = vpop.f32.mrb[15].mxu1 }
 0x11b   : > { %v7143_v8 = vadd.f32 %v5348_v10, %v5347_v0 }
 0x11d   : > { %v5256_v38 = vpop.f32.mrb[16].mxu0 }
 0x11e   : > { %v5257_v40 = vpop.f32.mrb[17].mxu0 }
 0x11f   : > { %v7145_v9 = vadd.f32 %v5257_v40, %v5256_v38  ;;  %v5259_v44 = vpop.f32.mrb[18].mxu0  ;;  %v5350_v46 = vpop.f32.mrb[16].mxu1 }
 0x120   : > { %v5260_v26 = vpop.f32.mrb[19].mxu0  ;;  %v5351_v36 = vpop.f32.mrb[17].mxu1 }
 0x121   : > { %v7147_v55 = vadd.f32 %v5260_v26, %v5259_v44  ;;  %v7149_v32 = vadd.f32 %v5351_v36, %v5350_v46  ;;  %v5353_v47 = vpop.f32.mrb[18].mxu1 }
 0x122   : > { %v5354_v42 = vpop.f32.mrb[19].mxu1 }
 0x123   : > { %v7151_v51 = vadd.f32 %v5354_v42, %v5353_v47 }
 0x125   : > { %v5262_v53 = vpop.f32.mrb[20].mxu0 }
 0x126   : > { %v5263_v33 = vpop.f32.mrb[21].mxu0 }
 0x127   : > { %v7153_v52 = vadd.f32 %v5263_v33, %v5262_v53  ;;  %v5265_v54 = vpop.f32.mrb[22].mxu0  ;;  %v5356_v18 = vpop.f32.mrb[20].mxu1 }
 0x128   : > { %v5266_v56 = vpop.f32.mrb[23].mxu0  ;;  %v5357_v63 = vpop.f32.mrb[21].mxu1 }
 0x129   : > { %v7155_v57 = vadd.f32 %v5266_v56, %v5265_v54  ;;  %v7157_v39 = vadd.f32 %v5357_v63, %v5356_v18  ;;  %v5359_v59 = vpop.f32.mrb[22].mxu1 }
 0x12a   : > { %v5360_v62 = vpop.f32.mrb[23].mxu1 }
 0x12b   : > { %v7159_v45 = vadd.f32 %v5360_v62, %v5359_v59 }
 0x12d   : > { %v5268_v61 = vpop.f32.mrb[24].mxu0 }
 0x12e   : > { %v5269_v24 = vpop.f32.mrb[25].mxu0 }
 0x12f   : > { %v7161_v60 = vadd.f32 %v5269_v24, %v5268_v61  ;;  %v5271_v15 = vpop.f32.mrb[26].mxu0  ;;  %v5362_v23 = vpop.f32.mrb[24].mxu1 }
 0x130   : > { %v5272_v43 = vpop.f32.mrb[27].mxu0  ;;  %v5363_v2 = vpop.f32.mrb[25].mxu1 }
 0x131   : > { %v7163_v20 = vadd.f32 %v5272_v43, %v5271_v15  ;;  %v7165_v12 = vadd.f32 %v5363_v2, %v5362_v23  ;;  %v5365_v49 = vpop.f32.mrb[26].mxu1 }
 0x132   : > { %v5366_v48 = vpop.f32.mrb[27].mxu1 }
 0x133   : > { %v7167_v37 = vadd.f32 %v5366_v48, %v5365_v49 }
 0x135   : > { %v5274_v41 = vpop.f32.mrb[28].mxu0 }
 0x136   : > { %v5275_v14 = vpop.f32.mrb[29].mxu0 }
 0x137   : > { %v7169_v5 = vadd.f32 %v5275_v14, %v5274_v41  ;;  %v5277_v35 = vpop.f32.mrb[30].mxu0  ;;  %v5368_v6 = vpop.f32.mrb[28].mxu1 }
 0x138   : > { %v5278_v21 = vpop.f32.mrb[31].mxu0  ;;  %v5369_v7 = vpop.f32.mrb[29].mxu1 }
 0x139   : > { %v7171_v28 = vadd.f32 %v5278_v21, %v5277_v35  ;;  %v7173_v58 = vadd.f32 %v5369_v7, %v5368_v6  ;;  %v5371_v31 = vpop.f32.mrb[30].mxu1 }
 0x13a   : > { %v5372_v0 = vpop.f32.mrb[31].mxu1 }
 0x13b   : > { %v7175_v10 = vadd.f32 %v5372_v0, %v5371_v31 }
 0x13d   : > { %v5280_v38 = vpop.f32.mrb[32].mxu0 }
 0x13e   : > { %v5281_v40 = vpop.f32.mrb[33].mxu0 }
 0x13f   : > { %v7177_v44 = vadd.f32 %v5281_v40, %v5280_v38  ;;  %v5283_v46 = vpop.f32.mrb[34].mxu0  ;;  %v5374_v26 = vpop.f32.mrb[32].mxu1 }
 0x140   : > { %v5284_v36 = vpop.f32.mrb[35].mxu0  ;;  %v5375_v47 = vpop.f32.mrb[33].mxu1 }
 0x141   : > { %v7179_v42 = vadd.f32 %v5284_v36, %v5283_v46  ;;  %v7181_v53 = vadd.f32 %v5375_v47, %v5374_v26  ;;  %v5377_v33 = vpop.f32.mrb[34].mxu1 }
 0x142   : > { %v5378_v54 = vpop.f32.mrb[35].mxu1 }
 0x143   : > { %v7183_v18 = vadd.f32 %v5378_v54, %v5377_v33 }
 0x145   : > { %v5286_v56 = vpop.f32.mrb[36].mxu0 }
 0x146   : > { %v5287_v63 = vpop.f32.mrb[37].mxu0 }
 0x147   : > { %v5288_v59 = vadd.f32 %v5287_v63, %v5286_v56  ;;  %v5289_v62 = vpop.f32.mrb[38].mxu0  ;;  %v5380_v61 = vpop.f32.mrb[36].mxu1 }
 0x148   : > { %v5290_v24 = vpop.f32.mrb[39].mxu0  ;;  %v5381_v15 = vpop.f32.mrb[37].mxu1 }
 0x149   : > { %v5291_v23 = vadd.f32 %v5290_v24, %v5289_v62  ;;  %v5382_v43 = vadd.f32 %v5381_v15, %v5380_v61  ;;  %v5383_v2 = vpop.f32.mrb[38].mxu1 }
 0x14a   : > { %v5384_v49 = vpop.f32.mrb[39].mxu1 }
 0x14b   : > { %v5385_v48 = vadd.f32 %v5384_v49, %v5383_v2 }
 0x14d   : > { %v5756_v41 = vpop.f32.mrb[40].mxu0 }
 0x14e   : > { %v1596_v14 = vadd.f32 %v5756_v41, %v7121_v1  ;;  %v1587_v35 = vpop.f32.mrb[41].mxu0 }
 0x14f   : > { %v1588_v6 = vadd.f32 %v7113_v27, %v1587_v35  ;;  %v5757_v21 = vpop.f32.mrb[42].mxu0 }
 0x150   : > { %v7188_v7 = vadd.f32 %v7125_v17, %v1596_v14  ;;  %v1599_v31 = vadd.f32 %v5757_v21, %v7123_v25  ;;  %v1590_v0 = vpop.f32.mrb[43].mxu0 }
 0x151   : > { %v1845_v38 = vadd.f32 %v7117_v50, %v1588_v6  ;;  %v1591_v40 = vadd.f32 %v7115_v16, %v1590_v0 }
 0x152   : > { %v7194_v46 = vadd.f32 %v7127_v11, %v1599_v31 }
 0x153   : > { %v1848_v26 = vadd.f32 %v7119_v3, %v1591_v40 }
 0x155   : > { %v5760_v1 = vpop.f32.mrb[44].mxu0 }
 0x156   : > { %v1612_v36 = vadd.f32 %v5760_v1, %v7137_v29  ;;  %v1603_v27 = vpop.f32.mrb[45].mxu0 }
 0x157   : > { %v1604_v47 = vadd.f32 %v7129_v13, %v1603_v27  ;;  %v5761_v17 = vpop.f32.mrb[46].mxu0 }
 0x158   : > { %v7200_v33 = vadd.f32 %v7141_v30, %v1612_v36  ;;  %v1615_v25 = vadd.f32 %v5761_v17, %v7139_v34  ;;  %v1606_v50 = vpop.f32.mrb[47].mxu0 }
 0x159   : > { %v7204_v16 = vadd.f32 %v7133_v4, %v1604_v47  ;;  %v1607_v11 = vadd.f32 %v7131_v19, %v1606_v50 }
 0x15a   : > { %v7208_v3 = vadd.f32 %v7143_v8, %v1615_v25 }
 0x15b   : > { %v7211_v29 = vadd.f32 %v7135_v22, %v1607_v11 }
 0x15d   : > { %v5764_v54 = vpop.f32.mrb[48].mxu0 }
 0x15e   : > { %v1628_v13 = vadd.f32 %v5764_v54, %v7153_v52  ;;  %v1619_v56 = vpop.f32.mrb[49].mxu0 }
 0x15f   : > { %v1620_v30 = vadd.f32 %v7145_v9, %v1619_v56  ;;  %v5765_v63 = vpop.f32.mrb[50].mxu0 }
 0x160   : > { %v7216_v34 = vadd.f32 %v7157_v39, %v1628_v13  ;;  %v1631_v4 = vadd.f32 %v5765_v63, %v7155_v57  ;;  %v1622_v62 = vpop.f32.mrb[51].mxu0 }
 0x161   : > { %v7220_v19 = vadd.f32 %v7149_v32, %v1620_v30  ;;  %v1623_v8 = vadd.f32 %v7147_v55, %v1622_v62 }
 0x162   : > { %v7224_v22 = vadd.f32 %v7159_v45, %v1631_v4 }
 0x163   : > { %v7227_v52 = vadd.f32 %v7151_v51, %v1623_v8 }
 0x165   : > { %v5768_v61 = vpop.f32.mrb[52].mxu0 }
 0x166   : > { %v1644_v9 = vadd.f32 %v5768_v61, %v7169_v5  ;;  %v1635_v24 = vpop.f32.mrb[53].mxu0 }
 0x167   : > { %v1636_v39 = vadd.f32 %v7161_v60, %v1635_v24  ;;  %v5769_v15 = vpop.f32.mrb[54].mxu0 }
 0x168   : > { %v7232_v57 = vadd.f32 %v7173_v58, %v1644_v9  ;;  %v1647_v32 = vadd.f32 %v5769_v15, %v7171_v28  ;;  %v1638_v2 = vpop.f32.mrb[55].mxu0 }
 0x169   : > { %v7236_v55 = vadd.f32 %v7165_v12, %v1636_v39  ;;  %v1639_v45 = vadd.f32 %v7163_v20, %v1638_v2 }
 0x16a   : > { %v7240_v51 = vadd.f32 %v7175_v10, %v1647_v32 }
 0x16b   : > { %v7243_v5 = vadd.f32 %v7167_v37, %v1639_v45 }
 0x16d   : > { %v5772_v49 = vpop.f32.mrb[56].mxu0 }
 0x16e   : > { %v1660_v60 = vadd.f32 %v5772_v49, %v5288_v59  ;;  %v1651_v41 = vpop.f32.mrb[57].mxu0 }
 0x16f   : > { %v1652_v58 = vadd.f32 %v7177_v44, %v1651_v41  ;;  %v5773_v14 = vpop.f32.mrb[58].mxu0 }
 0x170   : > { %v7246_v35 = vadd.f32 %v5382_v43, %v1660_v60  ;;  %v1663_v28 = vadd.f32 %v5773_v14, %v5291_v23  ;;  %v1654_v6 = vpop.f32.mrb[59].mxu0 }
 0x171   : > { %v7249_v12 = vadd.f32 %v7181_v53, %v1652_v58  ;;  %v1655_v20 = vadd.f32 %v7179_v42, %v1654_v6  ;;  %v7260_v53 = vld [vmem:[%s7980_s4] ss:$0 sm:$0xff] }
 0x172   : > { %v7252_v10 = vadd.f32 %v5385_v48, %v1663_v28 }
 0x173   : > { %v7255_v37 = vadd.f32 %v7183_v18, %v1655_v20  ;;  %v7265_v18 = vld [vmem:[%s7981_s5] ss:$0 sm:$0xff] }
 0x175   : > { %v5420_v21 = vpop.f32.mrb[60].mxu0 }
 0x176   : > { %v5421_v59 = vpop.f32.mrb[61].mxu0 }
 0x177   : > { %v5422_v31 = vadd.f32 %v5421_v59, %v5420_v21  ;;  %v5423_v0 = vpop.f32.mrb[62].mxu0  ;;  %v5828_v44 = vpop.f32.mrb[40].mxu1 }
 0x178   : > { %v5424_v40 = vpop.f32.mrb[63].mxu0  ;;  %v2615_v43 = vpop.f32.mrb[41].mxu1 }
 0x179   : > { %v5425_v1 = vadd.f32 %v5424_v40, %v5423_v0  ;;  %v5948_v23 = vadd.f32 %v5422_v31, %v1845_v38  ;;  %v5829_v36 = vpop.f32.mrb[42].mxu1 }
 0x17a   : > { %v2618_v42 = vpop.f32.mrb[43].mxu1 }
 0x17b   : > { %v5949_v48 = vadd.f32 %v5948_v23, %v2615_v43  ;;  %v5956_v27 = vadd.f32 %v5425_v1, %v1848_v26 }
 0x17d   : > { %v2720_v47 = vmul.f32 %v5949_v48, %v7260_v53  ;;  %v5957_v17 = vadd.f32 %v5956_v27, %v2618_v42  ;;  %v5426_v25 = vpop.f32.mrb[64].mxu0 }
 0x17e   : > { %v5427_v50 = vpop.f32.mrb[65].mxu0 }
 0x17f   : > { %v2746_v38 = vadd.f32 %v7265_v18, %v2720_v47  ;;  %v2721_v11 = vmul.f32 %v5957_v17, %v7260_v53  ;;  %v5428_v54 = vadd.f32 %v5427_v50, %v5426_v25  ;;  %v5429_v13 = vpop.f32.mrb[66].mxu0  ;;  %v5832_v56 = vpop.f32.mrb[44].mxu1 }
 0x180   : > { %v5430_v30 = vpop.f32.mrb[67].mxu0  ;;  %v2631_v63 = vpop.f32.mrb[45].mxu1 }
 0x181   : > { %v2747_v26 = vadd.f32 %v7265_v18, %v2721_v11  ;;  %v5944_v4 = vadd.f32 %v5428_v54, %v7188_v7  ;;  %v5431_v62 = vadd.f32 %v5430_v30, %v5429_v13  ;;  %v5833_v8 = vpop.f32.mrb[46].mxu1  ;;  %v2766_v9 = vmax.f32 %v2746_v38, 0.0 }
 0x182   : > { %v2634_v61 = vpop.f32.mrb[47].mxu1 }
 0x183   : > { %v2767_v24 = vmax.f32 %v2747_v26, 0.0  ;;  %v5945_v39 = vadd.f32 %v5944_v4, %v5828_v44  ;;  %v5952_v15 = vadd.f32 %v5431_v62, %v7194_v46 }
 0x185   : > { %v2786_v32 = vpack.c.bf16 %v2767_v24, %v2766_v9  ;;  %v2722_v2 = vmul.f32 %v5945_v39, %v7260_v53  ;;  %v5953_v45 = vadd.f32 %v5952_v15, %v5829_v36  ;;  %v5432_v49 = vpop.f32.mrb[68].mxu0 }
 0x186   : > { %v5433_v60 = vpop.f32.mrb[69].mxu0 }
 0x187   : > { %2796 = vst [vmem:[#allocation2 + $0x20] sm:$0xff] %v2786_v32  ;;  %v2748_v41 = vadd.f32 %v7265_v18, %v2722_v2  ;;  %v2723_v58 = vmul.f32 %v5953_v45, %v7260_v53  ;;  %v5434_v7 = vadd.f32 %v5433_v60, %v5432_v49  ;;  %v5435_v14 = vpop.f32.mrb[70].mxu0  ;;  %v7276_v28 = vpop.f32.mrb[48].mxu1 }
 0x188   : > { %v5436_v6 = vpop.f32.mrb[71].mxu0  ;;  %v2647_v20 = vpop.f32.mrb[49].mxu1 }
 0x189   : > { %v2749_v21 = vadd.f32 %v7265_v18, %v2723_v58  ;;  %v5964_v46 = vadd.f32 %v5434_v7, %v7204_v16  ;;  %v5437_v59 = vadd.f32 %v5436_v6, %v5435_v14  ;;  %v7280_v31 = vpop.f32.mrb[50].mxu1  ;;  %v2768_v44 = vmax.f32 %v2748_v41, 0.0 }
 0x18a   : > { %v2650_v0 = vpop.f32.mrb[51].mxu1 }
 0x18b   : > { %v2769_v40 = vmax.f32 %v2749_v21, 0.0  ;;  %v5965_v43 = vadd.f32 %v5964_v46, %v2631_v63  ;;  %v5972_v1 = vadd.f32 %v5437_v59, %v7211_v29 }
 0x18d   : > { %v2787_v23 = vpack.c.bf16 %v2769_v40, %v2768_v44  ;;  %v2724_v36 = vmul.f32 %v5965_v43, %v7260_v53  ;;  %v5973_v42 = vadd.f32 %v5972_v1, %v2634_v61  ;;  %v5438_v48 = vpop.f32.mrb[72].mxu0 }
 0x18e   : > { %v5439_v27 = vpop.f32.mrb[73].mxu0 }
 0x18f   : > { %2797 = vst [vmem:[#allocation2 + $0x38] sm:$0xff] %v2787_v23  ;;  %v2750_v47 = vadd.f32 %v7265_v18, %v2724_v36  ;;  %v2725_v16 = vmul.f32 %v5973_v42, %v7260_v53  ;;  %v5440_v17 = vadd.f32 %v5439_v27, %v5438_v48  ;;  %v5441_v25 = vpop.f32.mrb[74].mxu0  ;;  %v7286_v50 = vpop.f32.mrb[52].mxu1 }
 0x190   : > { %v5442_v38 = vpop.f32.mrb[75].mxu0  ;;  %v7288_v11 = vpop.f32.mrb[53].mxu1 }
 0x191   : > { %v2751_v29 = vadd.f32 %v7265_v18, %v2725_v16  ;;  %v5960_v54 = vadd.f32 %v5440_v17, %v7200_v33  ;;  %v5443_v13 = vadd.f32 %v5442_v38, %v5441_v25  ;;  %v7292_v30 = vpop.f32.mrb[54].mxu1  ;;  %v2770_v26 = vmax.f32 %v2750_v47, 0.0 }
 0x192   : > { %v7294_v63 = vpop.f32.mrb[55].mxu1 }
 0x193   : > { %v2771_v4 = vmax.f32 %v2751_v29, 0.0  ;;  %v5961_v62 = vadd.f32 %v5960_v54, %v5832_v56  ;;  %v5968_v61 = vadd.f32 %v5443_v13, %v7208_v3 }
 0x195   : > { %v2788_v9 = vpack.c.bf16 %v2771_v4, %v2770_v26  ;;  %v2726_v24 = vmul.f32 %v5961_v62, %v7260_v53  ;;  %v5969_v39 = vadd.f32 %v5968_v61, %v5833_v8  ;;  %v5444_v15 = vpop.f32.mrb[76].mxu0 }
 0x196   : > { %v5445_v32 = vpop.f32.mrb[77].mxu0 }
 0x197   : > { %2798 = vst [vmem:[#allocation2 + $0x50] sm:$0xff] %v2788_v9  ;;  %v2752_v2 = vadd.f32 %v7265_v18, %v2726_v24  ;;  %v2727_v33 = vmul.f32 %v5969_v39, %v7260_v53  ;;  %v5446_v45 = vadd.f32 %v5445_v32, %v5444_v15  ;;  %v5447_v49 = vpop.f32.mrb[78].mxu0  ;;  %v7300_v60 = vpop.f32.mrb[56].mxu1 }
 0x198   : > { %v5448_v41 = vpop.f32.mrb[79].mxu0  ;;  %v7302_v58 = vpop.f32.mrb[57].mxu1 }
 0x199   : > { %v2753_v3 = vadd.f32 %v7265_v18, %v2727_v33  ;;  %v5980_v56 = vadd.f32 %v5446_v45, %v7220_v19  ;;  %v5449_v7 = vadd.f32 %v5448_v41, %v5447_v49  ;;  %v7306_v8 = vpop.f32.mrb[58].mxu1  ;;  %v2772_v6 = vmax.f32 %v2752_v2, 0.0 }
 0x19a   : > { %v7308_v14 = vpop.f32.mrb[59].mxu1 }
 0x19b   : > { %v2773_v21 = vmax.f32 %v2753_v3, 0.0  ;;  %v5981_v46 = vadd.f32 %v5980_v56, %v2647_v20  ;;  %v5988_v59 = vadd.f32 %v5449_v7, %v7227_v52 }
 0x19d   : > { %v2789_v44 = vpack.c.bf16 %v2773_v21, %v2772_v6  ;;  %v2728_v40 = vmul.f32 %v5981_v46, %v7260_v53  ;;  %v5989_v43 = vadd.f32 %v5988_v59, %v2650_v0  ;;  %v5450_v1 = vpop.f32.mrb[80].mxu0 }
 0x19e   : > { %v5451_v23 = vpop.f32.mrb[81].mxu0 }
 0x19f   : > { %2799 = vst [vmem:[#allocation2 + $0x68] sm:$0xff] %v2789_v44  ;;  %v2754_v36 = vadd.f32 %v7265_v18, %v2728_v40  ;;  %v2729_v19 = vmul.f32 %v5989_v43, %v7260_v53  ;;  %v5452_v42 = vadd.f32 %v5451_v23, %v5450_v1  ;;  %v5453_v48 = vpop.f32.mrb[82].mxu0 }
 0x1a0   : > { %v5454_v27 = vpop.f32.mrb[83].mxu0 }
 0x1a1   : > { %v2755_v47 = vadd.f32 %v7265_v18, %v2729_v19  ;;  %v5976_v20 = vadd.f32 %v5452_v42, %v7216_v34  ;;  %v5455_v16 = vadd.f32 %v5454_v27, %v5453_v48  ;;  %v2774_v52 = vmax.f32 %v2754_v36, 0.0 }
 0x1a3   : > { %v2775_v17 = vmax.f32 %v2755_v47, 0.0  ;;  %v5977_v25 = vadd.f32 %v5976_v20, %v7276_v28  ;;  %v5984_v0 = vadd.f32 %v5455_v16, %v7224_v22 }
 0x1a5   : > { %v2790_v38 = vpack.c.bf16 %v2775_v17, %v2774_v52  ;;  %v2730_v29 = vmul.f32 %v5977_v25, %v7260_v53  ;;  %v5985_v54 = vadd.f32 %v5984_v0, %v7280_v31  ;;  %v5456_v13 = vpop.f32.mrb[84].mxu0 }
 0x1a6   : > { %v5457_v26 = vpop.f32.mrb[85].mxu0 }
 0x1a7   : > { %2800 = vst [vmem:[#allocation2 + $0x80] sm:$0xff] %v2790_v38  ;;  %v2756_v4 = vadd.f32 %v7265_v18, %v2730_v29  ;;  %v2731_v62 = vmul.f32 %v5985_v54, %v7260_v53  ;;  %v5458_v34 = vadd.f32 %v5457_v26, %v5456_v13  ;;  %v5459_v61 = vpop.f32.mrb[86].mxu0 }
 0x1a8   : > { %v5460_v9 = vpop.f32.mrb[87].mxu0 }
 0x1a9   : > { %v2757_v24 = vadd.f32 %v7265_v18, %v2731_v62  ;;  %v5996_v28 = vadd.f32 %v5458_v34, %v7236_v55  ;;  %v5461_v22 = vadd.f32 %v5460_v9, %v5459_v61  ;;  %v2776_v39 = vmax.f32 %v2756_v4, 0.0 }
 0x1ab   : > { %v2777_v15 = vmax.f32 %v2757_v24, 0.0  ;;  %v5997_v32 = vadd.f32 %v5996_v28, %v7288_v11  ;;  %v6004_v31 = vadd.f32 %v5461_v22, %v7243_v5 }
 0x1ad   : > { %v2791_v2 = vpack.c.bf16 %v2777_v15, %v2776_v39  ;;  %v2732_v33 = vmul.f32 %v5997_v32, %v7260_v53  ;;  %v6005_v45 = vadd.f32 %v6004_v31, %v7294_v63  ;;  %v5462_v49 = vpop.f32.mrb[88].mxu0 }
 0x1ae   : > { %v5463_v41 = vpop.f32.mrb[89].mxu0 }
 0x1af   : > { %2801 = vst [vmem:[#allocation2 + $0x98] sm:$0xff] %v2791_v2  ;;  %v2758_v3 = vadd.f32 %v7265_v18, %v2732_v33  ;;  %v2733_v56 = vmul.f32 %v6005_v45, %v7260_v53  ;;  %v5464_v55 = vadd.f32 %v5463_v41, %v5462_v49  ;;  %v5465_v7 = vpop.f32.mrb[90].mxu0 }
 0x1b0   : > { %v5466_v6 = vpop.f32.mrb[91].mxu0 }
 0x1b1   : > { %v2759_v21 = vadd.f32 %v7265_v18, %v2733_v56  ;;  %v5992_v11 = vadd.f32 %v5464_v55, %v7232_v57  ;;  %v5467_v5 = vadd.f32 %v5466_v6, %v5465_v7  ;;  %v2778_v46 = vmax.f32 %v2758_v3, 0.0 }
 0x1b3   : > { %v2779_v59 = vmax.f32 %v2759_v21, 0.0  ;;  %v5993_v44 = vadd.f32 %v5992_v11, %v7286_v50  ;;  %v6000_v63 = vadd.f32 %v5467_v5, %v7240_v51 }
 0x1b5   : > { %v2792_v40 = vpack.c.bf16 %v2779_v59, %v2778_v46  ;;  %v2734_v43 = vmul.f32 %v5993_v44, %v7260_v53  ;;  %v6001_v1 = vadd.f32 %v6000_v63, %v7292_v30  ;;  %v5468_v23 = vpop.f32.mrb[92].mxu0 }
 0x1b6   : > { %v5469_v36 = vpop.f32.mrb[93].mxu0 }
 0x1b7   : > { %2802 = vst [vmem:[#allocation2 + $0xb0] sm:$0xff] %v2792_v40  ;;  %v2760_v19 = vadd.f32 %v7265_v18, %v2734_v43  ;;  %v2735_v42 = vmul.f32 %v6001_v1, %v7260_v53  ;;  %v5470_v57 = vadd.f32 %v5469_v36, %v5468_v23  ;;  %v5471_v48 = vpop.f32.mrb[94].mxu0 }
 0x1b8   : > { %v5472_v27 = vpop.f32.mrb[95].mxu0 }
 0x1b9   : > { %v2761_v47 = vadd.f32 %v7265_v18, %v2735_v42  ;;  %v6012_v50 = vadd.f32 %v5470_v57, %v7249_v12  ;;  %v5473_v51 = vadd.f32 %v5472_v27, %v5471_v48  ;;  %v2780_v20 = vmax.f32 %v2760_v19, 0.0 }
 0x1bb   : > { %v2781_v16 = vmax.f32 %v2761_v47, 0.0  ;;  %v6013_v52 = vadd.f32 %v6012_v50, %v7302_v58  ;;  %v6020_v30 = vadd.f32 %v5473_v51, %v7255_v37 }
 0x1bd   : > { %v2793_v17 = vpack.c.bf16 %v2781_v16, %v2780_v20  ;;  %v2736_v25 = vmul.f32 %v6013_v52, %v7260_v53  ;;  %v6021_v0 = vadd.f32 %v6020_v30, %v7308_v14  ;;  %v5474_v38 = vpop.f32.mrb[96].mxu0 }
 0x1be   : > { %v5475_v29 = vpop.f32.mrb[97].mxu0 }
 0x1bf   : > { %2803 = vst [vmem:[#allocation2 + $0xc8] sm:$0xff] %v2793_v17  ;;  %v2762_v54 = vadd.f32 %v7265_v18, %v2736_v25  ;;  %v2737_v13 = vmul.f32 %v6021_v0, %v7260_v53  ;;  %v5476_v12 = vadd.f32 %v5475_v29, %v5474_v38  ;;  %v5477_v26 = vpop.f32.mrb[98].mxu0 }
 0x1c0   : > { %v5478_v4 = vpop.f32.mrb[99].mxu0 }
 0x1c1   : > { %v2763_v62 = vadd.f32 %v7265_v18, %v2737_v13  ;;  %v6008_v58 = vadd.f32 %v5476_v12, %v7246_v35  ;;  %v5479_v37 = vadd.f32 %v5478_v4, %v5477_v26  ;;  %v2782_v34 = vmax.f32 %v2762_v54, 0.0 }
 0x1c3   : > { %v2783_v61 = vmax.f32 %v2763_v62, 0.0  ;;  %v6009_v9 = vadd.f32 %v6008_v58, %v7300_v60  ;;  %v6016_v14 = vadd.f32 %v5479_v37, %v7252_v10  ;;  %v6356_v10 = vmov (!%p5014_p13), 0  }
 0x1c4   : > { %2810 = vst [vmem:[#allocation2 + $0x20] sm:$0xff] (!%p5014_p13), %v6356_v10 }
 0x1c5   : > { %v2794_v24 = vpack.c.bf16 %v2783_v61, %v2782_v34  ;;  %v2738_v28 = vmul.f32 %v6009_v9, %v7260_v53  ;;  %v6017_v22 = vadd.f32 %v6016_v14, %v7306_v8 }
 0x1c7   : > { %2804 = vst [vmem:[#allocation2 + $0xe0] sm:$0xff] %v2794_v24  ;;  %v2764_v39 = vadd.f32 %v7265_v18, %v2738_v28  ;;  %v2739_v15 = vmul.f32 %v6017_v22, %v7260_v53 }
 0x1c9   : > { %v2765_v32 = vadd.f32 %v7265_v18, %v2739_v15  ;;  %v2784_v35 = vmax.f32 %v2764_v39, 0.0  ;;  %2809 = sbr.rel (%p5014_p13) target bundleno = 464 (0x1d0), region = 60 }
 0x1cb   : > { %v2785_v31 = vmax.f32 %v2765_v32, 0.0 }
 0x1cd   : > { %v2795_v2 = vpack.c.bf16 %v2785_v31, %v2784_v35 }
 0x1cf   : > { %2805 = vst [vmem:[#allocation2 + $0xf8] sm:$0xff] %v2795_v2 }
 0x1d0 PF: > { %p5015_p0 = scmp.ne.s32.totalorder %s6338_s30, 1 }
 0x1d1   : > { %v6357_v60 = vmov (!%p5015_p0), 0  }
 0x1d2   : > { %2814 = sbr.rel (%p5015_p0) target bundleno = 473 (0x1d9), region = 64  ;;  %2815 = vst [vmem:[#allocation2 + $0xf8] sm:$0xff] (!%p5015_p0), %v6357_v60 }
 0x1d9 PF: > { %v6244_v53 = vld [vmem:[%s7982_s6 + $0x100] sm:$0xff]   ;;  %v6247_v33 = vld [vmem:[%s7982_s6 + $0x108] sm:$0xff]   ;;  %v6250_v41 = vld [vmem:[%s7982_s6 + $0x110] sm:$0xff]  }
 0x1da   : > { %v6245_v18 = vld [vmem:[%s7982_s6 + $0x140] sm:$0xff]   ;;  %5498 = vmatprep.subr.bf16.mxu0 %v6244_v53  ;;  %v6248_v45 = vld [vmem:[%s7982_s6 + $0x148] sm:$0xff]   ;;  %v6251_v3 = vld [vmem:[%s7982_s6 + $0x150] sm:$0xff]  }
 0x1db   : > { %v6246_v8 = vld [vmem:[%s7982_s6 + $0xc0] sm:$0xff]   ;;  %5846 = vmatprep.subr.bf16.mxu1 %v6245_v18  ;;  %v6249_v49 = vld [vmem:[%s7982_s6 + $0xc8] sm:$0xff]   ;;  %v6252_v56 = vld [vmem:[%s7982_s6 + $0xd0] sm:$0xff]  }
 0x1dc   : > { %5499 = vmatpush3.bf16.msra.mxu0 %v6246_v8  ;;  %5847 = vmatpush3.bf16.msra.mxu1 %v6245_v18  ;;  %v6253_v55 = vld [vmem:[%s7982_s6 + $0x118] sm:$0xff]   ;;  %v6256_v21 = vld [vmem:[%s7982_s6 + $0x120] sm:$0xff]   ;;  %v6259_v46 = vld [vmem:[%s7982_s6 + $0x128] sm:$0xff]  }
 0x1dd   : > { %5500 = vmatprep.subr.bf16.mxu0 %v6247_v33  ;;  %5848 = vmatprep.subr.bf16.mxu1 %v6248_v45  ;;  %v6254_v7 = vld [vmem:[%s7982_s6 + $0x158] sm:$0xff]   ;;  %v6257_v11 = vld [vmem:[%s7982_s6 + $0x160] sm:$0xff]   ;;  %v6260_v59 = vld [vmem:[%s7982_s6 + $0x168] sm:$0xff]  }
 0x1de   : > { %v6255_v6 = vld [vmem:[%s7982_s6 + $0xd8] sm:$0xff]   ;;  %v6258_v5 = vld [vmem:[%s7982_s6 + $0xe0] sm:$0xff]   ;;  %v6261_v44 = vld [vmem:[%s7982_s6 + $0xe8] sm:$0xff]  }
 0x1df   : > { %v6262_v63 = vld [vmem:[%s7982_s6 + $0x130] sm:$0xff]   ;;  %v6265_v1 = vld [vmem:[%s7982_s6 + $0x138] sm:$0xff]   ;;  %v3178_v36 = vld [vmem:[#allocation2 + $0x40] sm:$0x1] }
 0x1e0   : > { %5501 = vmatpush3.bf16.msra.mxu0 %v6249_v49  ;;  %5849 = vmatpush3.bf16.msra.mxu1 %v6248_v45  ;;  %v6263_v40 = vld [vmem:[%s7982_s6 + $0x170] sm:$0xff]   ;;  %v7423_v23 = vld [vmem:[#allocation2 + $0x38] sm:$0xff]  ;;  %v3189_v27 = vshll.u32 %v3178_v36, 16  ;;  %v6268_v12 = vld [vmem:[%s7982_s6 + $0x80] sm:$0xff]  }
 0x1e1   : > { %5502 = vmatprep.subr.bf16.mxu0 %v6250_v41  ;;  %5850 = vmatprep.subr.bf16.mxu1 %v6251_v3  ;;  %v6264_v43 = vld [vmem:[%s7982_s6 + $0xf0] sm:$0xff]   ;;  %v6266_v42 = vld [vmem:[%s7982_s6 + $0x178] sm:$0xff]   ;;  %v3082_v57 = vshll.u32 %v7423_v23, 16  ;;  %v3079_v48 = vshrl.u32 %v7423_v23, 16  ;;  %v7445_v26 = vld [vmem:[#allocation2 + $0x68] sm:$0xff] }
 0x1e2   : > { %v3058_v19 = vld [vmem:[#allocation2 + $0x30] sm:$0x80]  ;;  %v6267_v51 = vld [vmem:[%s7982_s6 + $0xf8] sm:$0xff]   ;;  %3474 = vmatprep.mubr.bf16.mxu0 %v7423_v23  ;;  %v3191_v17 = vrot.slane %v3189_v27, 1  ;;  %v3180_v4 = vld [vmem:[#allocation2 + $0x70] sm:$0x1] }
 0x1e3   : > { %v3075_v47 = vshrl.u32 %v3058_v19, 16  ;;  %v7430_v50 = vld [vmem:[#allocation2 + $0x50] sm:$0xff]  ;;  %v3179_v52 = vld [vmem:[#allocation2 + $0x58] sm:$0x1]  ;;  %v3186_v30 = vrot.slane %v3082_v57, 1  ;;  %v3081_v0 = vrot.slane %v3079_v48, 7 }
 0x1e4   : > { %5503 = vmatpush3.bf16.msra.mxu0 %v6252_v56  ;;  %5851 = vmatpush3.bf16.msra.mxu1 %v6251_v3  ;;  %v3091_v20 = vshrl.u32 %v7430_v50, 16  ;;  %v3094_v16 = vshll.u32 %v7430_v50, 16  ;;  %v3196_v29 = vshll.u32 %v3179_v52, 16  ;;  %v3103_v34 = vshrl.u32 %v7445_v26, 16  ;;  %v3060_v9 = vld [vmem:[#allocation2 + $0x48] sm:$0x80] }
 0x1e5   : > { %5504 = vmatprep.subr.bf16.mxu0 %v6253_v55  ;;  %5852 = vmatprep.subr.bf16.mxu1 %v6254_v7  ;;  %v3077_v25 = vrot.slane %v3075_v47, 7  ;;  %v7438_v54 = vor.u32 %v3186_v30, %v3079_v48  ;;  %v7440_v13 = vor.u32 %v3082_v57, %v3081_v0  ;;  %v3106_v61 = vshll.u32 %v7445_v26, 16  ;;  %v7451_v14 = vld [vmem:[#allocation2 + $0x80] sm:$0xff]  ;;  %v3181_v39 = vld [vmem:[#allocation2 + $0x88] sm:$0x1]  ;;  %v7468_v8 = vld [vmem:[#allocation2 + $0x98] sm:$0xff] }
 0x1e6   : > { %v3193_v38 = vrot.slane %v3094_v16, 1  ;;  %v3093_v62 = vrot.slane %v3091_v20, 7  ;;  %v3198_v37 = vrot.slane %v3196_v29, 1  ;;  %v3203_v28 = vshll.u32 %v3180_v4, 16  ;;  %v6269_v35 = vld [vmem:[%s7982_s6 + $0x88] sm:$0xff]   ;;  %v7474_v55 = vld [vmem:[#allocation2 + $0xb0] sm:$0xff] }
 0x1e7   : > { %v3192_v24 = vsel %vm878_vm8, %v7438_v54, %v3191_v17  ;;  %v3087_v22 = vshrl.u32 %v3060_v9, 16  ;;  %v3085_v15 = vsel %vm552_vm4, %v3077_v25, %v7440_v13  ;;  %v3200_v31 = vrot.slane %v3106_v61, 1  ;;  %v3182_v33 = vld [vmem:[#allocation2 + $0xa0] sm:$0x1]  ;;  %v3062_v56 = vld [vmem:[#allocation2 + $0x60] sm:$0x80] }
 0x1e8   : > { %5505 = vmatpush3.bf16.msra.mxu0 %v6255_v6  ;;  %5853 = vmatpush3.bf16.msra.mxu1 %v6254_v7  ;;  %v7447_v58 = vor.u32 %v3193_v38, %v3091_v20  ;;  %v3205_v2 = vrot.slane %v3203_v28, 1  ;;  %v3115_v10 = vshrl.u32 %v7451_v14, 16  ;;  %v3118_v60 = vshll.u32 %v7451_v14, 16  ;;  %v6270_v6 = vld [vmem:[%s7982_s6 + $0x90] sm:$0xff]   ;;  %v6271_v20 = vld [vmem:[%s7982_s6 + $0x98] sm:$0xff]   ;;  %v7508_v17 = vld [vmem:[#allocation2 + $0xe0] sm:$0xff] }
 0x1e9   : > { %5506 = vmatprep.subr.bf16.mxu0 %v6256_v21  ;;  %5854 = vmatprep.subr.bf16.mxu1 %v6257_v11  ;;  %v3210_v53 = vshll.u32 %v3181_v39, 16  ;;  %v7466_v18 = vor.u32 %v3200_v31, %v3103_v34  ;;  %v3089_v45 = vrot.slane %v3087_v22, 7  ;;  %v7470_v49 = vor.u32 %v3094_v16, %v3093_v62  ;;  %v3064_v30 = vld [vmem:[#allocation2 + $0x78] sm:$0x80]  ;;  %v6272_v4 = vld [vmem:[%s7982_s6 + $0xa0] sm:$0xff]  }
 0x1ea   : > { %v3199_v32 = vsel %vm878_vm8, %v7447_v58, %v3198_v37  ;;  %5862 = vmatprep.mubr.bf16.mxu1 %v3192_v24  ;;  %v3207_v41 = vrot.slane %v3118_v60, 1  ;;  %v3127_v21 = vshrl.u32 %v7468_v8, 16  ;;  %v3105_v36 = vrot.slane %v3103_v34, 7  ;;  %v3185_v37 = vld [vmem:[#allocation2 + $0xe8] sm:$0x1]  ;;  %v6275_v24 = vld [vmem:[%s7982_s6 + $0x40] sm:$0xff]  }
 0x1eb   : > { %v3212_v3 = vrot.slane %v3210_v53, 1  ;;  %v3206_v7 = vsel %vm878_vm8, %v7466_v18, %v3205_v2  ;;  %v3139_v27 = vshrl.u32 %v7474_v55, 16  ;;  %v3111_v9 = vshrl.u32 %v3064_v30, 16  ;;  %v6276_v28 = vld [vmem:[%s7982_s6] sm:$0xff]  }
 0x1ec   : > { %5507 = vmatpush3.bf16.msra.mxu0 %v6258_v5  ;;  %5855 = vmatpush3.bf16.msra.mxu1 %v6257_v11  ;;  %v3130_v11 = vshll.u32 %v7468_v8, 16  ;;  %v3217_v5 = vshll.u32 %v3182_v33, 16  ;;  %v7515_v29 = vor.u32 %v3106_v61, %v3105_v36  ;;  %v3166_v61 = vshll.u32 %v7508_v17, 16  ;;  %v2938_v33 = vld [vmem:[#allocation2 + $0x28] sm:$0x1] }
 0x1ed   : > { %5508 = vmatprep.subr.bf16.mxu0 %v6259_v46  ;;  %5856 = vmatprep.subr.bf16.mxu1 %v6260_v59  ;;  %v3183_v46 = vld [vmem:[#allocation2 + $0xb8] sm:$0x1]  ;;  %v3163_v31 = vshrl.u32 %v7508_v17, 16  ;;  %v3238_v2 = vshll.u32 %v3185_v37, 16 }
 0x1ee   : > { %v3224_v19 = vshll.u32 %v3183_v46, 16 }
 0x1f0   : > { %5509 = vmatpush3.bf16.msra.mxu0 %v6261_v44  ;;  %5857 = vmatpush3.bf16.msra.mxu1 %v6260_v59  ;;  %v7486_v59 = vor.u32 %v3207_v41, %v3115_v10  ;;  %v3099_v44 = vshrl.u32 %v3062_v56, 16  ;;  %v3113_v41 = vrot.slane %v3111_v9, 7 }
 0x1f1   : > { %5510 = vmatprep.subr.bf16.mxu0 %v6262_v63  ;;  %5858 = vmatprep.subr.bf16.mxu1 %v6263_v40  ;;  %v3142_v63 = vshll.u32 %v7474_v55, 16 }
 0x1f2   : > { %v3213_v57 = vsel %vm878_vm8, %v7486_v59, %v3212_v3  ;;  %v3101_v16 = vrot.slane %v3099_v44, 7  ;;  %v3235_v3 = vrot.slane %v3166_v61, 1  ;;  %v2949_v44 = vshll.u32 %v2938_v33, 16 }
 0x1f3   : > { %v3221_v47 = vrot.slane %v3142_v63, 1 }
 0x1f4   : > { %5511 = vmatpush3.bf16.msra.mxu0 %v6264_v43  ;;  %5859 = vmatpush3.bf16.msra.mxu1 %v6263_v40  ;;  %v3214_v40 = vrot.slane %v3130_v11, 1  ;;  %v3219_v43 = vrot.slane %v3217_v5, 1  ;;  %v7568_v36 = vor.u32 %v3235_v3, %v3163_v31  ;;  %v6279_v3 = vld [vmem:[%s7982_s6 + $0x180] sm:$0xff]  }
 0x1f5   : > { %5512 = vmatprep.subr.bf16.mxu0 %v6265_v1  ;;  %5860 = vmatprep.subr.bf16.mxu1 %v6266_v42  ;;  %v3097_v1 = vsel %vm552_vm4, %v3089_v45, %v7470_v49  ;;  %v7525_v34 = vor.u32 %v3221_v47, %v3139_v27 }
 0x1f6   : > { %v7499_v48 = vor.u32 %v3214_v40, %v3127_v21  ;;  %v3240_v40 = vrot.slane %v3238_v2, 1  ;;  %v6288_v2 = vld [vmem:[%s7982_s6 + $0x58] sm:$0xff]  }
 0x1f8   : > { %5513 = vmatpush3.bf16.msra.mxu0 %v6267_v51  ;;  %5861 = vmatpush3.bf16.msra.mxu1 %v6266_v42  ;;  %v7493_v42 = vld [vmem:[#allocation2 + $0xc8] sm:$0xff]  ;;  %v3184_v51 = vld [vmem:[#allocation2 + $0xd0] sm:$0x1]  ;;  %v3220_v25 = vsel %vm878_vm8, %v7499_v48, %v3219_v43 }
 0x1f9   : > { %5878 = vmatprep.subr.bf16.mxu1 %v6268_v12  ;;  %v3154_v52 = vshll.u32 %v7493_v42, 16  ;;  %v3151_v0 = vshrl.u32 %v7493_v42, 16  ;;  %v3231_v38 = vshll.u32 %v3184_v51, 16  ;;  %5578 = vmatprep.subr.bf16.mxu0 %v6275_v24  ;;  %v6274_v43 = vld [vmem:[%s7982_s6 + $0xb0] sm:$0xff]   ;;  %v6281_v51 = vld [vmem:[%s7982_s6 + $0x8] sm:$0xff]  }
 0x1fa   : > { %v3068_v24 = vld [vmem:[#allocation2 + $0xa8] sm:$0x80] }
 0x1fb   : > { %3475 = vmatmul.mubr.bf16.vlgmr.msra.gmra.mrb[100].mxu0 %v3085_v15  ;;  %5863 = vmatmul.mubr.bf16.vlgmr.msra.gmra.mrb[60].mxu1 %v3199_v32  ;;  %v3228_v62 = vrot.slane %v3154_v52, 1  ;;  %v3233_v39 = vrot.slane %v3231_v38, 1  ;;  %v3117_v15 = vrot.slane %v3115_v10, 7  ;;  %v7540_v32 = vld [vmem:[#allocation2 + $0x20] sm:$0xff]  ;;  %v6273_v10 = vld [vmem:[%s7982_s6 + $0xa8] sm:$0xff]   ;;  %v3129_v38 = vrot.slane %v3127_v21, 7 }
 0x1fc   : > { %5879 = vmatpush3.bf16.msra.mxu1 %v6268_v12  ;;  %3482 = vmatprep.mubr.bf16.mxu0 %v7430_v50  ;;  %v3226_v12 = vrot.slane %v3224_v19, 1  ;;  %v2842_v53 = vshll.u32 %v7540_v32, 16  ;;  %v2839_v56 = vshrl.u32 %v7540_v32, 16  ;;  %v6278_v21 = vld [vmem:[%s7982_s6 + $0x1c0] sm:$0xff]  }
 0x1fd   : > { %5880 = vmatprep.subr.bf16.mxu1 %v6269_v35  ;;  %5866 = vmatprep.mubr.bf16.mxu1 %v3206_v7  ;;  %v7536_v22 = vor.u32 %v3228_v62, %v3151_v0  ;;  %v3066_v7 = vld [vmem:[#allocation2 + $0x90] sm:$0x80] }
 0x1fe   : > { %5579 = vmatpush3.bf16.msra.mxu0 %v6276_v28  ;;  %v3227_v45 = vsel %vm878_vm8, %v7525_v34, %v3226_v12  ;;  %v2946_v46 = vrot.slane %v2842_v53, 1  ;;  %v3123_v19 = vshrl.u32 %v3066_v7, 16  ;;  %v6277_v12 = vld [vmem:[%s7982_s6 + $0xb8] sm:$0xff]   ;;  %v6284_v28 = vld [vmem:[%s7982_s6 + $0x50] sm:$0xff]   ;;  %v3141_v7 = vrot.slane %v3139_v27, 7 }
 0x1ff   : > { %v3234_v5 = vsel %vm878_vm8, %v7536_v22, %v3233_v39  ;;  %v6286_v39 = vld [vmem:[%s7982_s6 + $0x10] sm:$0xff]  }
 0x200   : > { %5881 = vmatpush3.bf16.msra.mxu1 %v6269_v35  ;;  %v3109_v35 = vsel %vm552_vm4, %v3101_v16, %v7515_v29  ;;  %v2940_v16 = vld [vmem:[#allocation2 + $0x58] sm:$0x1] }
 0x201   : > { %5882 = vmatprep.subr.bf16.mxu1 %v6270_v6  ;;  %v2963_v9 = vshll.u32 %v2940_v16, 16  ;;  %v6294_v16 = vld [vmem:[%s7982_s6 + $0x20] sm:$0xff]  }
 0x203   : > { %3483 = vmatmul.mubr.bf16.gmra.mrb[104].mxu0 %v3097_v1  ;;  %5867 = vmatmul.mubr.bf16.gmra.mrb[64].mxu1 %v3213_v57  ;;  %v7564_v1 = vor.u32 %v3118_v60, %v3117_v15  ;;  %v6280_v57 = vld [vmem:[%s7982_s6 + $0x48] sm:$0xff]   ;;  %v2947_v60 = vor.u32 %v2946_v46, %v2839_v56  ;;  %v7600_v15 = vor.u32 %v3130_v11, %v3129_v38  ;;  %v2965_v33 = vrot.slane %v2963_v9, 1 }
 0x204   : > { %5883 = vmatpush3.bf16.msra.mxu1 %v6270_v6  ;;  %3490 = vmatprep.mubr.bf16.mxu0 %v7445_v26  ;;  %v2939_v6 = vld [vmem:[#allocation2 + $0x40] sm:$0x1]  ;;  %v6283_v46 = vld [vmem:[%s7982_s6 + $0x188] sm:$0xff]  }
 0x205   : > { %5884 = vmatprep.subr.bf16.mxu1 %v6271_v20  ;;  %5870 = vmatprep.mubr.bf16.mxu1 %v3220_v25  ;;  %v2956_v47 = vshll.u32 %v2939_v6, 16  ;;  %v3121_v30 = vsel %vm552_vm4, %v3113_v41, %v7564_v1  ;;  %v3241_v25 = vsel %vm878_vm8, %v7568_v36, %v3240_v40  ;;  %v6282_v6 = vld [vmem:[%s7982_s6 + $0x1c8] sm:$0xff]   ;;  %v6290_v40 = vld [vmem:[%s7982_s6 + $0x18] sm:$0xff]  }
 0x206   : > { %5580 = vmatprep.subr.bf16.mxu0 %v6280_v57  ;;  %v6292_v57 = vld [vmem:[%s7982_s6 + $0x60] sm:$0xff]   ;;  %v6296_v9 = vld [vmem:[%s7982_s6 + $0x68] sm:$0xff]  }
 0x207   : > { %5581 = vmatpush3.bf16.msra.mxu0 %v6281_v51  ;;  %v2958_v62 = vrot.slane %v2956_v47, 1  ;;  %v7634_v47 = vor.u32 %v3142_v63, %v3141_v7  ;;  %v3070_v51 = vld [vmem:[#allocation2 + $0xc0] sm:$0x80] }
 0x208   : > { %5885 = vmatpush3.bf16.msra.mxu1 %v6271_v20  ;;  %v2951_v20 = vrot.slane %v2949_v44, 1  ;;  %5582 = vmatprep.subr.bf16.mxu0 %v6284_v28  ;;  %v6298_v28 = vld [vmem:[%s7982_s6 + $0x28] sm:$0xff]  }
 0x209   : > { %5886 = vmatprep.subr.bf16.mxu1 %v6272_v4  ;;  %v2959_v11 = vsel %vm878_vm8, %v7438_v54, %v2958_v62  ;;  %v2966_v54 = vsel %vm878_vm8, %v7447_v58, %v2965_v33  ;;  %v6289_v62 = vld [vmem:[%s7982_s6 + $0x1d8] sm:$0xff]   ;;  %v6293_v33 = vld [vmem:[%s7982_s6 + $0x1e0] sm:$0xff]  }
 0x20a   : > { %v2952_v37 = vsel %vm878_vm8, %v2947_v60, %v2951_v20  ;;  %v2943_v60 = vld [vmem:[#allocation2 + $0xa0] sm:$0x1] }
 0x20b   : > { %3491 = vmatmul.mubr.bf16.gmra.mrb[108].mxu0 %v3109_v35  ;;  %5871 = vmatmul.mubr.bf16.gmra.mrb[68].mxu1 %v3227_v45  ;;  %v2941_v35 = vld [vmem:[#allocation2 + $0x70] sm:$0x1]  ;;  %v3135_v45 = vshrl.u32 %v3068_v24, 16  ;;  %v2944_v24 = vld [vmem:[#allocation2 + $0xb8] sm:$0x1] }
 0x20c   : > { %5887 = vmatpush3.bf16.msra.mxu1 %v6272_v4  ;;  %3498 = vmatprep.mubr.bf16.mxu0 %v7451_v14  ;;  %v3125_v4 = vrot.slane %v3123_v19, 7  ;;  %v6285_v19 = vld [vmem:[%s7982_s6 + $0x1d0] sm:$0xff]  }
 0x20d   : > { %5888 = vmatprep.subr.bf16.mxu1 %v6273_v10  ;;  %5874 = vmatprep.mubr.bf16.mxu1 %v3234_v5  ;;  %v2942_v5 = vld [vmem:[#allocation2 + $0x88] sm:$0x1]  ;;  %v3137_v44 = vrot.slane %v3135_v45, 7  ;;  %v6300_v45 = vld [vmem:[%s7982_s6 + $0x70] sm:$0xff]  }
 0x20e   : > { %5583 = vmatpush3.bf16.msra.mxu0 %v6286_v39  ;;  %v3133_v41 = vsel %vm552_vm4, %v3125_v4, %v7600_v15  ;;  %v2977_v27 = vshll.u32 %v2942_v5, 16  ;;  %v2984_v4 = vshll.u32 %v2943_v60, 16  ;;  %v2818_v60 = vld [vmem:[#allocation2 + $0x18] sm:$0x80] }
 0x20f   : > { %5584 = vmatprep.subr.bf16.mxu0 %v6288_v2  ;;  %v3145_v63 = vsel %vm552_vm4, %v3137_v44, %v7634_v47 }
 0x210   : > { %5889 = vmatpush3.bf16.msra.mxu1 %v6273_v10  ;;  %v2970_v10 = vshll.u32 %v2941_v35, 16  ;;  %v2979_v20 = vrot.slane %v2977_v27, 1  ;;  %v2986_v2 = vrot.slane %v2984_v4, 1  ;;  %v6299_v27 = vld [vmem:[%s7982_s6 + $0x1a8] sm:$0xff]   ;;  %v6305_v4 = vld [vmem:[%s7982_s6 + $0x1f8] sm:$0xff]  }
 0x211   : > { %5890 = vmatprep.subr.bf16.mxu1 %v6274_v43 }
 0x212   : > { %5585 = vmatpush3.bf16.msra.mxu0 %v6290_v40  ;;  %v6304_v40 = vld [vmem:[%s7982_s6 + $0x78] sm:$0xff]  }
 0x213   : > { %3499 = vmatmul.mubr.bf16.gmra.mrb[112].mxu0 %v3121_v30  ;;  %5875 = vmatmul.mubr.bf16.gmra.mrb[72].mxu1 %v3241_v25  ;;  %v6287_v30 = vld [vmem:[%s7982_s6 + $0x190] sm:$0xff]   ;;  %v3153_v25 = vrot.slane %v3151_v0, 7  ;;  %v2980_v0 = vsel %vm878_vm8, %v7486_v59, %v2979_v20  ;;  %v3975_v20 = vld [vmem:[#allocation2 + $0x48] sm:$0x80] }
 0x214   : > { %5891 = vmatpush3.bf16.msra.mxu1 %v6274_v43  ;;  %3506 = vmatprep.mubr.bf16.mxu0 %v7468_v8  ;;  %v2972_v43 = vrot.slane %v2970_v10, 1  ;;  %v3072_v10 = vld [vmem:[#allocation2 + $0xd8] sm:$0x80] }
 0x215   : > { %5892 = vmatprep.subr.bf16.mxu1 %v6277_v12  ;;  %5894 = vmatprep.mubr.bf16.mxu1 %v2952_v37  ;;  %v6291_v37 = vld [vmem:[%s7982_s6 + $0x198] sm:$0xff]   ;;  %v7665_v35 = vor.u32 %v3154_v52, %v3153_v25  ;;  %v6295_v52 = vld [vmem:[%s7982_s6 + $0x1a0] sm:$0xff]   ;;  %v3159_v5 = vshrl.u32 %v3072_v10, 16  ;;  %v2822_v10 = vld [vmem:[#allocation2 + $0x48] sm:$0x80] }
 0x216   : > { %5586 = vmatprep.subr.bf16.mxu0 %v6292_v57  ;;  %v2973_v38 = vsel %vm878_vm8, %v7466_v18, %v2972_v43 }
 0x217   : > { %5587 = vmatpush3.bf16.msra.mxu0 %v6294_v16  ;;  %v3161_v43 = vrot.slane %v3159_v5, 7  ;;  %v6306_v16 = vld [vmem:[%s7982_s6 + $0x38] sm:$0xff]  }
 0x218   : > { %5893 = vmatpush3.bf16.msra.mxu1 %v6277_v12  ;;  %v3147_v12 = vshrl.u32 %v3070_v51, 16  ;;  %5588 = vmatprep.subr.bf16.mxu0 %v6296_v9  ;;  %v6301_v51 = vld [vmem:[%s7982_s6 + $0x1f0] sm:$0xff]   ;;  %v6308_v9 = vld [vmem:[%s7982_s6 + $0x200] sm:$0xff]  }
 0x219   : > { %5658 = vmatprep.subr.bf16.mxu1 %v6278_v21  ;;  %v2991_v21 = vshll.u32 %v2944_v24, 16  ;;  %v2820_v24 = vld [vmem:[#allocation2 + $0x30] sm:$0x80] }
 0x21a   : > { %v3149_v39 = vrot.slane %v3147_v12, 7  ;;  %v3992_v12 = vshrl.u32 %v3975_v20, 16  ;;  %v6314_v20 = vld [vmem:[%s7982_s6 + $0x230] sm:$0xff]  }
 0x21b   : > { %3507 = vmatmul.mubr.bf16.gmra.mrb[116].mxu0 %v3133_v41  ;;  %5895 = vmatmul.mubr.bf16.vlgmr.msra.gmra.mrb[60].mxu1 %v2959_v11  ;;  %v2945_v41 = vld [vmem:[#allocation2 + $0xd0] sm:$0x1]  ;;  %v2993_v11 = vrot.slane %v2991_v21, 1 }
 0x21c   : > { %5659 = vmatpush3.bf16.msra.mxu1 %v6279_v3  ;;  %3514 = vmatprep.mubr.bf16.mxu0 %v7474_v55  ;;  %v3165_v3 = vrot.slane %v3163_v31, 7  ;;  %v3157_v7 = vsel %vm552_vm4, %v3149_v39, %v7665_v35  ;;  %v6302_v31 = vld [vmem:[%s7982_s6 + $0x30] sm:$0xff]  }
 0x21d   : > { %5660 = vmatprep.subr.bf16.mxu1 %v6282_v6  ;;  %5898 = vmatprep.mubr.bf16.mxu1 %v2966_v54  ;;  %v2987_v6 = vsel %vm878_vm8, %v7499_v48, %v2986_v2  ;;  %v6297_v54 = vld [vmem:[%s7982_s6 + $0x1e8] sm:$0xff]   ;;  %v2994_v44 = vsel %vm878_vm8, %v7525_v34, %v2993_v11  ;;  %v2847_v2 = vshrl.u32 %v2820_v24, 16  ;;  %v6310_v11 = vld [vmem:[%s7982_s6 + $0x210] sm:$0xff]   ;;  %v3987_v24 = vld [vmem:[#allocation2 + $0xd8] sm:$0x80] }
 0x21e   : > { %5589 = vmatpush3.bf16.msra.mxu0 %v6298_v28  ;;  %v3977_v28 = vld [vmem:[#allocation2 + $0x60] sm:$0x80] }
 0x21f   : > { %5590 = vmatprep.subr.bf16.mxu0 %v6300_v45 }
 0x220   : > { %5661 = vmatpush3.bf16.msra.mxu1 %v6283_v46  ;;  %v2998_v46 = vshll.u32 %v2945_v41, 16  ;;  %v3979_v41 = vld [vmem:[#allocation2 + $0x78] sm:$0x80] }
 0x221   : > { %5662 = vmatprep.subr.bf16.mxu1 %v6285_v19  ;;  %v7699_v19 = vor.u32 %v3166_v61, %v3165_v3 }
 0x222   : > { %v3000_v57 = vrot.slane %v2998_v46, 1  ;;  %5591 = vmatpush3.bf16.msra.mxu0 %v6302_v31 }
 0x223   : > { %3515 = vmatmul.mubr.bf16.gmra.mrb[120].mxu0 %v3145_v63  ;;  %5899 = vmatmul.mubr.bf16.gmra.mrb[64].mxu1 %v2973_v38  ;;  %v3169_v61 = vsel %vm552_vm4, %v3161_v43, %v7699_v19  ;;  %v6303_v63 = vld [vmem:[%s7982_s6 + $0x1b0] sm:$0xff]   ;;  %v2835_v38 = vshrl.u32 %v2818_v60, 16  ;;  %v6313_v43 = vld [vmem:[%s7982_s6 + $0x228] sm:$0xff]  }
 0x224   : > { %5663 = vmatpush3.bf16.msra.mxu1 %v6287_v30  ;;  %3522 = vmatprep.mubr.bf16.mxu0 %v7493_v42  ;;  %v2841_v30 = vrot.slane %v2839_v56, 7  ;;  %v3001_v25 = vsel %vm878_vm8, %v7536_v22, %v3000_v57  ;;  %v6307_v56 = vld [vmem:[%s7982_s6 + $0x1b8] sm:$0xff]   ;;  %v3983_v60 = vld [vmem:[#allocation2 + $0xa8] sm:$0x80] }
 0x225   : > { %5664 = vmatprep.subr.bf16.mxu1 %v6289_v62  ;;  %5902 = vmatprep.mubr.bf16.mxu1 %v2980_v0  ;;  %v2837_v62 = vrot.slane %v2835_v38, 7  ;;  %v3994_v0 = vrot.slane %v3992_v12, 7  ;;  %v3985_v12 = vld [vmem:[#allocation2 + $0xc0] sm:$0x80] }
 0x226   : > { %5592 = vmatprep.subr.bf16.mxu0 %v6304_v40 }
 0x227   : > { %5593 = vmatpush3.bf16.msra.mxu0 %v6306_v16  ;;  %v4002_v39 = vsel %vm552_vm4, %v3994_v0, %v7470_v49 }
 0x228   : > { %5665 = vmatpush3.bf16.msra.mxu1 %v6291_v37  ;;  %v2844_v37 = vor.u32 %v2842_v53, %v2841_v30  ;;  %v2849_v53 = vrot.slane %v2847_v2, 7  ;;  %v7783_v2 = vld [vmem:[#allocation2 + $0xf8] sm:$0xff] }
 0x229   : > { %5666 = vmatprep.subr.bf16.mxu1 %v6293_v33  ;;  %v4004_v33 = vshrl.u32 %v3977_v28, 16 }
 0x22a   : > { %v2845_v21 = vsel %vm552_vm4, %v2837_v62, %v2844_v37  ;;  %v4052_v37 = vshrl.u32 %v3985_v12, 16 }
 0x22b   : > { %3523 = vmatmul.mubr.bf16.gmra.mrb[124].mxu0 %v3157_v7  ;;  %5903 = vmatmul.mubr.bf16.gmra.mrb[68].mxu1 %v2987_v6  ;;  %v4006_v45 = vrot.slane %v4004_v33, 7  ;;  %v2859_v7 = vshrl.u32 %v2822_v10, 16  ;;  %v6311_v6 = vld [vmem:[%s7982_s6 + $0x218] sm:$0xff]   ;;  %v4083_v10 = vshll.u32 %v7783_v2, 16 }
 0x22c   : > { %5667 = vmatpush3.bf16.msra.mxu1 %v6295_v52  ;;  %3530 = vmatprep.mubr.bf16.mxu0 %v7508_v17  ;;  %v2857_v52 = vsel %vm552_vm4, %v2849_v53, %v7440_v13  ;;  %v2824_v13 = vld [vmem:[#allocation2 + $0x60] sm:$0x80]  ;;  %v4054_v0 = vrot.slane %v4052_v37, 7 }
 0x22d   : > { %5668 = vmatprep.subr.bf16.mxu1 %v6297_v54  ;;  %5906 = vmatprep.mubr.bf16.mxu1 %v2994_v44  ;;  %v4014_v3 = vsel %vm552_vm4, %v4006_v45, %v7515_v29  ;;  %v2861_v5 = vrot.slane %v2859_v7, 7  ;;  %v3981_v54 = vld [vmem:[#allocation2 + $0x90] sm:$0x80]  ;;  %v6312_v44 = vld [vmem:[%s7982_s6 + $0x220] sm:$0xff]  }
 0x22e   : > { %v2832_v53 = vld [vmem:[#allocation2 + $0xc0] sm:$0x80]  ;;  %v3989_v45 = vld [vmem:[#allocation2 + $0xf0] sm:$0x80] }
 0x22f   : > { %v2869_v31 = vsel %vm552_vm4, %v2861_v5, %v7470_v49  ;;  %v2826_v49 = vld [vmem:[#allocation2 + $0x78] sm:$0x80] }
 0x230   : > { %5669 = vmatpush3.bf16.msra.mxu1 %v6299_v27  ;;  %v2871_v27 = vshrl.u32 %v2824_v13, 16  ;;  %v4097_v13 = vld [vmem:[#allocation2 + $0x88] sm:$0x1] }
 0x231   : > { %5670 = vmatprep.subr.bf16.mxu1 %v6301_v51 }
 0x232   : > { %v2873_v57 = vrot.slane %v2871_v27, 7  ;;  %v4098_v27 = vld [vmem:[#allocation2 + $0xa0] sm:$0x1] }
 0x233   : > { %3531 = vmatmul.mubr.bf16.gmra.mrb[128].mxu0 %v3169_v61  ;;  %5907 = vmatmul.mubr.bf16.gmra.mrb[72].mxu1 %v3001_v25  ;;  %v2883_v61 = vshrl.u32 %v2826_v49, 16  ;;  %v6315_v25 = vld [vmem:[%s7982_s6 + $0x238] sm:$0xff]  }
 0x234   : > { %5671 = vmatpush3.bf16.msra.mxu1 %v6303_v63  ;;  %3812 = vmatprep.mubr.bf16.mxu0 %v7540_v32  ;;  %v6309_v32 = vld [vmem:[%s7982_s6 + $0x208] sm:$0xff]   ;;  %v2881_v16 = vsel %vm552_vm4, %v2873_v57, %v7515_v29  ;;  %v2828_v29 = vld [vmem:[#allocation2 + $0x90] sm:$0x80]  ;;  %v4127_v57 = vshll.u32 %v4098_v27, 16 }
 0x235   : > { %5672 = vmatprep.subr.bf16.mxu1 %v6305_v4  ;;  %4391 = vmatprep.mubr.bf16.mxu1 %v7430_v50  ;;  %v2885_v63 = vrot.slane %v2883_v61, 7  ;;  %v2895_v62 = vshrl.u32 %v2828_v29, 16 }
 0x236   : > { %v4129_v49 = vrot.slane %v4127_v57, 1 }
 0x237   : > { %v2893_v4 = vsel %vm552_vm4, %v2885_v63, %v7564_v1 }
 0x238   : > { %5673 = vmatpush3.bf16.msra.mxu1 %v6307_v56 }
 0x239   : > { %5910 = vmatprep.subr.bf16.mxu1 %v6308_v9 }
 0x23b   : > { %3813 = vmatmul.mubr.bf16.vlgmr.msra.gmra.mrb[132].mxu0 %v2845_v21  ;;  %4392 = vmatmul.mubr.bf16.vlgmr.msra.gmra.mrb[76].mxu1 %v4002_v39  ;;  %v4064_v39 = vshrl.u32 %v3987_v24, 16 }
 0x23c   : > { %5911 = vmatpush3.bf16.msra.mxu1 %v6308_v9  ;;  %3820 = vmatprep.mubr.bf16.mxu0 %v7423_v23  ;;  %v4016_v23 = vshrl.u32 %v3979_v41, 16  ;;  %v2830_v9 = vld [vmem:[#allocation2 + $0xa8] sm:$0x80]  ;;  %v2919_v41 = vshrl.u32 %v2832_v53, 16 }
 0x23d   : > { %4399 = vmatprep.mubr.bf16.mxu1 %v7445_v26  ;;  %5912 = vmatprep.subr.bf16.mxu1 %v6309_v32  ;;  %v2907_v21 = vshrl.u32 %v2830_v9, 16  ;;  %v4066_v33 = vrot.slane %v4064_v39, 7 }
 0x23e   : > { %v4018_v46 = vrot.slane %v4016_v23, 7 }
 0x240   : > { %5913 = vmatpush3.bf16.msra.mxu1 %v6309_v32  ;;  %v4026_v40 = vsel %vm552_vm4, %v4018_v46, %v7564_v1  ;;  %v4062_v1 = vsel %vm552_vm4, %v4054_v0, %v7665_v35  ;;  %v4080_v32 = vshrl.u32 %v7783_v2, 16  ;;  %v4096_v46 = vld [vmem:[#allocation2 + $0x70] sm:$0x1] }
 0x241   : > { %5914 = vmatprep.subr.bf16.mxu1 %v6310_v11 }
 0x243   : > { %3821 = vmatmul.mubr.bf16.gmra.mrb[136].mxu0 %v2857_v52  ;;  %4400 = vmatmul.mubr.bf16.gmra.mrb[80].mxu1 %v4014_v3  ;;  %v4074_v52 = vsel %vm552_vm4, %v4066_v33, %v7699_v19  ;;  %v4076_v3 = vshrl.u32 %v3989_v45, 16 }
 0x244   : > { %3828 = vmatprep.mubr.bf16.mxu0 %v7430_v50  ;;  %4407 = vmatprep.mubr.bf16.mxu1 %v7451_v14  ;;  %v4028_v50 = vshrl.u32 %v3981_v54, 16  ;;  %v4113_v54 = vshll.u32 %v4096_v46, 16 }
 0x245   : > { %5915 = vmatpush3.bf16.msra.mxu1 %v6310_v11  ;;  %v4078_v23 = vrot.slane %v4076_v3, 7 }
 0x246   : > { %5916 = vmatprep.subr.bf16.mxu1 %v6311_v6  ;;  %v4030_v51 = vrot.slane %v4028_v50, 7  ;;  %v4099_v50 = vld [vmem:[#allocation2 + $0xb8] sm:$0x1] }
 0x248   : > { %v4038_v30 = vsel %vm552_vm4, %v4030_v51, %v7600_v15  ;;  %v4134_v51 = vshll.u32 %v4099_v50, 16 }
 0x249   : > { %5917 = vmatpush3.bf16.msra.mxu1 %v6311_v6 }
 0x24a   : > { %5918 = vmatprep.subr.bf16.mxu1 %v6312_v44 }
 0x24b   : > { %3829 = vmatmul.mubr.bf16.gmra.mrb[140].mxu0 %v2869_v31  ;;  %4408 = vmatmul.mubr.bf16.gmra.mrb[84].mxu1 %v4026_v40  ;;  %v4120_v31 = vshll.u32 %v4097_v13, 16 }
 0x24c   : > { %3836 = vmatprep.mubr.bf16.mxu0 %v7445_v26  ;;  %4415 = vmatprep.mubr.bf16.mxu1 %v7468_v8  ;;  %v4040_v26 = vshrl.u32 %v3983_v60, 16  ;;  %v4100_v60 = vld [vmem:[#allocation2 + $0xd0] sm:$0x1] }
 0x24d   : > { %5919 = vmatpush3.bf16.msra.mxu1 %v6312_v44  ;;  %v4122_v40 = vrot.slane %v4120_v31, 1 }
 0x24e   : > { %5920 = vmatprep.subr.bf16.mxu1 %v6313_v43  ;;  %v4042_v38 = vrot.slane %v4040_v26, 7 }
 0x250   : > { %v4050_v56 = vsel %vm552_vm4, %v4042_v38, %v7634_v47  ;;  %v4152_v38 = vrot.slane %v4083_v10, 1 }
 0x251   : > { %5921 = vmatpush3.bf16.msra.mxu1 %v6313_v43 }
 0x252   : > { %5922 = vmatprep.subr.bf16.mxu1 %v6314_v20 }
 0x253   : > { %3837 = vmatmul.mubr.bf16.gmra.mrb[144].mxu0 %v2881_v16  ;;  %4416 = vmatmul.mubr.bf16.gmra.mrb[88].mxu1 %v4038_v30  ;;  %v4130_v16 = vsel %vm878_vm8, %v7499_v48, %v4129_v49  ;;  %v4141_v30 = vshll.u32 %v4100_v60, 16  ;;  %v4153_v48 = vor.u32 %v4152_v38, %v4080_v32 }
 0x254   : > { %3844 = vmatprep.mubr.bf16.mxu0 %v7451_v14  ;;  %4423 = vmatprep.mubr.bf16.mxu1 %v7474_v55  ;;  %v2897_v14 = vrot.slane %v2895_v62, 7 }
 0x255   : > { %5923 = vmatpush3.bf16.msra.mxu1 %v6314_v20  ;;  %v4101_v20 = vld [vmem:[#allocation2 + $0xe8] sm:$0x1] }
 0x256   : > { %5924 = vmatprep.subr.bf16.mxu1 %v6315_v25  ;;  %v2905_v28 = vsel %vm552_vm4, %v2897_v14, %v7600_v15  ;;  %v4095_v15 = vld [vmem:[#allocation2 + $0x58] sm:$0x1]  ;;  %v4148_v26 = vshll.u32 %v4101_v20, 16 }
 0x257   : > { %v4106_v7 = vshll.u32 %v4095_v15, 16 }
 0x259   : > { %5925 = vmatpush3.bf16.msra.mxu1 %v6315_v25  ;;  %v4108_v5 = vrot.slane %v4106_v7, 1  ;;  %v4150_v25 = vrot.slane %v4148_v26, 1 }
 0x25b   : > { %3845 = vmatmul.mubr.bf16.gmra.mrb[148].mxu0 %v2893_v4  ;;  %4424 = vmatmul.mubr.bf16.gmra.mrb[92].mxu1 %v4050_v56  ;;  %v4109_v44 = vsel %vm878_vm8, %v7447_v58, %v4108_v5  ;;  %v4136_v58 = vrot.slane %v4134_v51, 1  ;;  %v4151_v12 = vsel %vm878_vm8, %v7568_v36, %v4150_v25 }
 0x25c   : > { %3852 = vmatprep.mubr.bf16.mxu0 %v7468_v8  ;;  %4431 = vmatprep.mubr.bf16.mxu1 %v7493_v42  ;;  %v2909_v8 = vrot.slane %v2907_v21, 7 }
 0x25d   : > { %v4137_v61 = vsel %vm878_vm8, %v7525_v34, %v4136_v58 }
 0x25e   : > { %v2917_v11 = vsel %vm552_vm4, %v2909_v8, %v7634_v47 }
 0x263   : > { %3853 = vmatmul.mubr.bf16.gmra.mrb[152].mxu0 %v2905_v28  ;;  %4432 = vmatmul.mubr.bf16.gmra.mrb[96].mxu1 %v4062_v1 }
 0x264   : > { %3860 = vmatprep.mubr.bf16.mxu0 %v7474_v55  ;;  %4439 = vmatprep.mubr.bf16.mxu1 %v7508_v17  ;;  %v4082_v55 = vrot.slane %v4080_v32, 7  ;;  %v2921_v17 = vrot.slane %v2919_v41, 7 }
 0x266   : > { %v4085_v6 = vor.u32 %v4083_v10, %v4082_v55  ;;  %v2929_v47 = vsel %vm552_vm4, %v2921_v17, %v7665_v35  ;;  %v4123_v35 = vsel %vm878_vm8, %v7486_v59, %v4122_v40  ;;  %v4102_v59 = vld [vmem:[#allocation2 + $0x100] sm:$0x1] }
 0x267   : > { %v4155_v29 = vshll.u32 %v4102_v59, 16 }
 0x268   : > { %v4086_v19 = vsel %vm552_vm4, %v4078_v23, %v4085_v6 }
 0x269   : > { %v4157_v4 = vrot.slane %v4155_v29, 1 }
 0x26b   : > { %3861 = vmatmul.mubr.bf16.gmra.mrb[156].mxu0 %v2917_v11  ;;  %4440 = vmatmul.mubr.bf16.gmra.mrb[100].mxu1 %v4074_v52  ;;  %v4158_v34 = vsel %vm878_vm8, %v4153_v48, %v4157_v4 }
 0x26c   : > { %3868 = vmatprep.mubr.bf16.mxu0 %v7493_v42  ;;  %4447 = vmatprep.mubr.bf16.mxu1 %v7783_v2  ;;  %v4115_v42 = vrot.slane %v4113_v54, 1 }
 0x26e   : > { %v4116_v43 = vsel %vm878_vm8, %v7466_v18, %v4115_v42  ;;  %v4143_v18 = vrot.slane %v4141_v30, 1 }
 0x270   : > { %v4144_v63 = vsel %vm878_vm8, %v7536_v22, %v4143_v18 }
 0x273   : > { %3869 = vmatmul.mubr.bf16.gmra.mrb[160].mxu0 %v2929_v47  ;;  %4448 = vmatmul.mubr.bf16.gmra.mrb[104].mxu1 %v4086_v19 }
 0x274   : > { %5926 = vmatprep.mubr.bf16.mxu1 %v4109_v44 }
 0x27b   : > { %5927 = vmatmul.mubr.bf16.vlgmr.msra.gmra.mrb[60].mxu1 %v4116_v43 }
 0x27c   : > { %5930 = vmatprep.mubr.bf16.mxu1 %v4123_v35 }
 0x283   : > { %5931 = vmatmul.mubr.bf16.gmra.mrb[64].mxu1 %v4130_v16 }
 0x284   : > { %5934 = vmatprep.mubr.bf16.mxu1 %v4137_v61 }
 0x28b   : > { %5935 = vmatmul.mubr.bf16.gmra.mrb[68].mxu1 %v4144_v63 }
 0x28c   : > { %5938 = vmatprep.mubr.bf16.mxu1 %v4151_v12 }
 0x293   : > { %5939 = vmatmul.mubr.bf16.gmra.mrb[72].mxu1 %v4158_v34 }
 0x2ce   : > { %v5514_v56 = vpop.f32.mrb[100].mxu0 }
 0x2cf   : > { %v5515_v62 = vpop.f32.mrb[101].mxu0 }
 0x2d0   : > { %v5516_v37 = vadd.f32 %v5515_v62, %v5514_v56  ;;  %v5517_v14 = vpop.f32.mrb[102].mxu0 }
 0x2d1   : > { %v5518_v0 = vpop.f32.mrb[103].mxu0 }
 0x2d2   : > { %v5519_v9 = vadd.f32 %v5518_v0, %v5517_v14 }
 0x2d6   : > { %v5520_v24 = vpop.f32.mrb[104].mxu0 }
 0x2d7   : > { %v5521_v22 = vpop.f32.mrb[105].mxu0 }
 0x2d8   : > { %v7813_v28 = vadd.f32 %v5521_v22, %v5520_v24  ;;  %v5523_v1 = vpop.f32.mrb[106].mxu0 }
 0x2d9   : > { %v5524_v21 = vpop.f32.mrb[107].mxu0 }
 0x2da   : > { %v7815_v36 = vadd.f32 %v5524_v21, %v5523_v1 }
 0x2de   : > { %v5526_v39 = vpop.f32.mrb[108].mxu0 }
 0x2df   : > { %v5527_v2 = vpop.f32.mrb[109].mxu0 }
 0x2e0   : > { %v7817_v8 = vadd.f32 %v5527_v2, %v5526_v39  ;;  %v5529_v33 = vpop.f32.mrb[110].mxu0 }
 0x2e1   : > { %v5530_v32 = vpop.f32.mrb[111].mxu0 }
 0x2e2   : > { %v7819_v53 = vadd.f32 %v5530_v32, %v5529_v33 }
 0x2e6   : > { %v5532_v45 = vpop.f32.mrb[112].mxu0 }
 0x2e7   : > { %v5533_v15 = vpop.f32.mrb[113].mxu0 }
 0x2e8   : > { %v7821_v10 = vadd.f32 %v5533_v15, %v5532_v45  ;;  %v5535_v41 = vpop.f32.mrb[114].mxu0 }
 0x2e9   : > { %v5536_v11 = vpop.f32.mrb[115].mxu0 }
 0x2ea   : > { %v7823_v52 = vadd.f32 %v5536_v11, %v5535_v41 }
 0x2ee   : > { %v5538_v3 = vpop.f32.mrb[116].mxu0 }
 0x2ef   : > { %v5539_v55 = vpop.f32.mrb[117].mxu0 }
 0x2f0   : > { %v7825_v7 = vadd.f32 %v5539_v55, %v5538_v3  ;;  %v5541_v17 = vpop.f32.mrb[118].mxu0 }
 0x2f1   : > { %v5542_v23 = vpop.f32.mrb[119].mxu0 }
 0x2f2   : > { %v7827_v6 = vadd.f32 %v5542_v23, %v5541_v17 }
 0x2f6   : > { %v5544_v5 = vpop.f32.mrb[120].mxu0 }
 0x2f7   : > { %v5545_v46 = vpop.f32.mrb[121].mxu0 }
 0x2f8   : > { %v7829_v13 = vadd.f32 %v5545_v46, %v5544_v5  ;;  %v5547_v47 = vpop.f32.mrb[122].mxu0 }
 0x2f9   : > { %v5548_v19 = vpop.f32.mrb[123].mxu0 }
 0x2fa   : > { %v7831_v54 = vadd.f32 %v5548_v19, %v5547_v47 }
 0x2fe   : > { %v5550_v44 = vpop.f32.mrb[124].mxu0 }
 0x2ff   : > { %v5551_v31 = vpop.f32.mrb[125].mxu0 }
 0x300   : > { %v7833_v42 = vadd.f32 %v5551_v31, %v5550_v44  ;;  %v5553_v40 = vpop.f32.mrb[126].mxu0 }
 0x301   : > { %v5554_v27 = vpop.f32.mrb[127].mxu0 }
 0x302   : > { %v7835_v50 = vadd.f32 %v5554_v27, %v5553_v40 }
 0x306   : > { %v5556_v43 = vpop.f32.mrb[128].mxu0 }
 0x307   : > { %v5557_v57 = vpop.f32.mrb[129].mxu0 }
 0x308   : > { %v7837_v35 = vadd.f32 %v5557_v57, %v5556_v43  ;;  %v5559_v51 = vpop.f32.mrb[130].mxu0 }
 0x309   : > { %v5560_v49 = vpop.f32.mrb[131].mxu0 }
 0x30a   : > { %v7839_v58 = vadd.f32 %v5560_v49, %v5559_v51 }
 0x30e   : > { %v5594_v60 = vpop.f32.mrb[132].mxu0  ;;  %v5674_v20 = vpop.f32.mrb[76].mxu1 }
 0x30f   : > { %v5595_v16 = vpop.f32.mrb[133].mxu0  ;;  %v5675_v30 = vpop.f32.mrb[77].mxu1 }
 0x310   : > { %v5596_v61 = vadd.f32 %v5595_v16, %v5594_v60  ;;  %v5676_v26 = vadd.f32 %v5675_v30, %v5674_v20  ;;  %v5597_v18 = vpop.f32.mrb[134].mxu0  ;;  %v5677_v25 = vpop.f32.mrb[78].mxu1 }
 0x311   : > { %v5598_v59 = vpop.f32.mrb[135].mxu0  ;;  %v5678_v63 = vpop.f32.mrb[79].mxu1 }
 0x312   : > { %v6025_v38 = vadd.f32 %v5596_v61, %v5516_v37  ;;  %v5599_v29 = vadd.f32 %v5598_v59, %v5597_v18  ;;  %v5679_v12 = vadd.f32 %v5678_v63, %v5677_v25 }
 0x314   : > { %v6031_v48 = vadd.f32 %v5599_v29, %v5519_v9  ;;  %v7841_v4 = vadd.f32 %v6025_v38, %v5676_v26 }
 0x316   : > { %v5600_v34 = vpop.f32.mrb[136].mxu0  ;;  %v5680_v56 = vpop.f32.mrb[80].mxu1  ;;  %v7843_v62 = vadd.f32 %v6031_v48, %v5679_v12 }
 0x317   : > { %v5601_v14 = vpop.f32.mrb[137].mxu0  ;;  %v5681_v0 = vpop.f32.mrb[81].mxu1 }
 0x318   : > { %v5602_v24 = vadd.f32 %v5601_v14, %v5600_v34  ;;  %v5682_v22 = vadd.f32 %v5681_v0, %v5680_v56  ;;  %v5603_v1 = vpop.f32.mrb[138].mxu0  ;;  %v5683_v21 = vpop.f32.mrb[82].mxu1 }
 0x319   : > { %v5604_v39 = vpop.f32.mrb[139].mxu0  ;;  %v5684_v2 = vpop.f32.mrb[83].mxu1 }
 0x31a   : > { %v6022_v33 = vadd.f32 %v5602_v24, %v7813_v28  ;;  %v5605_v37 = vadd.f32 %v5604_v39, %v5603_v1  ;;  %v5685_v32 = vadd.f32 %v5684_v2, %v5683_v21 }
 0x31c   : > { %v6028_v9 = vadd.f32 %v5605_v37, %v7815_v36  ;;  %v7847_v45 = vadd.f32 %v6022_v33, %v5682_v22 }
 0x31e   : > { %v5606_v15 = vpop.f32.mrb[140].mxu0  ;;  %v5686_v41 = vpop.f32.mrb[84].mxu1  ;;  %v7849_v11 = vadd.f32 %v6028_v9, %v5685_v32 }
 0x31f   : > { %v5607_v3 = vpop.f32.mrb[141].mxu0  ;;  %v5687_v55 = vpop.f32.mrb[85].mxu1 }
 0x320   : > { %v5608_v17 = vadd.f32 %v5607_v3, %v5606_v15  ;;  %v5688_v23 = vadd.f32 %v5687_v55, %v5686_v41  ;;  %v5609_v5 = vpop.f32.mrb[142].mxu0  ;;  %v5689_v46 = vpop.f32.mrb[86].mxu1 }
 0x321   : > { %v5610_v47 = vpop.f32.mrb[143].mxu0  ;;  %v5690_v19 = vpop.f32.mrb[87].mxu1 }
 0x322   : > { %v6037_v28 = vadd.f32 %v5608_v17, %v7817_v8  ;;  %v5611_v44 = vadd.f32 %v5610_v47, %v5609_v5  ;;  %v5691_v31 = vadd.f32 %v5690_v19, %v5689_v46 }
 0x324   : > { %v6043_v36 = vadd.f32 %v5611_v44, %v7819_v53  ;;  %v7853_v40 = vadd.f32 %v6037_v28, %v5688_v23 }
 0x326   : > { %v5612_v27 = vpop.f32.mrb[144].mxu0  ;;  %v5692_v43 = vpop.f32.mrb[88].mxu1  ;;  %v7855_v57 = vadd.f32 %v6043_v36, %v5691_v31 }
 0x327   : > { %v5613_v51 = vpop.f32.mrb[145].mxu0  ;;  %v5693_v49 = vpop.f32.mrb[89].mxu1 }
 0x328   : > { %v5614_v60 = vadd.f32 %v5613_v51, %v5612_v27  ;;  %v5694_v20 = vadd.f32 %v5693_v49, %v5692_v43  ;;  %v5615_v16 = vpop.f32.mrb[146].mxu0  ;;  %v5695_v30 = vpop.f32.mrb[90].mxu1 }
 0x329   : > { %v5616_v61 = vpop.f32.mrb[147].mxu0  ;;  %v5696_v26 = vpop.f32.mrb[91].mxu1 }
 0x32a   : > { %v6034_v8 = vadd.f32 %v5614_v60, %v7821_v10  ;;  %v5617_v18 = vadd.f32 %v5616_v61, %v5615_v16  ;;  %v5697_v25 = vadd.f32 %v5696_v26, %v5695_v30 }
 0x32c   : > { %v6040_v53 = vadd.f32 %v5617_v18, %v7823_v52  ;;  %v7859_v59 = vadd.f32 %v6034_v8, %v5694_v20 }
 0x32e   : > { %v5618_v63 = vpop.f32.mrb[148].mxu0  ;;  %v5698_v38 = vpop.f32.mrb[92].mxu1  ;;  %v7861_v29 = vadd.f32 %v6040_v53, %v5697_v25 }
 0x32f   : > { %v5619_v12 = vpop.f32.mrb[149].mxu0  ;;  %v5699_v48 = vpop.f32.mrb[93].mxu1 }
 0x330   : > { %v5620_v34 = vadd.f32 %v5619_v12, %v5618_v63  ;;  %v5700_v56 = vadd.f32 %v5699_v48, %v5698_v38  ;;  %v5621_v14 = vpop.f32.mrb[150].mxu0  ;;  %v5701_v0 = vpop.f32.mrb[94].mxu1 }
 0x331   : > { %v5622_v24 = vpop.f32.mrb[151].mxu0  ;;  %v5702_v22 = vpop.f32.mrb[95].mxu1 }
 0x332   : > { %v6049_v10 = vadd.f32 %v5620_v34, %v7825_v7  ;;  %v5623_v1 = vadd.f32 %v5622_v24, %v5621_v14  ;;  %v5703_v21 = vadd.f32 %v5702_v22, %v5701_v0  ;;  %v7888_v22 = vld [vmem:[%s7983_s7] ss:$0 sm:$0xff] }
 0x334   : > { %v6055_v52 = vadd.f32 %v5623_v1, %v7827_v6  ;;  %v7865_v39 = vadd.f32 %v6049_v10, %v5700_v56  ;;  %v5202_v1 = vld [vmem:[%s6579_s23 + $0x8] sm:$0xff]  }
 0x336   : > { %v5624_v2 = vpop.f32.mrb[152].mxu0  ;;  %v5704_v33 = vpop.f32.mrb[96].mxu1  ;;  %v7867_v37 = vadd.f32 %v6055_v52, %v5703_v21 }
 0x337   : > { %v5625_v32 = vpop.f32.mrb[153].mxu0  ;;  %v5705_v9 = vpop.f32.mrb[97].mxu1 }
 0x338   : > { %v5626_v15 = vadd.f32 %v5625_v32, %v5624_v2  ;;  %v5706_v41 = vadd.f32 %v5705_v9, %v5704_v33  ;;  %v5627_v3 = vpop.f32.mrb[154].mxu0  ;;  %v5707_v55 = vpop.f32.mrb[98].mxu1  ;;  %v5131_v33 = vld [vmem:[%s6579_s23] sm:$0xff]  }
 0x339   : > { %v5628_v17 = vpop.f32.mrb[155].mxu0  ;;  %v5708_v23 = vpop.f32.mrb[99].mxu1 }
 0x33a   : > { %v6046_v7 = vadd.f32 %v5626_v15, %v7829_v13  ;;  %v5629_v5 = vadd.f32 %v5628_v17, %v5627_v3  ;;  %v5709_v46 = vadd.f32 %v5708_v23, %v5707_v55  ;;  %v5136_v15 = vunpack.c.l.bf16 %v5202_v1 }
 0x33b   : > { %v5132_v55 = vunpack.c.l.bf16 %v5131_v33 }
 0x33c   : > { %v6052_v6 = vadd.f32 %v5629_v5, %v7831_v54  ;;  %v7871_v47 = vadd.f32 %v6046_v7, %v5706_v41  ;;  %v5137_v5 = vunpack.c.h.bf16 %v5202_v1  ;;  %v5206_v1 = vld [vmem:[%s6579_s23 + $0x28] sm:$0xff]  }
 0x33e   : > { %v5630_v19 = vpop.f32.mrb[156].mxu0  ;;  %v5710_v28 = vpop.f32.mrb[100].mxu1  ;;  %v7873_v44 = vadd.f32 %v6052_v6, %v5709_v46  ;;  %v5133_v6 = vunpack.c.h.bf16 %v5131_v33 }
 0x33f   : > { %v5631_v31 = vpop.f32.mrb[157].mxu0  ;;  %v5711_v36 = vpop.f32.mrb[101].mxu1 }
 0x340   : > { %v5632_v27 = vadd.f32 %v5631_v31, %v5630_v19  ;;  %v5712_v43 = vadd.f32 %v5711_v36, %v5710_v28  ;;  %v5633_v51 = vpop.f32.mrb[158].mxu0  ;;  %v5713_v49 = vpop.f32.mrb[102].mxu1  ;;  %v5203_v31 = vld [vmem:[%s6579_s23 + $0x10] sm:$0xff]  }
 0x341   : > { %v5634_v60 = vpop.f32.mrb[159].mxu0  ;;  %v5714_v20 = vpop.f32.mrb[103].mxu1 }
 0x342   : > { %v6061_v13 = vadd.f32 %v5632_v27, %v7833_v42  ;;  %v5635_v16 = vadd.f32 %v5634_v60, %v5633_v51  ;;  %v5715_v30 = vadd.f32 %v5714_v20, %v5713_v49 }
 0x344   : > { %v6067_v54 = vadd.f32 %v5635_v16, %v7835_v50  ;;  %v7877_v61 = vadd.f32 %v6061_v13, %v5712_v43  ;;  %v5140_v16 = vunpack.c.l.bf16 %v5203_v31 }
 0x346   : > { %v5636_v26 = vpop.f32.mrb[160].mxu0  ;;  %v5716_v8 = vpop.f32.mrb[104].mxu1  ;;  %v7879_v18 = vadd.f32 %v6067_v54, %v5715_v30 }
 0x347   : > { %v5637_v25 = vpop.f32.mrb[161].mxu0  ;;  %v5717_v53 = vpop.f32.mrb[105].mxu1 }
 0x348   : > { %v5638_v63 = vadd.f32 %v5637_v25, %v5636_v26  ;;  %v5718_v38 = vadd.f32 %v5717_v53, %v5716_v8  ;;  %v5639_v12 = vpop.f32.mrb[162].mxu0  ;;  %v5719_v48 = vpop.f32.mrb[106].mxu1 }
 0x349   : > { %v5640_v34 = vpop.f32.mrb[163].mxu0  ;;  %v5720_v42 = vpop.f32.mrb[107].mxu1 }
 0x34a   : > { %v6058_v56 = vadd.f32 %v5638_v63, %v7837_v35  ;;  %v5641_v14 = vadd.f32 %v5640_v34, %v5639_v12  ;;  %v5721_v50 = vadd.f32 %v5720_v42, %v5719_v48  ;;  %v7898_v35 = vld [vmem:[%s7984_s8] ss:$0 sm:$0xff] }
 0x34c   : > { %v6064_v0 = vadd.f32 %v5641_v14, %v7839_v58  ;;  %v7883_v24 = vadd.f32 %v6058_v56, %v5718_v38 }
 0x34e   : > { %v5928_v10 = vpop.f32.mrb[60].mxu1  ;;  %v7891_v21 = vadd.f32 %v6064_v0, %v5721_v50  ;;  %v5141_v50 = vunpack.c.h.bf16 %v5203_v31  ;;  %v5153_v31 = vunpack.c.h.bf16 %v5206_v1 }
 0x34f   : > { %v6024_v52 = vadd.f32 %v7847_v45, %v5928_v10  ;;  %v4490_v2 = vpop.f32.mrb[61].mxu1 }
 0x350   : > { %v6027_v58 = vadd.f32 %v7841_v4, %v4490_v2  ;;  %v5929_v32 = vpop.f32.mrb[62].mxu1 }
 0x351   : > { %v4577_v9 = vmul.f32 %v6024_v52, %v7888_v22  ;;  %v6030_v41 = vadd.f32 %v7849_v11, %v5929_v32  ;;  %v4493_v3 = vpop.f32.mrb[63].mxu1  ;;  %v5204_v11 = vld [vmem:[%s6579_s23 + $0x18] sm:$0xff]   ;;  %v5205_v52 = vld [vmem:[%s6579_s23 + $0x20] sm:$0xff]  }
 0x352   : > { %v4575_v45 = vmul.f32 %v6027_v58, %v7888_v22  ;;  %v6033_v17 = vadd.f32 %v7843_v62, %v4493_v3  ;;  %v5144_v20 = vunpack.c.l.bf16 %v5204_v11  ;;  %v5145_v42 = vunpack.c.h.bf16 %v5204_v11 }
 0x353   : > { %v4599_v23 = vadd.f32 %v7898_v35, %v4577_v9  ;;  %v4578_v7 = vmul.f32 %v6030_v41, %v7888_v22  ;;  %v5152_v41 = vunpack.c.l.bf16 %v5206_v1 }
 0x354   : > { %v4597_v4 = vadd.f32 %v7898_v35, %v4575_v45  ;;  %v4576_v46 = vmul.f32 %v6033_v17, %v7888_v22  ;;  %v5148_v45 = vunpack.c.l.bf16 %v5205_v52 }
 0x355   : > { %v4647_v19 = vadd.f32 %v5136_v15, %v4599_v23  ;;  %v4600_v28 = vadd.f32 %v7898_v35, %v4578_v7 }
 0x356   : > { %v4645_v36 = vadd.f32 %v5132_v55, %v4597_v4  ;;  %v4598_v27 = vadd.f32 %v7898_v35, %v4576_v46  ;;  %v5932_v43 = vpop.f32.mrb[64].mxu1 }
 0x357   : > { %v4648_v62 = vadd.f32 %v5137_v5, %v4600_v28  ;;  %v6036_v51 = vadd.f32 %v7859_v59, %v5932_v43  ;;  %v4506_v49 = vpop.f32.mrb[65].mxu1  ;;  %v4663_v54 = vmax.f32 %v4647_v19, 0.0  ;;  %v5149_v43 = vunpack.c.h.bf16 %v5205_v52 }
 0x358   : > { %v4646_v60 = vadd.f32 %v5133_v6, %v4598_v27  ;;  %v6039_v13 = vadd.f32 %v7853_v40, %v4506_v49  ;;  %v5933_v30 = vpop.f32.mrb[66].mxu1  ;;  %v4661_v63 = vmax.f32 %v4645_v36, 0.0  ;;  %v5208_v49 = vld [vmem:[%s6579_s23 + $0x38] sm:$0xff]  }
 0x359   : > { %v4664_v26 = vmax.f32 %v4648_v62, 0.0  ;;  %v4581_v8 = vmul.f32 %v6036_v51, %v7888_v22  ;;  %v6042_v25 = vadd.f32 %v7861_v29, %v5933_v30  ;;  %v4509_v53 = vpop.f32.mrb[67].mxu1 }
 0x35a   : > { %v4662_v38 = vmax.f32 %v4646_v60, 0.0  ;;  %v4579_v59 = vmul.f32 %v6039_v13, %v7888_v22  ;;  %v6045_v12 = vadd.f32 %v7855_v57, %v4509_v53  ;;  %v5207_v60 = vld [vmem:[%s6579_s23 + $0x30] sm:$0xff]  }
 0x35b   : > { %v5170_v40 = vpack.c.bf16 %v4664_v26, %v4663_v54  ;;  %v4603_v48 = vadd.f32 %v7898_v35, %v4581_v8  ;;  %v4582_v34 = vmul.f32 %v6042_v25, %v7888_v22  ;;  %v5160_v8 = vunpack.c.l.bf16 %v5208_v49 }
 0x35c   : > { %v5165_v56 = vpack.c.bf16 %v4662_v38, %v4661_v63  ;;  %v4601_v14 = vadd.f32 %v7898_v35, %v4579_v59  ;;  %v4580_v29 = vmul.f32 %v6045_v12, %v7888_v22  ;;  %v5156_v53 = vunpack.c.l.bf16 %v5207_v60 }
 0x35d   : > { %5209 = vst [vmem:[%s6527_s10 + $0x8] sm:$0xff] %v5170_v40   ;;  %v4651_v0 = vadd.f32 %v5144_v20, %v4603_v48  ;;  %v4604_v10 = vadd.f32 %v7898_v35, %v4582_v34 }
 0x35e   : > { %5166 = vst [vmem:[%s6527_s10] sm:$0xff] %v5165_v56   ;;  %v4649_v57 = vadd.f32 %v5140_v16, %v4601_v14  ;;  %v4602_v2 = vadd.f32 %v7898_v35, %v4580_v29  ;;  %v5936_v33 = vpop.f32.mrb[68].mxu1 }
 0x35f   : > { %v4652_v58 = vadd.f32 %v5145_v42, %v4604_v10  ;;  %v6048_v32 = vadd.f32 %v7871_v47, %v5936_v33  ;;  %v4522_v9 = vpop.f32.mrb[69].mxu1  ;;  %v4667_v17 = vmax.f32 %v4651_v0, 0.0 }
 0x360   : > { %v4650_v15 = vadd.f32 %v5141_v50, %v4602_v2  ;;  %v6051_v3 = vadd.f32 %v7865_v39, %v4522_v9  ;;  %v5937_v55 = vpop.f32.mrb[70].mxu1  ;;  %v4665_v46 = vmax.f32 %v4649_v57, 0.0  ;;  %v5161_v50 = vunpack.c.h.bf16 %v5208_v49 }
 0x361   : > { %v4668_v23 = vmax.f32 %v4652_v58, 0.0  ;;  %v4585_v7 = vmul.f32 %v6048_v32, %v7888_v22  ;;  %v6054_v5 = vadd.f32 %v7873_v44, %v5937_v55  ;;  %v4525_v4 = vpop.f32.mrb[71].mxu1 }
 0x362   : > { %v4666_v6 = vmax.f32 %v4650_v15, 0.0  ;;  %v4583_v47 = vmul.f32 %v6051_v3, %v7888_v22  ;;  %v6057_v19 = vadd.f32 %v7867_v37, %v4525_v4 }
 0x363   : > { %v5180_v39 = vpack.c.bf16 %v4668_v23, %v4667_v17  ;;  %v4607_v28 = vadd.f32 %v7898_v35, %v4585_v7  ;;  %v4586_v11 = vmul.f32 %v6054_v5, %v7888_v22 }
 0x364   : > { %v5175_v36 = vpack.c.bf16 %v4666_v6, %v4665_v46  ;;  %v4605_v27 = vadd.f32 %v7898_v35, %v4583_v47  ;;  %v4584_v44 = vmul.f32 %v6057_v19, %v7888_v22 }
 0x365   : > { %5211 = vst [vmem:[%s6527_s10 + $0x18] sm:$0xff] %v5180_v39   ;;  %v4655_v62 = vadd.f32 %v5152_v41, %v4607_v28  ;;  %v4608_v51 = vadd.f32 %v7898_v35, %v4586_v11 }
 0x366   : > { %5210 = vst [vmem:[%s6527_s10 + $0x10] sm:$0xff] %v5175_v36   ;;  %v4653_v37 = vadd.f32 %v5148_v45, %v4605_v27  ;;  %v4606_v20 = vadd.f32 %v7898_v35, %v4584_v44  ;;  %v5940_v13 = vpop.f32.mrb[72].mxu1 }
 0x367   : > { %v4656_v16 = vadd.f32 %v5153_v31, %v4608_v51  ;;  %v6060_v30 = vadd.f32 %v7883_v24, %v5940_v13  ;;  %v4538_v54 = vpop.f32.mrb[73].mxu1  ;;  %v4671_v38 = vmax.f32 %v4655_v62, 0.0 }
 0x368   : > { %v4654_v26 = vadd.f32 %v5149_v43, %v4606_v20  ;;  %v6063_v25 = vadd.f32 %v7877_v61, %v4538_v54  ;;  %v5941_v63 = vpop.f32.mrb[74].mxu1  ;;  %v4669_v34 = vmax.f32 %v4653_v37, 0.0 }
 0x369   : > { %v4672_v59 = vmax.f32 %v4656_v16, 0.0  ;;  %v4589_v12 = vmul.f32 %v6060_v30, %v7888_v22  ;;  %v6066_v40 = vadd.f32 %v7891_v21, %v5941_v63  ;;  %v4541_v48 = vpop.f32.mrb[75].mxu1  ;;  %v5157_v21 = vunpack.c.h.bf16 %v5207_v60 }
 0x36a   : > { %v4670_v42 = vmax.f32 %v4654_v26, 0.0  ;;  %v4587_v24 = vmul.f32 %v6063_v25, %v7888_v22  ;;  %v6069_v56 = vadd.f32 %v7879_v18, %v4541_v48 }
 0x36b   : > { %v5190_v14 = vpack.c.bf16 %v4672_v59, %v4671_v38  ;;  %v4611_v61 = vadd.f32 %v7898_v35, %v4589_v12  ;;  %v4590_v29 = vmul.f32 %v6066_v40, %v7888_v22 }
 0x36c   : > { %v5185_v0 = vpack.c.bf16 %v4670_v42, %v4669_v34  ;;  %v4609_v10 = vadd.f32 %v7898_v35, %v4587_v24  ;;  %v4588_v1 = vmul.f32 %v6069_v56, %v7888_v22 }
 0x36d   : > { %5213 = vst [vmem:[%s6527_s10 + $0x28] sm:$0xff] %v5190_v14   ;;  %v4659_v52 = vadd.f32 %v5160_v8, %v4611_v61  ;;  %v4612_v57 = vadd.f32 %v7898_v35, %v4590_v29 }
 0x36e   : > { %5212 = vst [vmem:[%s6527_s10 + $0x20] sm:$0xff] %v5185_v0   ;;  %v4657_v18 = vadd.f32 %v5156_v53, %v4609_v10  ;;  %v4610_v2 = vadd.f32 %v7898_v35, %v4588_v1 }
 0x36f   : > { %v4660_v33 = vadd.f32 %v5161_v50, %v4612_v57  ;;  %v4675_v32 = vmax.f32 %v4659_v52, 0.0 }
 0x370   : > { %v4658_v58 = vadd.f32 %v5157_v21, %v4610_v2  ;;  %v4673_v15 = vmax.f32 %v4657_v18, 0.0 }
 0x371   : > { %v4676_v9 = vmax.f32 %v4660_v33, 0.0 }
 0x372   : > { %v4674_v41 = vmax.f32 %v4658_v58, 0.0 }
 0x373   : > { %v5200_v3 = vpack.c.bf16 %v4676_v9, %v4675_v32 }
 0x374   : > { %v5195_v45 = vpack.c.bf16 %v4674_v41, %v4673_v15 }
 0x375   : > { %5215 = vst [vmem:[%s6527_s10 + $0x38] sm:$0xff] %v5200_v3  }
 0x376   : > { %5214 = vst [vmem:[%s6527_s10 + $0x30] sm:$0xff] %v5195_v45  }
 0x377 PF: > { %s19_s13 = sadd.s32 1, %s6354_s13   ;;  %s7996_s30 = smov %s6346_s11 }
 0x378   : > { %p16_p1 = scmp.ge.s32.totalorder %s19_s13, 6   ;;  %s7997_s10 = smov %s6350_s12 }
 0x379   : > { %s7998_s11 = smov %s8001_s14  ;;  %s7999_s12 = smov %s8005_s15 }
 0x37a   :  { %18 = sbr.rel (!%p16_p1) target bundleno = 3 (0x3), region = 104 }

</bundles_post_ra>
